<compile_context>
chip_gen: v6e
topology: v6e:2x2x1
jax: 0.10.0
libtpu: 0.0.40
codegen_flags: <defaults>
</compile_context>

<pallas_src>
import math
import functools

import jax
import jax.numpy as jnp
from jax.experimental import pallas as pl
from jax.experimental.pallas import tpu as pltpu

# Camera intrinsics K (constants from the PyTorch module)
FX, FY = 572.4114, 573.57043
CX, CY = 325.2611, 242.04899

_BIG = 1e30                                             # sentinel for invalid/padded points
_W_EDGE_CONST = 1.0 / math.sqrt(2.0 * math.pi) + 1.0    # edge weight when mask_edge == 0
_LANE = 128
_TS = 128          # src points per grid step (sublane axis of the matmul)
_CHUNK = 256       # tgt points per inner matmul chunk (lane axis)

WEIGHT_CHAMFER = 1.0
WEIGHT_MASK = 1.0


def _round_up(x, m):
    return (x + m - 1) // m * m


def _self_loss_kernel(src_ref, tgt_ref, pm_ref, ms_ref,          # inputs
                      cham_ref, mask_ref,                         # scalar outputs (SMEM)
                      colmin_ref, s1_ref, c1_ref,                 # VMEM scratch
                      *, n_chunks, chunk):
    si = pl.program_id(0)
    n_si = pl.num_programs(0)
    ts = src_ref.shape[0]

    # ---- one-time init + (constant-weight) mask BCE, first grid step only ----
    @pl.when(si == 0)
    def _init():
        colmin_ref[...] = jnp.full(colmin_ref.shape, _BIG, jnp.float32)
        s1_ref[...] = jnp.zeros(s1_ref.shape, jnp.float32)
        c1_ref[...] = jnp.zeros(c1_ref.shape, jnp.float32)

        # weighted_ex_loss_probs with the constant edge weight (see header note).
        target = ms_ref[...]
        probs = jnp.clip(pm_ref[...], 1e-7, 1.0 - 1e-7)
        pos = target > 0.0
        neg = target == 0.0
        pos_sum = jnp.sum(jnp.where(pos, -target * jnp.log(probs), 0.0)) * _W_EDGE_CONST
        neg_sum = jnp.sum(jnp.where(neg, -jnp.log(1.0 - probs), 0.0)) * _W_EDGE_CONST
        n_pos = jnp.sum(pos.astype(jnp.float32))
        n_neg = jnp.sum(neg.astype(jnp.float32))
        mask_ref[0, 0] = (
            jnp.where(n_pos > 0, pos_sum / jnp.maximum(n_pos, 1.0), 0.0)
            + jnp.where(n_neg > 0, neg_sum / jnp.maximum(n_neg, 1.0), 0.0))

    # ---- sweep the resident tgt slab in lane chunks; distances on the MXU ----
    s = src_ref[...]                                      # (TS, 8) augmented src features
    acc = jnp.full((ts, _LANE), _BIG, jnp.float32)        # src->tgt running min (in vregs)

    for c in range(n_chunks):
        lo = c * chunk
        t_chunk = tgt_ref[:, lo:lo + chunk]               # (8, CHUNK)
        # One matmul gives |s|^2 + |t|^2 - 2<s,t> (+ BIG for invalid/padded points).
        d = jnp.dot(s, t_chunk, preferred_element_type=jnp.float32)   # (TS, CHUNK)

        # src -> tgt: elementwise running min, 128-lane blocks (VPU only).
        for lb in range(chunk // _LANE):
            acc = jnp.minimum(acc, d[:, lb * _LANE:(lb + 1) * _LANE])

        # tgt -> src: sublane-partial min (pure vmin over TS/8 row groups),
        # folded into the (8, nt_pad) VMEM accumulator.  The 8->1 sublane
        # reduce is deferred to the final grid step.
        part = d[0:8, :]
        for g in range(1, ts // 8):
            part = jnp.minimum(part, d[g * 8:(g + 1) * 8, :])
        colmin_ref[:, lo:lo + chunk] = jnp.minimum(colmin_ref[:, lo:lo + chunk], part)

    # ---- finish this src tile: one lane reduce + masked partial sums ---------
    row_min = jnp.maximum(jnp.min(acc, axis=1, keepdims=True), 0.0)   # (TS, 1), clamp >= 0
    valid_s = s[:, 5:6] > 0.5
    s1_ref[...] += jnp.where(valid_s, row_min, 0.0)
    c1_ref[...] += valid_s.astype(jnp.float32)

    # ---- finalize the chamfer scalar on the very last step --------------------
    @pl.when(si == n_si - 1)
    def _finalize():
        sum1 = jnp.sum(s1_ref[...])
        cnt1 = jnp.sum(c1_ref[...])
        # tgt direction: single deferred 8->1 sublane reduce, clamp >= 0, mask, sum.
        col_min = jnp.maximum(jnp.min(colmin_ref[...], axis=0, keepdims=True), 0.0)
        valid_t = tgt_ref[6:7, :] > 0.5
        sum2 = jnp.sum(jnp.where(valid_t, col_min, 0.0))
        cnt2 = jnp.sum(valid_t.astype(jnp.float32))
        cham = sum1 / jnp.maximum(cnt1, 1.0) + sum2 / jnp.maximum(cnt2, 1.0)
        ok = (cnt1 > 0.0) & (cnt2 > 0.0)                  # guard empty point sets
        cham_ref[0, 0] = jnp.where(ok, cham, 0.0)


def _point_features(depth, n_pad, is_tgt):
    """Back-projected per-point augmented features (plain XLA glue).

    src (n_pad, 8) cols: [x, y, z, 1, base_s, valid_s, 0, 0]
    tgt (8, n_pad) rows: [-2x, -2y, -2z, base_t, 1, 0, valid_t, 0]
    so  src @ tgt = |s|^2 + |t|^2 - 2<s,t> + BIG*(invalid_s + invalid_t).
    """
    H, W = depth.shape
    d = depth.astype(jnp.float32).reshape(-1)
    u = jnp.broadcast_to(jnp.arange(W, dtype=jnp.float32)[None, :] - CX, (H, W)).reshape(-1)
    v = jnp.broadcast_to(jnp.arange(H, dtype=jnp.float32)[:, None] - CY, (H, W)).reshape(-1)
    pad = n_pad - d.shape[0]
    d = jnp.pad(d, (0, pad))
    u = jnp.pad(u, (0, pad))
    v = jnp.pad(v, (0, pad))
    x = u * d / FX
    y = v * d / FY
    z = d
    valid = (d > 0.0).astype(jnp.float32)                 # padded entries -> invalid
    base = x * x + y * y + z * z + _BIG * (1.0 - valid)
    ones = jnp.ones_like(d)
    zeros = jnp.zeros_like(d)
    if is_tgt:
        return jnp.stack([-2.0 * x, -2.0 * y, -2.0 * z, base, ones, zeros, valid, zeros],
                         axis=0)                           # (8, n_pad)
    return jnp.stack([x, y, z, ones, base, valid, zeros, zeros], axis=1)    # (n_pad, 8)


def self_loss_forward(pred_PM, pred_Ms, depth_src, depth_tgt):
    """JAX wrapper matching SelfLoss.forward (returns (cham_loss, mask_loss))."""
    assert pred_PM.shape == pred_Ms.shape
    Hm, Wm = pred_PM.shape[-2:]
    pm2d = pred_PM.reshape(Hm, Wm).astype(jnp.float32)
    ms2d = pred_Ms.reshape(Hm, Wm).astype(jnp.float32)

    n_s = depth_src.shape[0] * depth_src.shape[1]
    n_t = depth_tgt.shape[0] * depth_tgt.shape[1]

    ns_pad = _round_up(n_s, _TS)
    nt_pad = _round_up(n_t, _CHUNK)
    n_si = ns_pad // _TS
    n_chunks = nt_pad // _CHUNK

    src_feat = _point_features(depth_src, ns_pad, is_tgt=False)   # (ns_pad, 8)
    tgt_feat = _point_features(depth_tgt, nt_pad, is_tgt=True)    # (8, nt_pad)

    cost = pl.CostEstimate(
        flops=int(2 * ns_pad * nt_pad * 8 + 4 * ns_pad * nt_pad),
        transcendentals=int(2 * Hm * Wm),
        bytes_accessed=int(4 * (ns_pad * 8 + 8 * nt_pad + 2 * Hm * Wm) + 8),
    )

    grid_spec = pltpu.PrefetchScalarGridSpec(
        num_scalar_prefetch=0,
        grid=(n_si,),
        in_specs=[
            pl.BlockSpec((_TS, 8), lambda i: (i, 0)),             # src point tile (streamed)
            pl.BlockSpec((8, nt_pad), lambda i: (0, 0)),          # full tgt slab (resident)
            pl.BlockSpec((Hm, Wm), lambda i: (0, 0)),             # pred_PM (resident)
            pl.BlockSpec((Hm, Wm), lambda i: (0, 0)),             # pred_Ms (resident)
        ],
        out_specs=(
            pl.BlockSpec((1, 1), lambda i: (0, 0),
                         memory_space=pltpu.MemorySpace.SMEM),    # chamfer loss
            pl.BlockSpec((1, 1), lambda i: (0, 0),
                         memory_space=pltpu.MemorySpace.SMEM),    # mask loss
        ),
        scratch_shapes=[
            pltpu.VMEM((8, nt_pad), jnp.float32),   # tgt-direction sublane-partial mins
            pltpu.VMEM((_TS, 1), jnp.float32),      # masked src-direction partial sums
            pltpu.VMEM((_TS, 1), jnp.float32),      # valid-src counts
        ],
    )

    cham, mask = pl.pallas_call(
        functools.partial(_self_loss_kernel, n_chunks=n_chunks, chunk=_CHUNK),
        grid_spec=grid_spec,
        out_shape=(jax.ShapeDtypeStruct((1, 1), jnp.float32),
                   jax.ShapeDtypeStruct((1, 1), jnp.float32)),
        compiler_params=pltpu.CompilerParams(
            dimension_semantics=("arbitrary",)),
        cost_estimate=cost,
    )(src_feat, tgt_feat, pm2d, ms2d)

    return WEIGHT_CHAMFER * cham[0, 0], WEIGHT_MASK * mask[0, 0]


if __name__ == "__main__":
    # Small shapes consistent with the module (masks are 1HW, depths are HW;
    # module defaults are 120x160, scaled down here but still multi-tile).
    H, W = 40, 60
    key = jax.random.PRNGKey(0)
    k1, k2, k3, k4 = jax.random.split(key, 4)
    pred_PM = jax.nn.sigmoid(jax.random.normal(k1, (1, H, W), jnp.float32))     # probs in (0,1)
    pred_Ms = (jax.random.uniform(k2, (1, H, W)) > 0.5).astype(jnp.float32)      # binary mask
    depth_src = jax.random.uniform(k3, (H, W), minval=0.0, maxval=2.0)
    depth_tgt = jax.random.uniform(k4, (H, W), minval=0.0, maxval=2.0)
    # zero out some depths to exercise the z > 0 validity path
    depth_src = jnp.where(depth_src < 0.3, 0.0, depth_src)
    depth_tgt = jnp.where(depth_tgt < 0.3, 0.0, depth_tgt)

    cham_loss, mask_loss = jax.jit(self_loss_forward)(pred_PM, pred_Ms, depth_src, depth_tgt)
    jax.block_until_ready((cham_loss, mask_loss))
    print("KERNEL_OK")
</pallas_src>

<mosaic_0001>
module attributes {stable_mosaic.version = 11 : i64} {
  func.func @_self_loss_kernel(%arg0: i32, %arg1: memref<128x8xf32, #tpu.memory_space<vmem>>, %arg2: memref<8x2560xf32, #tpu.memory_space<vmem>>, %arg3: memref<40x60xf32, #tpu.memory_space<vmem>>, %arg4: memref<40x60xf32, #tpu.memory_space<vmem>>, %arg5: memref<1x1xf32, #tpu.memory_space<smem>>, %arg6: memref<1x1xf32, #tpu.memory_space<smem>>, %arg7: memref<8x2560xf32, #tpu.memory_space<vmem>>, %arg8: memref<128x1xf32, #tpu.memory_space<vmem>>, %arg9: memref<128x1xf32, #tpu.memory_space<vmem>>) attributes {dimension_semantics = [#tpu.dimension_semantics<arbitrary>], iteration_bounds = array<i64: 19>, scalar_prefetch = 0 : i64, scratch_operands = 3 : i64, tpu.core_type = #tpu.core_type<tc>, window_params = [{transform_indices = @transform_0, window_bounds = array<i64: 128, 8>}, {pipeline_mode = #tpu.pipeline_mode<synchronous>, transform_indices = @transform_1, window_bounds = array<i64: 8, 2560>}, {pipeline_mode = #tpu.pipeline_mode<synchronous>, transform_indices = @transform_2, window_bounds = array<i64: 40, 60>}, {pipeline_mode = #tpu.pipeline_mode<synchronous>, transform_indices = @transform_3, window_bounds = array<i64: 40, 60>}, {transform_indices = @transform_4, window_bounds = array<i64: 1, 1>}, {transform_indices = @transform_5, window_bounds = array<i64: 1, 1>}]} {
    %c0_i32 = arith.constant 0 : i32
    %0 = arith.cmpi eq, %arg0, %c0_i32 : i32
    %1 = arith.extui %0 : i1 to i32
    %c0_i32_0 = arith.constant 0 : i32
    %2 = arith.cmpi ne, %1, %c0_i32_0 : i32
    scf.if %2 {
      %cst_76 = arith.constant 1.000000e+30 : f32
      %425 = vector.broadcast %cst_76 : f32 to vector<8x2560xf32>
      %c0_77 = arith.constant 0 : index
      %c0_78 = arith.constant 0 : index
      %426 = vector.load %arg7[%c0_77, %c0_78] : memref<8x2560xf32, #tpu.memory_space<vmem>>, vector<8x2560xf32>
      tpu.vector_store %arg7[%c0_77, %c0_78], %425 {strides = array<i32>} : memref<8x2560xf32, #tpu.memory_space<vmem>>, vector<8x2560xf32>,
      %cst_79 = arith.constant 0.000000e+00 : f32
      %427 = vector.broadcast %cst_79 : f32 to vector<128x1xf32>
      %c0_80 = arith.constant 0 : index
      %c0_81 = arith.constant 0 : index
      %428 = vector.load %arg8[%c0_80, %c0_81] : memref<128x1xf32, #tpu.memory_space<vmem>>, vector<128x1xf32>
      tpu.vector_store %arg8[%c0_80, %c0_81], %427 {strides = array<i32>} : memref<128x1xf32, #tpu.memory_space<vmem>>, vector<128x1xf32>,
      %cst_82 = arith.constant 0.000000e+00 : f32
      %429 = vector.broadcast %cst_82 : f32 to vector<128x1xf32>
      %c0_83 = arith.constant 0 : index
      %c0_84 = arith.constant 0 : index
      %430 = vector.load %arg9[%c0_83, %c0_84] : memref<128x1xf32, #tpu.memory_space<vmem>>, vector<128x1xf32>
      tpu.vector_store %arg9[%c0_83, %c0_84], %429 {strides = array<i32>} : memref<128x1xf32, #tpu.memory_space<vmem>>, vector<128x1xf32>,
      %c0_85 = arith.constant 0 : index
      %c0_86 = arith.constant 0 : index
      %431 = vector.load %arg4[%c0_85, %c0_86] : memref<40x60xf32, #tpu.memory_space<vmem>>, vector<40x60xf32>
      %c0_87 = arith.constant 0 : index
      %c0_88 = arith.constant 0 : index
      %432 = vector.load %arg3[%c0_87, %c0_88] : memref<40x60xf32, #tpu.memory_space<vmem>>, vector<40x60xf32>
      %cst_89 = arith.constant 1.000000e-07 : f32
      %cst_90 = arith.constant 0.99999988 : f32
      %433 = vector.broadcast %cst_89 : f32 to vector<40x60xf32>
      %434 = arith.maximumf %433, %432 : vector<40x60xf32>
      %435 = vector.broadcast %cst_90 : f32 to vector<40x60xf32>
      %436 = arith.minimumf %435, %434 : vector<40x60xf32>
      %cst_91 = arith.constant 0.000000e+00 : f32
      %437 = vector.broadcast %cst_91 : f32 to vector<40x60xf32>
      %438 = arith.cmpf ogt, %431, %437 : vector<40x60xf32>
      %cst_92 = arith.constant 0.000000e+00 : f32
      %439 = vector.broadcast %cst_92 : f32 to vector<40x60xf32>
      %440 = arith.cmpf oeq, %431, %439 : vector<40x60xf32>
      %cst_93 = arith.constant 0.000000e+00 : f32
      %441 = vector.broadcast %cst_93 : f32 to vector<40x60xf32>
      %442 = arith.subf %441, %431 : vector<40x60xf32>
      %443 = math.log %436 : vector<40x60xf32>
      %444 = arith.mulf %442, %443 : vector<40x60xf32>
      %cst_94 = arith.constant 0.000000e+00 : f32
      %445 = vector.broadcast %cst_94 : f32 to vector<40x60xf32>
      %446 = arith.select %438, %444, %445 : vector<40x60xi1>, vector<40x60xf32>
      %447 = vector.shape_cast %446 : vector<40x60xf32> to vector<1x40x60xf32>
      %cst_95 = arith.constant dense<0.000000e+00> : vector<1xf32>
      %448 = vector.multi_reduction <add>, %447, %cst_95 [1, 2] : vector<1x40x60xf32> to vector<1xf32>
      %449 = vector.shape_cast %448 : vector<1xf32> to vector<1x1x1xf32>
      %450 = vector.extract %449[0, 0, 0] : f32 from vector<1x1x1xf32>
      %cst_96 = arith.constant 1.39894223 : f32
      %451 = arith.mulf %450, %cst_96 : f32
      %cst_97 = arith.constant 1.000000e+00 : f32
      %452 = vector.broadcast %cst_97 : f32 to vector<40x60xf32>
      %453 = arith.subf %452, %436 : vector<40x60xf32>
      %454 = math.log %453 : vector<40x60xf32>
      %cst_98 = arith.constant 0.000000e+00 : f32
      %455 = vector.broadcast %cst_98 : f32 to vector<40x60xf32>
      %456 = arith.subf %455, %454 : vector<40x60xf32>
      %cst_99 = arith.constant 0.000000e+00 : f32
      %457 = vector.broadcast %cst_99 : f32 to vector<40x60xf32>
      %458 = arith.select %440, %456, %457 : vector<40x60xi1>, vector<40x60xf32>
      %459 = vector.shape_cast %458 : vector<40x60xf32> to vector<1x40x60xf32>
      %cst_100 = arith.constant dense<0.000000e+00> : vector<1xf32>
      %460 = vector.multi_reduction <add>, %459, %cst_100 [1, 2] : vector<1x40x60xf32> to vector<1xf32>
      %461 = vector.shape_cast %460 : vector<1xf32> to vector<1x1x1xf32>
      %462 = vector.extract %461[0, 0, 0] : f32 from vector<1x1x1xf32>
      %cst_101 = arith.constant 1.39894223 : f32
      %463 = arith.mulf %462, %cst_101 : f32
      %464 = arith.extui %438 : vector<40x60xi1> to vector<40x60xi32>
      %465 = arith.sitofp %464 : vector<40x60xi32> to vector<40x60xf32>
      %466 = vector.shape_cast %465 : vector<40x60xf32> to vector<1x40x60xf32>
      %cst_102 = arith.constant dense<0.000000e+00> : vector<1xf32>
      %467 = vector.multi_reduction <add>, %466, %cst_102 [1, 2] : vector<1x40x60xf32> to vector<1xf32>
      %468 = vector.shape_cast %467 : vector<1xf32> to vector<1x1x1xf32>
      %469 = vector.extract %468[0, 0, 0] : f32 from vector<1x1x1xf32>
      %470 = arith.extui %440 : vector<40x60xi1> to vector<40x60xi32>
      %471 = arith.sitofp %470 : vector<40x60xi32> to vector<40x60xf32>
      %472 = vector.shape_cast %471 : vector<40x60xf32> to vector<1x40x60xf32>
      %cst_103 = arith.constant dense<0.000000e+00> : vector<1xf32>
      %473 = vector.multi_reduction <add>, %472, %cst_103 [1, 2] : vector<1x40x60xf32> to vector<1xf32>
      %474 = vector.shape_cast %473 : vector<1xf32> to vector<1x1x1xf32>
      %475 = vector.extract %474[0, 0, 0] : f32 from vector<1x1x1xf32>
      %cst_104 = arith.constant 0.000000e+00 : f32
      %476 = arith.cmpf ogt, %469, %cst_104 : f32
      %cst_105 = arith.constant 1.000000e+00 : f32
      %477 = arith.maximumf %469, %cst_105 : f32
      %478 = arith.divf %451, %477 : f32
      %cst_106 = arith.constant 0.000000e+00 : f32
      %479 = arith.select %476, %478, %cst_106 : f32
      %cst_107 = arith.constant 0.000000e+00 : f32
      %480 = arith.cmpf ogt, %475, %cst_107 : f32
      %cst_108 = arith.constant 1.000000e+00 : f32
      %481 = arith.maximumf %475, %cst_108 : f32
      %482 = arith.divf %463, %481 : f32
      %cst_109 = arith.constant 0.000000e+00 : f32
      %483 = arith.select %480, %482, %cst_109 : f32
      %484 = arith.addf %479, %483 : f32
      %c0_110 = arith.constant 0 : index
      %c0_111 = arith.constant 0 : index
      %485 = memref.load %arg6[%c0_110, %c0_111] : memref<1x1xf32, #tpu.memory_space<smem>>
      memref.store %484, %arg6[%c0_110, %c0_111] : memref<1x1xf32, #tpu.memory_space<smem>>
    } else {
    }
    %c0 = arith.constant 0 : index
    %c0_1 = arith.constant 0 : index
    %3 = vector.load %arg1[%c0, %c0_1] : memref<128x8xf32, #tpu.memory_space<vmem>>, vector<128x8xf32>
    %cst = arith.constant 1.000000e+30 : f32
    %4 = vector.broadcast %cst : f32 to vector<128x128xf32>
    %c0_2 = arith.constant 0 : index
    %c0_3 = arith.constant 0 : index
    %5 = vector.load %arg2[%c0_2, %c0_3] : memref<8x2560xf32, #tpu.memory_space<vmem>>, vector<8x256xf32>
    %cst_4 = arith.constant dense<0.000000e+00> : vector<128x256xf32>
    %6 = tpu.matmul %3, %5, %cst_4 {dimension_numbers = #tpu.dot_dimension_numbers<[1], [0], [0], [1], [0, 0, 1, 1], [], []>} : vector<128x8xf32>, vector<8x256xf32>, vector<128x256xf32> -> vector<128x256xf32>
    %7 = vector.extract_strided_slice %6 {offsets = [0, 0], sizes = [128, 128], strides = [1, 1]} : vector<128x256xf32> to vector<128x128xf32>
    %8 = arith.minimumf %4, %7 : vector<128x128xf32>
    %9 = vector.extract_strided_slice %6 {offsets = [0, 128], sizes = [128, 128], strides = [1, 1]} : vector<128x256xf32> to vector<128x128xf32>
    %10 = arith.minimumf %8, %9 : vector<128x128xf32>
    %11 = vector.extract_strided_slice %6 {offsets = [0, 0], sizes = [8, 256], strides = [1, 1]} : vector<128x256xf32> to vector<8x256xf32>
    %12 = vector.extract_strided_slice %6 {offsets = [8, 0], sizes = [8, 256], strides = [1, 1]} : vector<128x256xf32> to vector<8x256xf32>
    %13 = arith.minimumf %11, %12 : vector<8x256xf32>
    %14 = vector.extract_strided_slice %6 {offsets = [16, 0], sizes = [8, 256], strides = [1, 1]} : vector<128x256xf32> to vector<8x256xf32>
    %15 = arith.minimumf %13, %14 : vector<8x256xf32>
    %16 = vector.extract_strided_slice %6 {offsets = [24, 0], sizes = [8, 256], strides = [1, 1]} : vector<128x256xf32> to vector<8x256xf32>
    %17 = arith.minimumf %15, %16 : vector<8x256xf32>
    %18 = vector.extract_strided_slice %6 {offsets = [32, 0], sizes = [8, 256], strides = [1, 1]} : vector<128x256xf32> to vector<8x256xf32>
    %19 = arith.minimumf %17, %18 : vector<8x256xf32>
    %20 = vector.extract_strided_slice %6 {offsets = [40, 0], sizes = [8, 256], strides = [1, 1]} : vector<128x256xf32> to vector<8x256xf32>
    %21 = arith.minimumf %19, %20 : vector<8x256xf32>
    %22 = vector.extract_strided_slice %6 {offsets = [48, 0], sizes = [8, 256], strides = [1, 1]} : vector<128x256xf32> to vector<8x256xf32>
    %23 = arith.minimumf %21, %22 : vector<8x256xf32>
    %24 = vector.extract_strided_slice %6 {offsets = [56, 0], sizes = [8, 256], strides = [1, 1]} : vector<128x256xf32> to vector<8x256xf32>
    %25 = arith.minimumf %23, %24 : vector<8x256xf32>
    %26 = vector.extract_strided_slice %6 {offsets = [64, 0], sizes = [8, 256], strides = [1, 1]} : vector<128x256xf32> to vector<8x256xf32>
    %27 = arith.minimumf %25, %26 : vector<8x256xf32>
    %28 = vector.extract_strided_slice %6 {offsets = [72, 0], sizes = [8, 256], strides = [1, 1]} : vector<128x256xf32> to vector<8x256xf32>
    %29 = arith.minimumf %27, %28 : vector<8x256xf32>
    %30 = vector.extract_strided_slice %6 {offsets = [80, 0], sizes = [8, 256], strides = [1, 1]} : vector<128x256xf32> to vector<8x256xf32>
    %31 = arith.minimumf %29, %30 : vector<8x256xf32>
    %32 = vector.extract_strided_slice %6 {offsets = [88, 0], sizes = [8, 256], strides = [1, 1]} : vector<128x256xf32> to vector<8x256xf32>
    %33 = arith.minimumf %31, %32 : vector<8x256xf32>
    %34 = vector.extract_strided_slice %6 {offsets = [96, 0], sizes = [8, 256], strides = [1, 1]} : vector<128x256xf32> to vector<8x256xf32>
    %35 = arith.minimumf %33, %34 : vector<8x256xf32>
    %36 = vector.extract_strided_slice %6 {offsets = [104, 0], sizes = [8, 256], strides = [1, 1]} : vector<128x256xf32> to vector<8x256xf32>
    %37 = arith.minimumf %35, %36 : vector<8x256xf32>
    %38 = vector.extract_strided_slice %6 {offsets = [112, 0], sizes = [8, 256], strides = [1, 1]} : vector<128x256xf32> to vector<8x256xf32>
    %39 = arith.minimumf %37, %38 : vector<8x256xf32>
    %40 = vector.extract_strided_slice %6 {offsets = [120, 0], sizes = [8, 256], strides = [1, 1]} : vector<128x256xf32> to vector<8x256xf32>
    %41 = arith.minimumf %39, %40 : vector<8x256xf32>
    %c0_5 = arith.constant 0 : index
    %c0_6 = arith.constant 0 : index
    %42 = vector.load %arg7[%c0_5, %c0_6] : memref<8x2560xf32, #tpu.memory_space<vmem>>, vector<8x256xf32>
    %43 = arith.minimumf %42, %41 : vector<8x256xf32>
    %c0_7 = arith.constant 0 : index
    %c0_8 = arith.constant 0 : index
    %44 = vector.load %arg7[%c0_7, %c0_8] : memref<8x2560xf32, #tpu.memory_space<vmem>>, vector<8x256xf32>
    tpu.vector_store %arg7[%c0_7, %c0_8], %43 {strides = array<i32>} : memref<8x2560xf32, #tpu.memory_space<vmem>>, vector<8x256xf32>,
    %c0_9 = arith.constant 0 : index
    %c256 = arith.constant 256 : index
    %45 = vector.load %arg2[%c0_9, %c256] : memref<8x2560xf32, #tpu.memory_space<vmem>>, vector<8x256xf32>
    %cst_10 = arith.constant dense<0.000000e+00> : vector<128x256xf32>
    %46 = tpu.matmul %3, %45, %cst_10 {dimension_numbers = #tpu.dot_dimension_numbers<[1], [0], [0], [1], [0, 0, 1, 1], [], []>} : vector<128x8xf32>, vector<8x256xf32>, vector<128x256xf32> -> vector<128x256xf32>
    %47 = vector.extract_strided_slice %46 {offsets = [0, 0], sizes = [128, 128], strides = [1, 1]} : vector<128x256xf32> to vector<128x128xf32>
    %48 = arith.minimumf %10, %47 : vector<128x128xf32>
    %49 = vector.extract_strided_slice %46 {offsets = [0, 128], sizes = [128, 128], strides = [1, 1]} : vector<128x256xf32> to vector<128x128xf32>
    %50 = arith.minimumf %48, %49 : vector<128x128xf32>
    %51 = vector.extract_strided_slice %46 {offsets = [0, 0], sizes = [8, 256], strides = [1, 1]} : vector<128x256xf32> to vector<8x256xf32>
    %52 = vector.extract_strided_slice %46 {offsets = [8, 0], sizes = [8, 256], strides = [1, 1]} : vector<128x256xf32> to vector<8x256xf32>
    %53 = arith.minimumf %51, %52 : vector<8x256xf32>
    %54 = vector.extract_strided_slice %46 {offsets = [16, 0], sizes = [8, 256], strides = [1, 1]} : vector<128x256xf32> to vector<8x256xf32>
    %55 = arith.minimumf %53, %54 : vector<8x256xf32>
    %56 = vector.extract_strided_slice %46 {offsets = [24, 0], sizes = [8, 256], strides = [1, 1]} : vector<128x256xf32> to vector<8x256xf32>
    %57 = arith.minimumf %55, %56 : vector<8x256xf32>
    %58 = vector.extract_strided_slice %46 {offsets = [32, 0], sizes = [8, 256], strides = [1, 1]} : vector<128x256xf32> to vector<8x256xf32>
    %59 = arith.minimumf %57, %58 : vector<8x256xf32>
    %60 = vector.extract_strided_slice %46 {offsets = [40, 0], sizes = [8, 256], strides = [1, 1]} : vector<128x256xf32> to vector<8x256xf32>
    %61 = arith.minimumf %59, %60 : vector<8x256xf32>
    %62 = vector.extract_strided_slice %46 {offsets = [48, 0], sizes = [8, 256], strides = [1, 1]} : vector<128x256xf32> to vector<8x256xf32>
    %63 = arith.minimumf %61, %62 : vector<8x256xf32>
    %64 = vector.extract_strided_slice %46 {offsets = [56, 0], sizes = [8, 256], strides = [1, 1]} : vector<128x256xf32> to vector<8x256xf32>
    %65 = arith.minimumf %63, %64 : vector<8x256xf32>
    %66 = vector.extract_strided_slice %46 {offsets = [64, 0], sizes = [8, 256], strides = [1, 1]} : vector<128x256xf32> to vector<8x256xf32>
    %67 = arith.minimumf %65, %66 : vector<8x256xf32>
    %68 = vector.extract_strided_slice %46 {offsets = [72, 0], sizes = [8, 256], strides = [1, 1]} : vector<128x256xf32> to vector<8x256xf32>
    %69 = arith.minimumf %67, %68 : vector<8x256xf32>
    %70 = vector.extract_strided_slice %46 {offsets = [80, 0], sizes = [8, 256], strides = [1, 1]} : vector<128x256xf32> to vector<8x256xf32>
    %71 = arith.minimumf %69, %70 : vector<8x256xf32>
    %72 = vector.extract_strided_slice %46 {offsets = [88, 0], sizes = [8, 256], strides = [1, 1]} : vector<128x256xf32> to vector<8x256xf32>
    %73 = arith.minimumf %71, %72 : vector<8x256xf32>
    %74 = vector.extract_strided_slice %46 {offsets = [96, 0], sizes = [8, 256], strides = [1, 1]} : vector<128x256xf32> to vector<8x256xf32>
    %75 = arith.minimumf %73, %74 : vector<8x256xf32>
    %76 = vector.extract_strided_slice %46 {offsets = [104, 0], sizes = [8, 256], strides = [1, 1]} : vector<128x256xf32> to vector<8x256xf32>
    %77 = arith.minimumf %75, %76 : vector<8x256xf32>
    %78 = vector.extract_strided_slice %46 {offsets = [112, 0], sizes = [8, 256], strides = [1, 1]} : vector<128x256xf32> to vector<8x256xf32>
    %79 = arith.minimumf %77, %78 : vector<8x256xf32>
    %80 = vector.extract_strided_slice %46 {offsets = [120, 0], sizes = [8, 256], strides = [1, 1]} : vector<128x256xf32> to vector<8x256xf32>
    %81 = arith.minimumf %79, %80 : vector<8x256xf32>
    %c0_11 = arith.constant 0 : index
    %c256_12 = arith.constant 256 : index
    %82 = vector.load %arg7[%c0_11, %c256_12] : memref<8x2560xf32, #tpu.memory_space<vmem>>, vector<8x256xf32>
    %83 = arith.minimumf %82, %81 : vector<8x256xf32>
    %c0_13 = arith.constant 0 : index
    %c256_14 = arith.constant 256 : index
    %84 = vector.load %arg7[%c0_13, %c256_14] : memref<8x2560xf32, #tpu.memory_space<vmem>>, vector<8x256xf32>
    tpu.vector_store %arg7[%c0_13, %c256_14], %83 {strides = array<i32>} : memref<8x2560xf32, #tpu.memory_space<vmem>>, vector<8x256xf32>,
    %c0_15 = arith.constant 0 : index
    %c512 = arith.constant 512 : index
    %85 = vector.load %arg2[%c0_15, %c512] : memref<8x2560xf32, #tpu.memory_space<vmem>>, vector<8x256xf32>
    %cst_16 = arith.constant dense<0.000000e+00> : vector<128x256xf32>
    %86 = tpu.matmul %3, %85, %cst_16 {dimension_numbers = #tpu.dot_dimension_numbers<[1], [0], [0], [1], [0, 0, 1, 1], [], []>} : vector<128x8xf32>, vector<8x256xf32>, vector<128x256xf32> -> vector<128x256xf32>
    %87 = vector.extract_strided_slice %86 {offsets = [0, 0], sizes = [128, 128], strides = [1, 1]} : vector<128x256xf32> to vector<128x128xf32>
    %88 = arith.minimumf %50, %87 : vector<128x128xf32>
    %89 = vector.extract_strided_slice %86 {offsets = [0, 128], sizes = [128, 128], strides = [1, 1]} : vector<128x256xf32> to vector<128x128xf32>
    %90 = arith.minimumf %88, %89 : vector<128x128xf32>
    %91 = vector.extract_strided_slice %86 {offsets = [0, 0], sizes = [8, 256], strides = [1, 1]} : vector<128x256xf32> to vector<8x256xf32>
    %92 = vector.extract_strided_slice %86 {offsets = [8, 0], sizes = [8, 256], strides = [1, 1]} : vector<128x256xf32> to vector<8x256xf32>
    %93 = arith.minimumf %91, %92 : vector<8x256xf32>
    %94 = vector.extract_strided_slice %86 {offsets = [16, 0], sizes = [8, 256], strides = [1, 1]} : vector<128x256xf32> to vector<8x256xf32>
    %95 = arith.minimumf %93, %94 : vector<8x256xf32>
    %96 = vector.extract_strided_slice %86 {offsets = [24, 0], sizes = [8, 256], strides = [1, 1]} : vector<128x256xf32> to vector<8x256xf32>
    %97 = arith.minimumf %95, %96 : vector<8x256xf32>
    %98 = vector.extract_strided_slice %86 {offsets = [32, 0], sizes = [8, 256], strides = [1, 1]} : vector<128x256xf32> to vector<8x256xf32>
    %99 = arith.minimumf %97, %98 : vector<8x256xf32>
    %100 = vector.extract_strided_slice %86 {offsets = [40, 0], sizes = [8, 256], strides = [1, 1]} : vector<128x256xf32> to vector<8x256xf32>
    %101 = arith.minimumf %99, %100 : vector<8x256xf32>
    %102 = vector.extract_strided_slice %86 {offsets = [48, 0], sizes = [8, 256], strides = [1, 1]} : vector<128x256xf32> to vector<8x256xf32>
    %103 = arith.minimumf %101, %102 : vector<8x256xf32>
    %104 = vector.extract_strided_slice %86 {offsets = [56, 0], sizes = [8, 256], strides = [1, 1]} : vector<128x256xf32> to vector<8x256xf32>
    %105 = arith.minimumf %103, %104 : vector<8x256xf32>
    %106 = vector.extract_strided_slice %86 {offsets = [64, 0], sizes = [8, 256], strides = [1, 1]} : vector<128x256xf32> to vector<8x256xf32>
    %107 = arith.minimumf %105, %106 : vector<8x256xf32>
    %108 = vector.extract_strided_slice %86 {offsets = [72, 0], sizes = [8, 256], strides = [1, 1]} : vector<128x256xf32> to vector<8x256xf32>
    %109 = arith.minimumf %107, %108 : vector<8x256xf32>
    %110 = vector.extract_strided_slice %86 {offsets = [80, 0], sizes = [8, 256], strides = [1, 1]} : vector<128x256xf32> to vector<8x256xf32>
    %111 = arith.minimumf %109, %110 : vector<8x256xf32>
    %112 = vector.extract_strided_slice %86 {offsets = [88, 0], sizes = [8, 256], strides = [1, 1]} : vector<128x256xf32> to vector<8x256xf32>
    %113 = arith.minimumf %111, %112 : vector<8x256xf32>
    %114 = vector.extract_strided_slice %86 {offsets = [96, 0], sizes = [8, 256], strides = [1, 1]} : vector<128x256xf32> to vector<8x256xf32>
    %115 = arith.minimumf %113, %114 : vector<8x256xf32>
    %116 = vector.extract_strided_slice %86 {offsets = [104, 0], sizes = [8, 256], strides = [1, 1]} : vector<128x256xf32> to vector<8x256xf32>
    %117 = arith.minimumf %115, %116 : vector<8x256xf32>
    %118 = vector.extract_strided_slice %86 {offsets = [112, 0], sizes = [8, 256], strides = [1, 1]} : vector<128x256xf32> to vector<8x256xf32>
    %119 = arith.minimumf %117, %118 : vector<8x256xf32>
    %120 = vector.extract_strided_slice %86 {offsets = [120, 0], sizes = [8, 256], strides = [1, 1]} : vector<128x256xf32> to vector<8x256xf32>
    %121 = arith.minimumf %119, %120 : vector<8x256xf32>
    %c0_17 = arith.constant 0 : index
    %c512_18 = arith.constant 512 : index
    %122 = vector.load %arg7[%c0_17, %c512_18] : memref<8x2560xf32, #tpu.memory_space<vmem>>, vector<8x256xf32>
    %123 = arith.minimumf %122, %121 : vector<8x256xf32>
    %c0_19 = arith.constant 0 : index
    %c512_20 = arith.constant 512 : index
    %124 = vector.load %arg7[%c0_19, %c512_20] : memref<8x2560xf32, #tpu.memory_space<vmem>>, vector<8x256xf32>
    tpu.vector_store %arg7[%c0_19, %c512_20], %123 {strides = array<i32>} : memref<8x2560xf32, #tpu.memory_space<vmem>>, vector<8x256xf32>,
    %c0_21 = arith.constant 0 : index
    %c768 = arith.constant 768 : index
    %125 = vector.load %arg2[%c0_21, %c768] : memref<8x2560xf32, #tpu.memory_space<vmem>>, vector<8x256xf32>
    %cst_22 = arith.constant dense<0.000000e+00> : vector<128x256xf32>
    %126 = tpu.matmul %3, %125, %cst_22 {dimension_numbers = #tpu.dot_dimension_numbers<[1], [0], [0], [1], [0, 0, 1, 1], [], []>} : vector<128x8xf32>, vector<8x256xf32>, vector<128x256xf32> -> vector<128x256xf32>
    %127 = vector.extract_strided_slice %126 {offsets = [0, 0], sizes = [128, 128], strides = [1, 1]} : vector<128x256xf32> to vector<128x128xf32>
    %128 = arith.minimumf %90, %127 : vector<128x128xf32>
    %129 = vector.extract_strided_slice %126 {offsets = [0, 128], sizes = [128, 128], strides = [1, 1]} : vector<128x256xf32> to vector<128x128xf32>
    %130 = arith.minimumf %128, %129 : vector<128x128xf32>
    %131 = vector.extract_strided_slice %126 {offsets = [0, 0], sizes = [8, 256], strides = [1, 1]} : vector<128x256xf32> to vector<8x256xf32>
    %132 = vector.extract_strided_slice %126 {offsets = [8, 0], sizes = [8, 256], strides = [1, 1]} : vector<128x256xf32> to vector<8x256xf32>
    %133 = arith.minimumf %131, %132 : vector<8x256xf32>
    %134 = vector.extract_strided_slice %126 {offsets = [16, 0], sizes = [8, 256], strides = [1, 1]} : vector<128x256xf32> to vector<8x256xf32>
    %135 = arith.minimumf %133, %134 : vector<8x256xf32>
    %136 = vector.extract_strided_slice %126 {offsets = [24, 0], sizes = [8, 256], strides = [1, 1]} : vector<128x256xf32> to vector<8x256xf32>
    %137 = arith.minimumf %135, %136 : vector<8x256xf32>
    %138 = vector.extract_strided_slice %126 {offsets = [32, 0], sizes = [8, 256], strides = [1, 1]} : vector<128x256xf32> to vector<8x256xf32>
    %139 = arith.minimumf %137, %138 : vector<8x256xf32>
    %140 = vector.extract_strided_slice %126 {offsets = [40, 0], sizes = [8, 256], strides = [1, 1]} : vector<128x256xf32> to vector<8x256xf32>
    %141 = arith.minimumf %139, %140 : vector<8x256xf32>
    %142 = vector.extract_strided_slice %126 {offsets = [48, 0], sizes = [8, 256], strides = [1, 1]} : vector<128x256xf32> to vector<8x256xf32>
    %143 = arith.minimumf %141, %142 : vector<8x256xf32>
    %144 = vector.extract_strided_slice %126 {offsets = [56, 0], sizes = [8, 256], strides = [1, 1]} : vector<128x256xf32> to vector<8x256xf32>
    %145 = arith.minimumf %143, %144 : vector<8x256xf32>
    %146 = vector.extract_strided_slice %126 {offsets = [64, 0], sizes = [8, 256], strides = [1, 1]} : vector<128x256xf32> to vector<8x256xf32>
    %147 = arith.minimumf %145, %146 : vector<8x256xf32>
    %148 = vector.extract_strided_slice %126 {offsets = [72, 0], sizes = [8, 256], strides = [1, 1]} : vector<128x256xf32> to vector<8x256xf32>
    %149 = arith.minimumf %147, %148 : vector<8x256xf32>
    %150 = vector.extract_strided_slice %126 {offsets = [80, 0], sizes = [8, 256], strides = [1, 1]} : vector<128x256xf32> to vector<8x256xf32>
    %151 = arith.minimumf %149, %150 : vector<8x256xf32>
    %152 = vector.extract_strided_slice %126 {offsets = [88, 0], sizes = [8, 256], strides = [1, 1]} : vector<128x256xf32> to vector<8x256xf32>
    %153 = arith.minimumf %151, %152 : vector<8x256xf32>
    %154 = vector.extract_strided_slice %126 {offsets = [96, 0], sizes = [8, 256], strides = [1, 1]} : vector<128x256xf32> to vector<8x256xf32>
    %155 = arith.minimumf %153, %154 : vector<8x256xf32>
    %156 = vector.extract_strided_slice %126 {offsets = [104, 0], sizes = [8, 256], strides = [1, 1]} : vector<128x256xf32> to vector<8x256xf32>
    %157 = arith.minimumf %155, %156 : vector<8x256xf32>
    %158 = vector.extract_strided_slice %126 {offsets = [112, 0], sizes = [8, 256], strides = [1, 1]} : vector<128x256xf32> to vector<8x256xf32>
    %159 = arith.minimumf %157, %158 : vector<8x256xf32>
    %160 = vector.extract_strided_slice %126 {offsets = [120, 0], sizes = [8, 256], strides = [1, 1]} : vector<128x256xf32> to vector<8x256xf32>
    %161 = arith.minimumf %159, %160 : vector<8x256xf32>
    %c0_23 = arith.constant 0 : index
    %c768_24 = arith.constant 768 : index
    %162 = vector.load %arg7[%c0_23, %c768_24] : memref<8x2560xf32, #tpu.memory_space<vmem>>, vector<8x256xf32>
    %163 = arith.minimumf %162, %161 : vector<8x256xf32>
    %c0_25 = arith.constant 0 : index
    %c768_26 = arith.constant 768 : index
    %164 = vector.load %arg7[%c0_25, %c768_26] : memref<8x2560xf32, #tpu.memory_space<vmem>>, vector<8x256xf32>
    tpu.vector_store %arg7[%c0_25, %c768_26], %163 {strides = array<i32>} : memref<8x2560xf32, #tpu.memory_space<vmem>>, vector<8x256xf32>,
    %c0_27 = arith.constant 0 : index
    %c1024 = arith.constant 1024 : index
    %165 = vector.load %arg2[%c0_27, %c1024] : memref<8x2560xf32, #tpu.memory_space<vmem>>, vector<8x256xf32>
    %cst_28 = arith.constant dense<0.000000e+00> : vector<128x256xf32>
    %166 = tpu.matmul %3, %165, %cst_28 {dimension_numbers = #tpu.dot_dimension_numbers<[1], [0], [0], [1], [0, 0, 1, 1], [], []>} : vector<128x8xf32>, vector<8x256xf32>, vector<128x256xf32> -> vector<128x256xf32>
    %167 = vector.extract_strided_slice %166 {offsets = [0, 0], sizes = [128, 128], strides = [1, 1]} : vector<128x256xf32> to vector<128x128xf32>
    %168 = arith.minimumf %130, %167 : vector<128x128xf32>
    %169 = vector.extract_strided_slice %166 {offsets = [0, 128], sizes = [128, 128], strides = [1, 1]} : vector<128x256xf32> to vector<128x128xf32>
    %170 = arith.minimumf %168, %169 : vector<128x128xf32>
    %171 = vector.extract_strided_slice %166 {offsets = [0, 0], sizes = [8, 256], strides = [1, 1]} : vector<128x256xf32> to vector<8x256xf32>
    %172 = vector.extract_strided_slice %166 {offsets = [8, 0], sizes = [8, 256], strides = [1, 1]} : vector<128x256xf32> to vector<8x256xf32>
    %173 = arith.minimumf %171, %172 : vector<8x256xf32>
    %174 = vector.extract_strided_slice %166 {offsets = [16, 0], sizes = [8, 256], strides = [1, 1]} : vector<128x256xf32> to vector<8x256xf32>
    %175 = arith.minimumf %173, %174 : vector<8x256xf32>
    %176 = vector.extract_strided_slice %166 {offsets = [24, 0], sizes = [8, 256], strides = [1, 1]} : vector<128x256xf32> to vector<8x256xf32>
    %177 = arith.minimumf %175, %176 : vector<8x256xf32>
    %178 = vector.extract_strided_slice %166 {offsets = [32, 0], sizes = [8, 256], strides = [1, 1]} : vector<128x256xf32> to vector<8x256xf32>
    %179 = arith.minimumf %177, %178 : vector<8x256xf32>
    %180 = vector.extract_strided_slice %166 {offsets = [40, 0], sizes = [8, 256], strides = [1, 1]} : vector<128x256xf32> to vector<8x256xf32>
    %181 = arith.minimumf %179, %180 : vector<8x256xf32>
    %182 = vector.extract_strided_slice %166 {offsets = [48, 0], sizes = [8, 256], strides = [1, 1]} : vector<128x256xf32> to vector<8x256xf32>
    %183 = arith.minimumf %181, %182 : vector<8x256xf32>
    %184 = vector.extract_strided_slice %166 {offsets = [56, 0], sizes = [8, 256], strides = [1, 1]} : vector<128x256xf32> to vector<8x256xf32>
    %185 = arith.minimumf %183, %184 : vector<8x256xf32>
    %186 = vector.extract_strided_slice %166 {offsets = [64, 0], sizes = [8, 256], strides = [1, 1]} : vector<128x256xf32> to vector<8x256xf32>
    %187 = arith.minimumf %185, %186 : vector<8x256xf32>
    %188 = vector.extract_strided_slice %166 {offsets = [72, 0], sizes = [8, 256], strides = [1, 1]} : vector<128x256xf32> to vector<8x256xf32>
    %189 = arith.minimumf %187, %188 : vector<8x256xf32>
    %190 = vector.extract_strided_slice %166 {offsets = [80, 0], sizes = [8, 256], strides = [1, 1]} : vector<128x256xf32> to vector<8x256xf32>
    %191 = arith.minimumf %189, %190 : vector<8x256xf32>
    %192 = vector.extract_strided_slice %166 {offsets = [88, 0], sizes = [8, 256], strides = [1, 1]} : vector<128x256xf32> to vector<8x256xf32>
    %193 = arith.minimumf %191, %192 : vector<8x256xf32>
    %194 = vector.extract_strided_slice %166 {offsets = [96, 0], sizes = [8, 256], strides = [1, 1]} : vector<128x256xf32> to vector<8x256xf32>
    %195 = arith.minimumf %193, %194 : vector<8x256xf32>
    %196 = vector.extract_strided_slice %166 {offsets = [104, 0], sizes = [8, 256], strides = [1, 1]} : vector<128x256xf32> to vector<8x256xf32>
    %197 = arith.minimumf %195, %196 : vector<8x256xf32>
    %198 = vector.extract_strided_slice %166 {offsets = [112, 0], sizes = [8, 256], strides = [1, 1]} : vector<128x256xf32> to vector<8x256xf32>
    %199 = arith.minimumf %197, %198 : vector<8x256xf32>
    %200 = vector.extract_strided_slice %166 {offsets = [120, 0], sizes = [8, 256], strides = [1, 1]} : vector<128x256xf32> to vector<8x256xf32>
    %201 = arith.minimumf %199, %200 : vector<8x256xf32>
    %c0_29 = arith.constant 0 : index
    %c1024_30 = arith.constant 1024 : index
    %202 = vector.load %arg7[%c0_29, %c1024_30] : memref<8x2560xf32, #tpu.memory_space<vmem>>, vector<8x256xf32>
    %203 = arith.minimumf %202, %201 : vector<8x256xf32>
    %c0_31 = arith.constant 0 : index
    %c1024_32 = arith.constant 1024 : index
    %204 = vector.load %arg7[%c0_31, %c1024_32] : memref<8x2560xf32, #tpu.memory_space<vmem>>, vector<8x256xf32>
    tpu.vector_store %arg7[%c0_31, %c1024_32], %203 {strides = array<i32>} : memref<8x2560xf32, #tpu.memory_space<vmem>>, vector<8x256xf32>,
    %c0_33 = arith.constant 0 : index
    %c1280 = arith.constant 1280 : index
    %205 = vector.load %arg2[%c0_33, %c1280] : memref<8x2560xf32, #tpu.memory_space<vmem>>, vector<8x256xf32>
    %cst_34 = arith.constant dense<0.000000e+00> : vector<128x256xf32>
    %206 = tpu.matmul %3, %205, %cst_34 {dimension_numbers = #tpu.dot_dimension_numbers<[1], [0], [0], [1], [0, 0, 1, 1], [], []>} : vector<128x8xf32>, vector<8x256xf32>, vector<128x256xf32> -> vector<128x256xf32>
    %207 = vector.extract_strided_slice %206 {offsets = [0, 0], sizes = [128, 128], strides = [1, 1]} : vector<128x256xf32> to vector<128x128xf32>
    %208 = arith.minimumf %170, %207 : vector<128x128xf32>
    %209 = vector.extract_strided_slice %206 {offsets = [0, 128], sizes = [128, 128], strides = [1, 1]} : vector<128x256xf32> to vector<128x128xf32>
    %210 = arith.minimumf %208, %209 : vector<128x128xf32>
    %211 = vector.extract_strided_slice %206 {offsets = [0, 0], sizes = [8, 256], strides = [1, 1]} : vector<128x256xf32> to vector<8x256xf32>
    %212 = vector.extract_strided_slice %206 {offsets = [8, 0], sizes = [8, 256], strides = [1, 1]} : vector<128x256xf32> to vector<8x256xf32>
    %213 = arith.minimumf %211, %212 : vector<8x256xf32>
    %214 = vector.extract_strided_slice %206 {offsets = [16, 0], sizes = [8, 256], strides = [1, 1]} : vector<128x256xf32> to vector<8x256xf32>
    %215 = arith.minimumf %213, %214 : vector<8x256xf32>
    %216 = vector.extract_strided_slice %206 {offsets = [24, 0], sizes = [8, 256], strides = [1, 1]} : vector<128x256xf32> to vector<8x256xf32>
    %217 = arith.minimumf %215, %216 : vector<8x256xf32>
    %218 = vector.extract_strided_slice %206 {offsets = [32, 0], sizes = [8, 256], strides = [1, 1]} : vector<128x256xf32> to vector<8x256xf32>
    %219 = arith.minimumf %217, %218 : vector<8x256xf32>
    %220 = vector.extract_strided_slice %206 {offsets = [40, 0], sizes = [8, 256], strides = [1, 1]} : vector<128x256xf32> to vector<8x256xf32>
    %221 = arith.minimumf %219, %220 : vector<8x256xf32>
    %222 = vector.extract_strided_slice %206 {offsets = [48, 0], sizes = [8, 256], strides = [1, 1]} : vector<128x256xf32> to vector<8x256xf32>
    %223 = arith.minimumf %221, %222 : vector<8x256xf32>
    %224 = vector.extract_strided_slice %206 {offsets = [56, 0], sizes = [8, 256], strides = [1, 1]} : vector<128x256xf32> to vector<8x256xf32>
    %225 = arith.minimumf %223, %224 : vector<8x256xf32>
    %226 = vector.extract_strided_slice %206 {offsets = [64, 0], sizes = [8, 256], strides = [1, 1]} : vector<128x256xf32> to vector<8x256xf32>
    %227 = arith.minimumf %225, %226 : vector<8x256xf32>
    %228 = vector.extract_strided_slice %206 {offsets = [72, 0], sizes = [8, 256], strides = [1, 1]} : vector<128x256xf32> to vector<8x256xf32>
    %229 = arith.minimumf %227, %228 : vector<8x256xf32>
    %230 = vector.extract_strided_slice %206 {offsets = [80, 0], sizes = [8, 256], strides = [1, 1]} : vector<128x256xf32> to vector<8x256xf32>
    %231 = arith.minimumf %229, %230 : vector<8x256xf32>
    %232 = vector.extract_strided_slice %206 {offsets = [88, 0], sizes = [8, 256], strides = [1, 1]} : vector<128x256xf32> to vector<8x256xf32>
    %233 = arith.minimumf %231, %232 : vector<8x256xf32>
    %234 = vector.extract_strided_slice %206 {offsets = [96, 0], sizes = [8, 256], strides = [1, 1]} : vector<128x256xf32> to vector<8x256xf32>
    %235 = arith.minimumf %233, %234 : vector<8x256xf32>
    %236 = vector.extract_strided_slice %206 {offsets = [104, 0], sizes = [8, 256], strides = [1, 1]} : vector<128x256xf32> to vector<8x256xf32>
    %237 = arith.minimumf %235, %236 : vector<8x256xf32>
    %238 = vector.extract_strided_slice %206 {offsets = [112, 0], sizes = [8, 256], strides = [1, 1]} : vector<128x256xf32> to vector<8x256xf32>
    %239 = arith.minimumf %237, %238 : vector<8x256xf32>
    %240 = vector.extract_strided_slice %206 {offsets = [120, 0], sizes = [8, 256], strides = [1, 1]} : vector<128x256xf32> to vector<8x256xf32>
    %241 = arith.minimumf %239, %240 : vector<8x256xf32>
    %c0_35 = arith.constant 0 : index
    %c1280_36 = arith.constant 1280 : index
    %242 = vector.load %arg7[%c0_35, %c1280_36] : memref<8x2560xf32, #tpu.memory_space<vmem>>, vector<8x256xf32>
    %243 = arith.minimumf %242, %241 : vector<8x256xf32>
    %c0_37 = arith.constant 0 : index
    %c1280_38 = arith.constant 1280 : index
    %244 = vector.load %arg7[%c0_37, %c1280_38] : memref<8x2560xf32, #tpu.memory_space<vmem>>, vector<8x256xf32>
    tpu.vector_store %arg7[%c0_37, %c1280_38], %243 {strides = array<i32>} : memref<8x2560xf32, #tpu.memory_space<vmem>>, vector<8x256xf32>,
    %c0_39 = arith.constant 0 : index
    %c1536 = arith.constant 1536 : index
    %245 = vector.load %arg2[%c0_39, %c1536] : memref<8x2560xf32, #tpu.memory_space<vmem>>, vector<8x256xf32>
    %cst_40 = arith.constant dense<0.000000e+00> : vector<128x256xf32>
    %246 = tpu.matmul %3, %245, %cst_40 {dimension_numbers = #tpu.dot_dimension_numbers<[1], [0], [0], [1], [0, 0, 1, 1], [], []>} : vector<128x8xf32>, vector<8x256xf32>, vector<128x256xf32> -> vector<128x256xf32>
    %247 = vector.extract_strided_slice %246 {offsets = [0, 0], sizes = [128, 128], strides = [1, 1]} : vector<128x256xf32> to vector<128x128xf32>
    %248 = arith.minimumf %210, %247 : vector<128x128xf32>
    %249 = vector.extract_strided_slice %246 {offsets = [0, 128], sizes = [128, 128], strides = [1, 1]} : vector<128x256xf32> to vector<128x128xf32>
    %250 = arith.minimumf %248, %249 : vector<128x128xf32>
    %251 = vector.extract_strided_slice %246 {offsets = [0, 0], sizes = [8, 256], strides = [1, 1]} : vector<128x256xf32> to vector<8x256xf32>
    %252 = vector.extract_strided_slice %246 {offsets = [8, 0], sizes = [8, 256], strides = [1, 1]} : vector<128x256xf32> to vector<8x256xf32>
    %253 = arith.minimumf %251, %252 : vector<8x256xf32>
    %254 = vector.extract_strided_slice %246 {offsets = [16, 0], sizes = [8, 256], strides = [1, 1]} : vector<128x256xf32> to vector<8x256xf32>
    %255 = arith.minimumf %253, %254 : vector<8x256xf32>
    %256 = vector.extract_strided_slice %246 {offsets = [24, 0], sizes = [8, 256], strides = [1, 1]} : vector<128x256xf32> to vector<8x256xf32>
    %257 = arith.minimumf %255, %256 : vector<8x256xf32>
    %258 = vector.extract_strided_slice %246 {offsets = [32, 0], sizes = [8, 256], strides = [1, 1]} : vector<128x256xf32> to vector<8x256xf32>
    %259 = arith.minimumf %257, %258 : vector<8x256xf32>
    %260 = vector.extract_strided_slice %246 {offsets = [40, 0], sizes = [8, 256], strides = [1, 1]} : vector<128x256xf32> to vector<8x256xf32>
    %261 = arith.minimumf %259, %260 : vector<8x256xf32>
    %262 = vector.extract_strided_slice %246 {offsets = [48, 0], sizes = [8, 256], strides = [1, 1]} : vector<128x256xf32> to vector<8x256xf32>
    %263 = arith.minimumf %261, %262 : vector<8x256xf32>
    %264 = vector.extract_strided_slice %246 {offsets = [56, 0], sizes = [8, 256], strides = [1, 1]} : vector<128x256xf32> to vector<8x256xf32>
    %265 = arith.minimumf %263, %264 : vector<8x256xf32>
    %266 = vector.extract_strided_slice %246 {offsets = [64, 0], sizes = [8, 256], strides = [1, 1]} : vector<128x256xf32> to vector<8x256xf32>
    %267 = arith.minimumf %265, %266 : vector<8x256xf32>
    %268 = vector.extract_strided_slice %246 {offsets = [72, 0], sizes = [8, 256], strides = [1, 1]} : vector<128x256xf32> to vector<8x256xf32>
    %269 = arith.minimumf %267, %268 : vector<8x256xf32>
    %270 = vector.extract_strided_slice %246 {offsets = [80, 0], sizes = [8, 256], strides = [1, 1]} : vector<128x256xf32> to vector<8x256xf32>
    %271 = arith.minimumf %269, %270 : vector<8x256xf32>
    %272 = vector.extract_strided_slice %246 {offsets = [88, 0], sizes = [8, 256], strides = [1, 1]} : vector<128x256xf32> to vector<8x256xf32>
    %273 = arith.minimumf %271, %272 : vector<8x256xf32>
    %274 = vector.extract_strided_slice %246 {offsets = [96, 0], sizes = [8, 256], strides = [1, 1]} : vector<128x256xf32> to vector<8x256xf32>
    %275 = arith.minimumf %273, %274 : vector<8x256xf32>
    %276 = vector.extract_strided_slice %246 {offsets = [104, 0], sizes = [8, 256], strides = [1, 1]} : vector<128x256xf32> to vector<8x256xf32>
    %277 = arith.minimumf %275, %276 : vector<8x256xf32>
    %278 = vector.extract_strided_slice %246 {offsets = [112, 0], sizes = [8, 256], strides = [1, 1]} : vector<128x256xf32> to vector<8x256xf32>
    %279 = arith.minimumf %277, %278 : vector<8x256xf32>
    %280 = vector.extract_strided_slice %246 {offsets = [120, 0], sizes = [8, 256], strides = [1, 1]} : vector<128x256xf32> to vector<8x256xf32>
    %281 = arith.minimumf %279, %280 : vector<8x256xf32>
    %c0_41 = arith.constant 0 : index
    %c1536_42 = arith.constant 1536 : index
    %282 = vector.load %arg7[%c0_41, %c1536_42] : memref<8x2560xf32, #tpu.memory_space<vmem>>, vector<8x256xf32>
    %283 = arith.minimumf %282, %281 : vector<8x256xf32>
    %c0_43 = arith.constant 0 : index
    %c1536_44 = arith.constant 1536 : index
    %284 = vector.load %arg7[%c0_43, %c1536_44] : memref<8x2560xf32, #tpu.memory_space<vmem>>, vector<8x256xf32>
    tpu.vector_store %arg7[%c0_43, %c1536_44], %283 {strides = array<i32>} : memref<8x2560xf32, #tpu.memory_space<vmem>>, vector<8x256xf32>,
    %c0_45 = arith.constant 0 : index
    %c1792 = arith.constant 1792 : index
    %285 = vector.load %arg2[%c0_45, %c1792] : memref<8x2560xf32, #tpu.memory_space<vmem>>, vector<8x256xf32>
    %cst_46 = arith.constant dense<0.000000e+00> : vector<128x256xf32>
    %286 = tpu.matmul %3, %285, %cst_46 {dimension_numbers = #tpu.dot_dimension_numbers<[1], [0], [0], [1], [0, 0, 1, 1], [], []>} : vector<128x8xf32>, vector<8x256xf32>, vector<128x256xf32> -> vector<128x256xf32>
    %287 = vector.extract_strided_slice %286 {offsets = [0, 0], sizes = [128, 128], strides = [1, 1]} : vector<128x256xf32> to vector<128x128xf32>
    %288 = arith.minimumf %250, %287 : vector<128x128xf32>
    %289 = vector.extract_strided_slice %286 {offsets = [0, 128], sizes = [128, 128], strides = [1, 1]} : vector<128x256xf32> to vector<128x128xf32>
    %290 = arith.minimumf %288, %289 : vector<128x128xf32>
    %291 = vector.extract_strided_slice %286 {offsets = [0, 0], sizes = [8, 256], strides = [1, 1]} : vector<128x256xf32> to vector<8x256xf32>
    %292 = vector.extract_strided_slice %286 {offsets = [8, 0], sizes = [8, 256], strides = [1, 1]} : vector<128x256xf32> to vector<8x256xf32>
    %293 = arith.minimumf %291, %292 : vector<8x256xf32>
    %294 = vector.extract_strided_slice %286 {offsets = [16, 0], sizes = [8, 256], strides = [1, 1]} : vector<128x256xf32> to vector<8x256xf32>
    %295 = arith.minimumf %293, %294 : vector<8x256xf32>
    %296 = vector.extract_strided_slice %286 {offsets = [24, 0], sizes = [8, 256], strides = [1, 1]} : vector<128x256xf32> to vector<8x256xf32>
    %297 = arith.minimumf %295, %296 : vector<8x256xf32>
    %298 = vector.extract_strided_slice %286 {offsets = [32, 0], sizes = [8, 256], strides = [1, 1]} : vector<128x256xf32> to vector<8x256xf32>
    %299 = arith.minimumf %297, %298 : vector<8x256xf32>
    %300 = vector.extract_strided_slice %286 {offsets = [40, 0], sizes = [8, 256], strides = [1, 1]} : vector<128x256xf32> to vector<8x256xf32>
    %301 = arith.minimumf %299, %300 : vector<8x256xf32>
    %302 = vector.extract_strided_slice %286 {offsets = [48, 0], sizes = [8, 256], strides = [1, 1]} : vector<128x256xf32> to vector<8x256xf32>
    %303 = arith.minimumf %301, %302 : vector<8x256xf32>
    %304 = vector.extract_strided_slice %286 {offsets = [56, 0], sizes = [8, 256], strides = [1, 1]} : vector<128x256xf32> to vector<8x256xf32>
    %305 = arith.minimumf %303, %304 : vector<8x256xf32>
    %306 = vector.extract_strided_slice %286 {offsets = [64, 0], sizes = [8, 256], strides = [1, 1]} : vector<128x256xf32> to vector<8x256xf32>
    %307 = arith.minimumf %305, %306 : vector<8x256xf32>
    %308 = vector.extract_strided_slice %286 {offsets = [72, 0], sizes = [8, 256], strides = [1, 1]} : vector<128x256xf32> to vector<8x256xf32>
    %309 = arith.minimumf %307, %308 : vector<8x256xf32>
    %310 = vector.extract_strided_slice %286 {offsets = [80, 0], sizes = [8, 256], strides = [1, 1]} : vector<128x256xf32> to vector<8x256xf32>
    %311 = arith.minimumf %309, %310 : vector<8x256xf32>
    %312 = vector.extract_strided_slice %286 {offsets = [88, 0], sizes = [8, 256], strides = [1, 1]} : vector<128x256xf32> to vector<8x256xf32>
    %313 = arith.minimumf %311, %312 : vector<8x256xf32>
    %314 = vector.extract_strided_slice %286 {offsets = [96, 0], sizes = [8, 256], strides = [1, 1]} : vector<128x256xf32> to vector<8x256xf32>
    %315 = arith.minimumf %313, %314 : vector<8x256xf32>
    %316 = vector.extract_strided_slice %286 {offsets = [104, 0], sizes = [8, 256], strides = [1, 1]} : vector<128x256xf32> to vector<8x256xf32>
    %317 = arith.minimumf %315, %316 : vector<8x256xf32>
    %318 = vector.extract_strided_slice %286 {offsets = [112, 0], sizes = [8, 256], strides = [1, 1]} : vector<128x256xf32> to vector<8x256xf32>
    %319 = arith.minimumf %317, %318 : vector<8x256xf32>
    %320 = vector.extract_strided_slice %286 {offsets = [120, 0], sizes = [8, 256], strides = [1, 1]} : vector<128x256xf32> to vector<8x256xf32>
    %321 = arith.minimumf %319, %320 : vector<8x256xf32>
    %c0_47 = arith.constant 0 : index
    %c1792_48 = arith.constant 1792 : index
    %322 = vector.load %arg7[%c0_47, %c1792_48] : memref<8x2560xf32, #tpu.memory_space<vmem>>, vector<8x256xf32>
    %323 = arith.minimumf %322, %321 : vector<8x256xf32>
    %c0_49 = arith.constant 0 : index
    %c1792_50 = arith.constant 1792 : index
    %324 = vector.load %arg7[%c0_49, %c1792_50] : memref<8x2560xf32, #tpu.memory_space<vmem>>, vector<8x256xf32>
    tpu.vector_store %arg7[%c0_49, %c1792_50], %323 {strides = array<i32>} : memref<8x2560xf32, #tpu.memory_space<vmem>>, vector<8x256xf32>,
    %c0_51 = arith.constant 0 : index
    %c2048 = arith.constant 2048 : index
    %325 = vector.load %arg2[%c0_51, %c2048] : memref<8x2560xf32, #tpu.memory_space<vmem>>, vector<8x256xf32>
    %cst_52 = arith.constant dense<0.000000e+00> : vector<128x256xf32>
    %326 = tpu.matmul %3, %325, %cst_52 {dimension_numbers = #tpu.dot_dimension_numbers<[1], [0], [0], [1], [0, 0, 1, 1], [], []>} : vector<128x8xf32>, vector<8x256xf32>, vector<128x256xf32> -> vector<128x256xf32>
    %327 = vector.extract_strided_slice %326 {offsets = [0, 0], sizes = [128, 128], strides = [1, 1]} : vector<128x256xf32> to vector<128x128xf32>
    %328 = arith.minimumf %290, %327 : vector<128x128xf32>
    %329 = vector.extract_strided_slice %326 {offsets = [0, 128], sizes = [128, 128], strides = [1, 1]} : vector<128x256xf32> to vector<128x128xf32>
    %330 = arith.minimumf %328, %329 : vector<128x128xf32>
    %331 = vector.extract_strided_slice %326 {offsets = [0, 0], sizes = [8, 256], strides = [1, 1]} : vector<128x256xf32> to vector<8x256xf32>
    %332 = vector.extract_strided_slice %326 {offsets = [8, 0], sizes = [8, 256], strides = [1, 1]} : vector<128x256xf32> to vector<8x256xf32>
    %333 = arith.minimumf %331, %332 : vector<8x256xf32>
    %334 = vector.extract_strided_slice %326 {offsets = [16, 0], sizes = [8, 256], strides = [1, 1]} : vector<128x256xf32> to vector<8x256xf32>
    %335 = arith.minimumf %333, %334 : vector<8x256xf32>
    %336 = vector.extract_strided_slice %326 {offsets = [24, 0], sizes = [8, 256], strides = [1, 1]} : vector<128x256xf32> to vector<8x256xf32>
    %337 = arith.minimumf %335, %336 : vector<8x256xf32>
    %338 = vector.extract_strided_slice %326 {offsets = [32, 0], sizes = [8, 256], strides = [1, 1]} : vector<128x256xf32> to vector<8x256xf32>
    %339 = arith.minimumf %337, %338 : vector<8x256xf32>
    %340 = vector.extract_strided_slice %326 {offsets = [40, 0], sizes = [8, 256], strides = [1, 1]} : vector<128x256xf32> to vector<8x256xf32>
    %341 = arith.minimumf %339, %340 : vector<8x256xf32>
    %342 = vector.extract_strided_slice %326 {offsets = [48, 0], sizes = [8, 256], strides = [1, 1]} : vector<128x256xf32> to vector<8x256xf32>
    %343 = arith.minimumf %341, %342 : vector<8x256xf32>
    %344 = vector.extract_strided_slice %326 {offsets = [56, 0], sizes = [8, 256], strides = [1, 1]} : vector<128x256xf32> to vector<8x256xf32>
    %345 = arith.minimumf %343, %344 : vector<8x256xf32>
    %346 = vector.extract_strided_slice %326 {offsets = [64, 0], sizes = [8, 256], strides = [1, 1]} : vector<128x256xf32> to vector<8x256xf32>
    %347 = arith.minimumf %345, %346 : vector<8x256xf32>
    %348 = vector.extract_strided_slice %326 {offsets = [72, 0], sizes = [8, 256], strides = [1, 1]} : vector<128x256xf32> to vector<8x256xf32>
    %349 = arith.minimumf %347, %348 : vector<8x256xf32>
    %350 = vector.extract_strided_slice %326 {offsets = [80, 0], sizes = [8, 256], strides = [1, 1]} : vector<128x256xf32> to vector<8x256xf32>
    %351 = arith.minimumf %349, %350 : vector<8x256xf32>
    %352 = vector.extract_strided_slice %326 {offsets = [88, 0], sizes = [8, 256], strides = [1, 1]} : vector<128x256xf32> to vector<8x256xf32>
    %353 = arith.minimumf %351, %352 : vector<8x256xf32>
    %354 = vector.extract_strided_slice %326 {offsets = [96, 0], sizes = [8, 256], strides = [1, 1]} : vector<128x256xf32> to vector<8x256xf32>
    %355 = arith.minimumf %353, %354 : vector<8x256xf32>
    %356 = vector.extract_strided_slice %326 {offsets = [104, 0], sizes = [8, 256], strides = [1, 1]} : vector<128x256xf32> to vector<8x256xf32>
    %357 = arith.minimumf %355, %356 : vector<8x256xf32>
    %358 = vector.extract_strided_slice %326 {offsets = [112, 0], sizes = [8, 256], strides = [1, 1]} : vector<128x256xf32> to vector<8x256xf32>
    %359 = arith.minimumf %357, %358 : vector<8x256xf32>
    %360 = vector.extract_strided_slice %326 {offsets = [120, 0], sizes = [8, 256], strides = [1, 1]} : vector<128x256xf32> to vector<8x256xf32>
    %361 = arith.minimumf %359, %360 : vector<8x256xf32>
    %c0_53 = arith.constant 0 : index
    %c2048_54 = arith.constant 2048 : index
    %362 = vector.load %arg7[%c0_53, %c2048_54] : memref<8x2560xf32, #tpu.memory_space<vmem>>, vector<8x256xf32>
    %363 = arith.minimumf %362, %361 : vector<8x256xf32>
    %c0_55 = arith.constant 0 : index
    %c2048_56 = arith.constant 2048 : index
    %364 = vector.load %arg7[%c0_55, %c2048_56] : memref<8x2560xf32, #tpu.memory_space<vmem>>, vector<8x256xf32>
    tpu.vector_store %arg7[%c0_55, %c2048_56], %363 {strides = array<i32>} : memref<8x2560xf32, #tpu.memory_space<vmem>>, vector<8x256xf32>,
    %c0_57 = arith.constant 0 : index
    %c2304 = arith.constant 2304 : index
    %365 = vector.load %arg2[%c0_57, %c2304] : memref<8x2560xf32, #tpu.memory_space<vmem>>, vector<8x256xf32>
    %cst_58 = arith.constant dense<0.000000e+00> : vector<128x256xf32>
    %366 = tpu.matmul %3, %365, %cst_58 {dimension_numbers = #tpu.dot_dimension_numbers<[1], [0], [0], [1], [0, 0, 1, 1], [], []>} : vector<128x8xf32>, vector<8x256xf32>, vector<128x256xf32> -> vector<128x256xf32>
    %367 = vector.extract_strided_slice %366 {offsets = [0, 0], sizes = [128, 128], strides = [1, 1]} : vector<128x256xf32> to vector<128x128xf32>
    %368 = arith.minimumf %330, %367 : vector<128x128xf32>
    %369 = vector.extract_strided_slice %366 {offsets = [0, 128], sizes = [128, 128], strides = [1, 1]} : vector<128x256xf32> to vector<128x128xf32>
    %370 = arith.minimumf %368, %369 : vector<128x128xf32>
    %371 = vector.extract_strided_slice %366 {offsets = [0, 0], sizes = [8, 256], strides = [1, 1]} : vector<128x256xf32> to vector<8x256xf32>
    %372 = vector.extract_strided_slice %366 {offsets = [8, 0], sizes = [8, 256], strides = [1, 1]} : vector<128x256xf32> to vector<8x256xf32>
    %373 = arith.minimumf %371, %372 : vector<8x256xf32>
    %374 = vector.extract_strided_slice %366 {offsets = [16, 0], sizes = [8, 256], strides = [1, 1]} : vector<128x256xf32> to vector<8x256xf32>
    %375 = arith.minimumf %373, %374 : vector<8x256xf32>
    %376 = vector.extract_strided_slice %366 {offsets = [24, 0], sizes = [8, 256], strides = [1, 1]} : vector<128x256xf32> to vector<8x256xf32>
    %377 = arith.minimumf %375, %376 : vector<8x256xf32>
    %378 = vector.extract_strided_slice %366 {offsets = [32, 0], sizes = [8, 256], strides = [1, 1]} : vector<128x256xf32> to vector<8x256xf32>
    %379 = arith.minimumf %377, %378 : vector<8x256xf32>
    %380 = vector.extract_strided_slice %366 {offsets = [40, 0], sizes = [8, 256], strides = [1, 1]} : vector<128x256xf32> to vector<8x256xf32>
    %381 = arith.minimumf %379, %380 : vector<8x256xf32>
    %382 = vector.extract_strided_slice %366 {offsets = [48, 0], sizes = [8, 256], strides = [1, 1]} : vector<128x256xf32> to vector<8x256xf32>
    %383 = arith.minimumf %381, %382 : vector<8x256xf32>
    %384 = vector.extract_strided_slice %366 {offsets = [56, 0], sizes = [8, 256], strides = [1, 1]} : vector<128x256xf32> to vector<8x256xf32>
    %385 = arith.minimumf %383, %384 : vector<8x256xf32>
    %386 = vector.extract_strided_slice %366 {offsets = [64, 0], sizes = [8, 256], strides = [1, 1]} : vector<128x256xf32> to vector<8x256xf32>
    %387 = arith.minimumf %385, %386 : vector<8x256xf32>
    %388 = vector.extract_strided_slice %366 {offsets = [72, 0], sizes = [8, 256], strides = [1, 1]} : vector<128x256xf32> to vector<8x256xf32>
    %389 = arith.minimumf %387, %388 : vector<8x256xf32>
    %390 = vector.extract_strided_slice %366 {offsets = [80, 0], sizes = [8, 256], strides = [1, 1]} : vector<128x256xf32> to vector<8x256xf32>
    %391 = arith.minimumf %389, %390 : vector<8x256xf32>
    %392 = vector.extract_strided_slice %366 {offsets = [88, 0], sizes = [8, 256], strides = [1, 1]} : vector<128x256xf32> to vector<8x256xf32>
    %393 = arith.minimumf %391, %392 : vector<8x256xf32>
    %394 = vector.extract_strided_slice %366 {offsets = [96, 0], sizes = [8, 256], strides = [1, 1]} : vector<128x256xf32> to vector<8x256xf32>
    %395 = arith.minimumf %393, %394 : vector<8x256xf32>
    %396 = vector.extract_strided_slice %366 {offsets = [104, 0], sizes = [8, 256], strides = [1, 1]} : vector<128x256xf32> to vector<8x256xf32>
    %397 = arith.minimumf %395, %396 : vector<8x256xf32>
    %398 = vector.extract_strided_slice %366 {offsets = [112, 0], sizes = [8, 256], strides = [1, 1]} : vector<128x256xf32> to vector<8x256xf32>
    %399 = arith.minimumf %397, %398 : vector<8x256xf32>
    %400 = vector.extract_strided_slice %366 {offsets = [120, 0], sizes = [8, 256], strides = [1, 1]} : vector<128x256xf32> to vector<8x256xf32>
    %401 = arith.minimumf %399, %400 : vector<8x256xf32>
    %c0_59 = arith.constant 0 : index
    %c2304_60 = arith.constant 2304 : index
    %402 = vector.load %arg7[%c0_59, %c2304_60] : memref<8x2560xf32, #tpu.memory_space<vmem>>, vector<8x256xf32>
    %403 = arith.minimumf %402, %401 : vector<8x256xf32>
    %c0_61 = arith.constant 0 : index
    %c2304_62 = arith.constant 2304 : index
    %404 = vector.load %arg7[%c0_61, %c2304_62] : memref<8x2560xf32, #tpu.memory_space<vmem>>, vector<8x256xf32>
    tpu.vector_store %arg7[%c0_61, %c2304_62], %403 {strides = array<i32>} : memref<8x2560xf32, #tpu.memory_space<vmem>>, vector<8x256xf32>,
    %cst_63 = arith.constant dense<0x7F800000> : vector<128xf32>
    %405 = vector.multi_reduction <minimumf>, %370, %cst_63 [1] : vector<128x128xf32> to vector<128xf32>
    %406 = vector.shape_cast %405 : vector<128xf32> to vector<128x1xf32>
    %cst_64 = arith.constant 0.000000e+00 : f32
    %407 = vector.broadcast %cst_64 : f32 to vector<128x1xf32>
    %408 = arith.maximumf %406, %407 : vector<128x1xf32>
    %409 = vector.extract_strided_slice %3 {offsets = [0, 5], sizes = [128, 1], strides = [1, 1]} : vector<128x8xf32> to vector<128x1xf32>
    %cst_65 = arith.constant 5.000000e-01 : f32
    %410 = vector.broadcast %cst_65 : f32 to vector<128x1xf32>
    %411 = arith.cmpf ogt, %409, %410 : vector<128x1xf32>
    %c0_66 = arith.constant 0 : index
    %c0_67 = arith.constant 0 : index
    %412 = vector.load %arg8[%c0_66, %c0_67] : memref<128x1xf32, #tpu.memory_space<vmem>>, vector<128x1xf32>
    %cst_68 = arith.constant 0.000000e+00 : f32
    %413 = vector.broadcast %cst_68 : f32 to vector<128x1xf32>
    %414 = arith.select %411, %408, %413 : vector<128x1xi1>, vector<128x1xf32>
    %415 = arith.addf %412, %414 : vector<128x1xf32>
    %c0_69 = arith.constant 0 : index
    %c0_70 = arith.constant 0 : index
    %416 = vector.load %arg8[%c0_69, %c0_70] : memref<128x1xf32, #tpu.memory_space<vmem>>, vector<128x1xf32>
    tpu.vector_store %arg8[%c0_69, %c0_70], %415 {strides = array<i32>} : memref<128x1xf32, #tpu.memory_space<vmem>>, vector<128x1xf32>,
    %c0_71 = arith.constant 0 : index
    %c0_72 = arith.constant 0 : index
    %417 = vector.load %arg9[%c0_71, %c0_72] : memref<128x1xf32, #tpu.memory_space<vmem>>, vector<128x1xf32>
    %418 = arith.extui %411 : vector<128x1xi1> to vector<128x1xi32>
    %419 = arith.sitofp %418 : vector<128x1xi32> to vector<128x1xf32>
    %420 = arith.addf %417, %419 : vector<128x1xf32>
    %c0_73 = arith.constant 0 : index
    %c0_74 = arith.constant 0 : index
    %421 = vector.load %arg9[%c0_73, %c0_74] : memref<128x1xf32, #tpu.memory_space<vmem>>, vector<128x1xf32>
    tpu.vector_store %arg9[%c0_73, %c0_74], %420 {strides = array<i32>} : memref<128x1xf32, #tpu.memory_space<vmem>>, vector<128x1xf32>,
    %c18_i32 = arith.constant 18 : i32
    %422 = arith.cmpi eq, %arg0, %c18_i32 : i32
    %423 = arith.extui %422 : i1 to i32
    %c0_i32_75 = arith.constant 0 : i32
    %424 = arith.cmpi ne, %423, %c0_i32_75 : i32
    scf.if %424 {
      %c0_76 = arith.constant 0 : index
      %c0_77 = arith.constant 0 : index
      %425 = vector.load %arg8[%c0_76, %c0_77] : memref<128x1xf32, #tpu.memory_space<vmem>>, vector<128x1xf32>
      %426 = vector.shape_cast %425 : vector<128x1xf32> to vector<1x128x1xf32>
      %cst_78 = arith.constant dense<0.000000e+00> : vector<1xf32>
      %427 = vector.multi_reduction <add>, %426, %cst_78 [1, 2] : vector<1x128x1xf32> to vector<1xf32>
      %428 = vector.shape_cast %427 : vector<1xf32> to vector<1x1x1xf32>
      %429 = vector.extract %428[0, 0, 0] : f32 from vector<1x1x1xf32>
      %c0_79 = arith.constant 0 : index
      %c0_80 = arith.constant 0 : index
      %430 = vector.load %arg9[%c0_79, %c0_80] : memref<128x1xf32, #tpu.memory_space<vmem>>, vector<128x1xf32>
      %431 = vector.shape_cast %430 : vector<128x1xf32> to vector<1x128x1xf32>
      %cst_81 = arith.constant dense<0.000000e+00> : vector<1xf32>
      %432 = vector.multi_reduction <add>, %431, %cst_81 [1, 2] : vector<1x128x1xf32> to vector<1xf32>
      %433 = vector.shape_cast %432 : vector<1xf32> to vector<1x1x1xf32>
      %434 = vector.extract %433[0, 0, 0] : f32 from vector<1x1x1xf32>
      %c0_82 = arith.constant 0 : index
      %c0_83 = arith.constant 0 : index
      %435 = vector.load %arg7[%c0_82, %c0_83] : memref<8x2560xf32, #tpu.memory_space<vmem>>, vector<8x2560xf32>
      %cst_84 = arith.constant dense<0x7F800000> : vector<2560xf32>
      %436 = vector.multi_reduction <minimumf>, %435, %cst_84 [0] : vector<8x2560xf32> to vector<2560xf32>
      %437 = vector.shape_cast %436 : vector<2560xf32> to vector<1x2560xf32>
      %cst_85 = arith.constant 0.000000e+00 : f32
      %438 = vector.broadcast %cst_85 : f32 to vector<1x2560xf32>
      %439 = arith.maximumf %437, %438 : vector<1x2560xf32>
      %c6 = arith.constant 6 : index
      %c0_86 = arith.constant 0 : index
      %440 = vector.load %arg2[%c6, %c0_86] : memref<8x2560xf32, #tpu.memory_space<vmem>>, vector<1x2560xf32>
      %cst_87 = arith.constant 5.000000e-01 : f32
      %441 = vector.broadcast %cst_87 : f32 to vector<1x2560xf32>
      %442 = arith.cmpf ogt, %440, %441 : vector<1x2560xf32>
      %cst_88 = arith.constant 0.000000e+00 : f32
      %443 = vector.broadcast %cst_88 : f32 to vector<1x2560xf32>
      %444 = arith.select %442, %439, %443 : vector<1x2560xi1>, vector<1x2560xf32>
      %445 = vector.shape_cast %444 : vector<1x2560xf32> to vector<1x1x2560xf32>
      %cst_89 = arith.constant dense<0.000000e+00> : vector<1xf32>
      %446 = vector.multi_reduction <add>, %445, %cst_89 [1, 2] : vector<1x1x2560xf32> to vector<1xf32>
      %447 = vector.shape_cast %446 : vector<1xf32> to vector<1x1x1xf32>
      %448 = vector.extract %447[0, 0, 0] : f32 from vector<1x1x1xf32>
      %449 = arith.extui %442 : vector<1x2560xi1> to vector<1x2560xi32>
      %450 = arith.sitofp %449 : vector<1x2560xi32> to vector<1x2560xf32>
      %451 = vector.shape_cast %450 : vector<1x2560xf32> to vector<1x1x2560xf32>
      %cst_90 = arith.constant dense<0.000000e+00> : vector<1xf32>
      %452 = vector.multi_reduction <add>, %451, %cst_90 [1, 2] : vector<1x1x2560xf32> to vector<1xf32>
      %453 = vector.shape_cast %452 : vector<1xf32> to vector<1x1x1xf32>
      %454 = vector.extract %453[0, 0, 0] : f32 from vector<1x1x1xf32>
      %cst_91 = arith.constant 1.000000e+00 : f32
      %455 = arith.maximumf %434, %cst_91 : f32
      %456 = arith.divf %429, %455 : f32
      %cst_92 = arith.constant 1.000000e+00 : f32
      %457 = arith.maximumf %454, %cst_92 : f32
      %458 = arith.divf %448, %457 : f32
      %459 = arith.addf %456, %458 : f32
      %cst_93 = arith.constant 0.000000e+00 : f32
      %460 = arith.cmpf ogt, %434, %cst_93 : f32
      %cst_94 = arith.constant 0.000000e+00 : f32
      %461 = arith.cmpf ogt, %454, %cst_94 : f32
      %462 = arith.andi %460, %461 : i1
      %cst_95 = arith.constant 0.000000e+00 : f32
      %463 = arith.select %462, %459, %cst_95 : f32
      %c0_96 = arith.constant 0 : index
      %c0_97 = arith.constant 0 : index
      %464 = memref.load %arg5[%c0_96, %c0_97] : memref<1x1xf32, #tpu.memory_space<smem>>
      memref.store %463, %arg5[%c0_96, %c0_97] : memref<1x1xf32, #tpu.memory_space<smem>>
    } else {
    }
    return
  }
  func.func @transform_0(%arg0: i32) -> (i32, i32) {
    %c0_i32 = arith.constant 0 : i32
    %c0_i32_0 = arith.constant 0 : i32
    return %arg0, %c0_i32 : i32, i32
  }
  func.func @transform_1(%arg0: i32) -> (i32, i32) {
    %c0_i32 = arith.constant 0 : i32
    %c0_i32_0 = arith.constant 0 : i32
    %c0_i32_1 = arith.constant 0 : i32
    return %c0_i32, %c0_i32_0 : i32, i32
  }
  func.func @transform_2(%arg0: i32) -> (i32, i32) {
    %c0_i32 = arith.constant 0 : i32
    %c0_i32_0 = arith.constant 0 : i32
    %c0_i32_1 = arith.constant 0 : i32
    return %c0_i32, %c0_i32_0 : i32, i32
  }
  func.func @transform_3(%arg0: i32) -> (i32, i32) {
    %c0_i32 = arith.constant 0 : i32
    %c0_i32_0 = arith.constant 0 : i32
    %c0_i32_1 = arith.constant 0 : i32
    return %c0_i32, %c0_i32_0 : i32, i32
  }
  func.func @transform_4(%arg0: i32) -> (i32, i32) {
    %c0_i32 = arith.constant 0 : i32
    %c0_i32_0 = arith.constant 0 : i32
    %c0_i32_1 = arith.constant 0 : i32
    return %c0_i32, %c0_i32_0 : i32, i32
  }
  func.func @transform_5(%arg0: i32) -> (i32, i32) {
    %c0_i32 = arith.constant 0 : i32
    %c0_i32_0 = arith.constant 0 : i32
    %c0_i32_1 = arith.constant 0 : i32
    return %c0_i32, %c0_i32_0 : i32, i32
  }
}

</mosaic_0001>

<bundles_post_ra>
// kernel: self_loss_forward.1
= control target key start
LH: loop header
LB: loop body
LE: loop exit
PB: predicated region body
PF: predicated region fallthrough
CT: control target
= control target key end

     0   :  { %11 = vsyncpa [#allocation6], 0  ;;  %s6561_s0 = inlined_call_operand.vmem [shape: f32[2432,8], index: 0, kind: input, shape index: {}]   ;;  %s6562_s1 = inlined_call_operand.vmem [shape: f32[8,2560], index: 1, kind: input, shape index: {}]   ;;  %s6563_s2 = inlined_call_operand.vmem [shape: f32[40,60], index: 2, kind: input, shape index: {}]   ;;  %s6564_s3 = inlined_call_operand.vmem [shape: f32[40,60], index: 3, kind: input, shape index: {}]   ;;  %s6565_s4 = inlined_call_operand.hbm [shape: f32[1,1], index: 4, kind: output, shape index: {0}]   ;;  %s6566_s5 = inlined_call_operand.hbm [shape: f32[1,1], index: 5, kind: output, shape index: {1}]  }
   0x1   :  { %12 = vsyncpa [#allocation8], 0  ;;  %s4454_s18 = smov 0  }
   0x2 LB: > { %s4460_s19 = sadd.s32 4294967295, %s4412_s18   ;;  %p4005_p0 = scmp.ge.s32.totalorder %s4412_s18, 1  ;;  %s4412_s18 = sphi %s4454_s18, %s18_s18  }
   0x3   : > { %p183_p1 = scmp.lt.s32.totalorder %s4412_s18, 20 }
   0x5   : > { %p184_p2 = pnand %p4005_p0, %p183_p1 }
   0x7   : > { %187 = sbr.rel (%p184_p2) target bundleno = 1566 (0x61e), region = 36 }
   0xc   : > { %s4006_s20 = sshll.u32 %s4460_s19, 4  ;;  %p4008_p4 = scmp.ne.s32.totalorder %s4460_s19, 0 }
   0xd   : > { %p207_p3 = scmp.lt.s32.totalorder %s4006_s20, 303  ;;  %s4416_s26 = smov (!%p4008_p4), 1.0  }
   0xe   : > { %215 = sbr.rel (%p4008_p4) target bundleno = 342 (0x156), region = 40 }
   0xf   : > { %s6648_s20 = smov (!%p207_p3, %s4006_s20), 303 }
  0x10   : > { %s4007_s21 = sshll.u32 %s6648_s20, 3 }
  0x11   : > { %s4468_s24 = scalar_lea.vmem %s6561_s0, %s4007_s21 }
  0x13   : > { %v4474_v0 = vld [vmem:[%s6564_s3] sm:$0xff]  ;;  %v4479_v1 = vld [vmem:[%s6564_s3 + $0x8] sm:$0xff]  ;;  %v4484_v2 = vld [vmem:[%s6564_s3 + $0x10] sm:$0xff]  ;;  %vm324_vm0 = vcmask 490496   ;;  %vm236_vm1 = vcmask 7168   ;;  %v4414_v5 = vmov 0.0  }
  0x14   : > { %v4489_v3 = vld [vmem:[%s6564_s3 + $0x18] sm:$0xff]  ;;  %v4494_v4 = vld [vmem:[%s6564_s3 + $0x20] sm:$0xff]  ;;  %vm289_vm2 = vcmp.gt.f32.partialorder %v4474_v0, 0.0  ;;  %vm290_vm3 = vcmp.gt.f32.partialorder %v4479_v1, 0.0  ;;  %vm291_vm4 = vcmp.gt.f32.partialorder %v4484_v2, 0.0  ;;  %237 = vst.msk [vmem:[#allocation3] sm:$0xff] %vm236_vm1, %v4414_v5 }
  0x15   : > { %238 = vst.msk [vmem:[#allocation3 + $0x8] sm:$0xff] %vm236_vm1, %v4414_v5  ;;  %239 = vst.msk [vmem:[#allocation3 + $0x10] sm:$0xff] %vm236_vm1, %v4414_v5  ;;  %vm292_vm5 = vcmp.gt.f32.partialorder %v4489_v3, 0.0  ;;  %vm293_vm6 = vcmp.gt.f32.partialorder %v4494_v4, 0.0  ;;  %v4009_v6 = vsel %vm289_vm2, 1.0, %v4414_v5  ;;  %v4010_v7 = vsel %vm290_vm3, 1.0, %v4414_v5 }
  0x16   : > { %240 = vst.msk [vmem:[#allocation3 + $0x18] sm:$0xff] %vm236_vm1, %v4414_v5  ;;  %241 = vst.msk [vmem:[#allocation3 + $0x20] sm:$0xff] %vm236_vm1, %v4414_v5  ;;  %v4011_v8 = vsel %vm291_vm4, 1.0, %v4414_v5  ;;  %v4012_v9 = vsel %vm292_vm5, 1.0, %v4414_v5  ;;  %v398_v10 = vsel %vm324_vm0, %v4009_v6, 0.0  ;;  %vm294_vm7 = vcmp.eq.f32.partialorder %v4474_v0, 0.0 }
  0x17   : > { %242 = vst.msk [vmem:[#allocation3 + $0x28] sm:$0xff] %vm236_vm1, %v4414_v5  ;;  %243 = vst.msk [vmem:[#allocation3 + $0x30] sm:$0xff] %vm236_vm1, %v4414_v5  ;;  %v4013_v11 = vsel %vm293_vm6, 1.0, %v4414_v5  ;;  %v399_v12 = vsel %vm324_vm0, %v4010_v7, 0.0  ;;  %v401_v13 = vsel %vm324_vm0, %v4011_v8, 0.0  ;;  %v403_v14 = vsel %vm324_vm0, %v4012_v9, 0.0 }
  0x18   : > { %244 = vst.msk [vmem:[#allocation3 + $0x38] sm:$0xff] %vm236_vm1, %v4414_v5  ;;  %245 = vst.msk [vmem:[#allocation3 + $0x40] sm:$0xff] %vm236_vm1, %v4414_v5  ;;  %v400_v15 = vadd.f32 %v399_v12, %v398_v10  ;;  %vm295_vm8 = vcmp.eq.f32.partialorder %v4479_v1, 0.0  ;;  %vm296_vm9 = vcmp.eq.f32.partialorder %v4484_v2, 0.0  ;;  %vm297_vm10 = vcmp.eq.f32.partialorder %v4489_v3, 0.0  ;;  %v274_v19 = vld [vmem:[%s6563_s2] sm:$0xff] }
  0x19   : > { %246 = vst.msk [vmem:[#allocation3 + $0x48] sm:$0xff] %vm236_vm1, %v4414_v5  ;;  %247 = vst.msk [vmem:[#allocation3 + $0x50] sm:$0xff] %vm236_vm1, %v4414_v5  ;;  %vm298_vm11 = vcmp.eq.f32.partialorder %v4494_v4, 0.0  ;;  %v4014_v16 = vsel %vm294_vm7, 1.0, %v4414_v5  ;;  %v4015_v17 = vsel %vm295_vm8, 1.0, %v4414_v5  ;;  %v4016_v18 = vsel %vm296_vm9, 1.0, %v4414_v5 }
  0x1a   : > { %248 = vst.msk [vmem:[#allocation3 + $0x58] sm:$0xff] %vm236_vm1, %v4414_v5  ;;  %249 = vst.msk [vmem:[#allocation3 + $0x60] sm:$0xff] %vm236_vm1, %v4414_v5  ;;  %v275_v20 = vld [vmem:[%s6563_s2 + $0x8] sm:$0xff]  ;;  %v402_v21 = vadd.f32 %v401_v13, %v400_v15  ;;  %v405_v22 = vsel %vm324_vm0, %v4013_v11, 0.0  ;;  %v4017_v23 = vsel %vm297_vm10, 1.0, %v4414_v5  ;;  %v426_v24 = vsel %vm324_vm0, %v4014_v16, 0.0 }
  0x1b   : > { %250 = vst.msk [vmem:[#allocation3 + $0x68] sm:$0xff] %vm236_vm1, %v4414_v5  ;;  %251 = vst.msk [vmem:[#allocation3 + $0x70] sm:$0xff] %vm236_vm1, %v4414_v5  ;;  %v276_v25 = vld [vmem:[%s6563_s2 + $0x10] sm:$0xff]  ;;  %v277_v26 = vld [vmem:[%s6563_s2 + $0x18] sm:$0xff]  ;;  %v4018_v28 = vsel %vm298_vm11, 1.0, %v4414_v5  ;;  %v427_v29 = vsel %vm324_vm0, %v4015_v17, 0.0 }
  0x1c   : > { %252 = vst.msk [vmem:[#allocation3 + $0x78] sm:$0xff] %vm236_vm1, %v4414_v5  ;;  %253 = vst.msk [vmem:[#allocation4] sm:$0xff] %vm236_vm1, %v4414_v5  ;;  %v278_v27 = vld [vmem:[%s6563_s2 + $0x20] sm:$0xff]  ;;  %v429_v30 = vsel %vm324_vm0, %v4016_v18, 0.0  ;;  %v431_v31 = vsel %vm324_vm0, %v4017_v23, 0.0  ;;  %v404_v32 = vadd.f32 %v403_v14, %v402_v21  ;;  %v428_v33 = vadd.f32 %v427_v29, %v426_v24 }
  0x1d   : > { %254 = vst.msk [vmem:[#allocation4 + $0x8] sm:$0xff] %vm236_vm1, %v4414_v5  ;;  %255 = vst.msk [vmem:[#allocation4 + $0x10] sm:$0xff] %vm236_vm1, %v4414_v5  ;;  %v279_v34 = vmax.f32 %v274_v19, 1e-07  ;;  %v280_v35 = vmax.f32 %v275_v20, 1e-07 }
  0x1e   : > { %256 = vst.msk [vmem:[#allocation4 + $0x18] sm:$0xff] %vm236_vm1, %v4414_v5  ;;  %257 = vst.msk [vmem:[#allocation4 + $0x20] sm:$0xff] %vm236_vm1, %v4414_v5  ;;  %v281_v36 = vmax.f32 %v276_v25, 1e-07  ;;  %v282_v37 = vmax.f32 %v277_v26, 1e-07  ;;  %v406_v39 = vadd.f32 %v405_v22, %v404_v32  ;;  %v430_v40 = vadd.f32 %v429_v30, %v428_v33 }
  0x1f   : > { %258 = vst.msk [vmem:[#allocation4 + $0x28] sm:$0xff] %vm236_vm1, %v4414_v5  ;;  %259 = vst.msk [vmem:[#allocation4 + $0x30] sm:$0xff] %vm236_vm1, %v4414_v5  ;;  %v283_v38 = vmax.f32 %v278_v27, 1e-07  ;;  %v284_v41 = vmin.f32 %v279_v34, 0.9999999 }
  0x20   : > { %260 = vst.msk [vmem:[#allocation4 + $0x38] sm:$0xff] %vm236_vm1, %v4414_v5  ;;  %261 = vst.msk [vmem:[#allocation4 + $0x40] sm:$0xff] %vm236_vm1, %v4414_v5  ;;  %v285_v42 = vmin.f32 %v280_v35, 0.9999999  ;;  %v433_v43 = vsel %vm324_vm0, %v4018_v28, 0.0  ;;  %407 = vadd.xlane.f32.xlu1 %v406_v39  ;;  %v432_v45 = vadd.f32 %v431_v31, %v430_v40  ;;  %v299_v54 = vsub.f32 0.0, %v4474_v0 }
  0x21   : > { %262 = vst.msk [vmem:[#allocation4 + $0x48] sm:$0xff] %vm236_vm1, %v4414_v5  ;;  %263 = vst.msk [vmem:[#allocation4 + $0x50] sm:$0xff] %vm236_vm1, %v4414_v5  ;;  %v286_v44 = vmin.f32 %v281_v36, 0.9999999  ;;  %v287_v46 = vmin.f32 %v282_v37, 0.9999999  ;;  %4265 = vlog2.f32 %v284_v41 }
  0x22   : > { %264 = vst.msk [vmem:[#allocation4 + $0x58] sm:$0xff] %vm236_vm1, %v4414_v5  ;;  %265 = vst.msk [vmem:[#allocation4 + $0x60] sm:$0xff] %vm236_vm1, %v4414_v5  ;;  %v288_v47 = vmin.f32 %v283_v38, 0.9999999  ;;  %v434_v48 = vadd.f32 %v433_v43, %v432_v45  ;;  %4267 = vlog2.f32 %v285_v42  ;;  %v344_v49 = vsub.f32 1.0, %v284_v41 }
  0x23   : > { %266 = vst.msk [vmem:[#allocation4 + $0x68] sm:$0xff] %vm236_vm1, %v4414_v5  ;;  %267 = vst.msk [vmem:[#allocation4 + $0x70] sm:$0xff] %vm236_vm1, %v4414_v5  ;;  %4269 = vlog2.f32 %v286_v44  ;;  %v345_v50 = vsub.f32 1.0, %v285_v42  ;;  %v346_v51 = vsub.f32 1.0, %v286_v44  ;;  %v347_v52 = vsub.f32 1.0, %v287_v46 }
  0x24   : > { %268 = vst.msk [vmem:[#allocation4 + $0x78] sm:$0xff] %vm236_vm1, %v4414_v5  ;;  %435 = vadd.xlane.f32.xlu1 %v434_v48  ;;  %4271 = vlog2.f32 %v287_v46  ;;  %v348_v53 = vsub.f32 1.0, %v288_v47  ;;  %v300_v56 = vsub.f32 0.0, %v4479_v1  ;;  %v301_v58 = vsub.f32 0.0, %v4484_v2 }
  0x25   : > { %4273 = vlog2.f32 %v288_v47  ;;  %v302_v61 = vsub.f32 0.0, %v4489_v3  ;;  %v303_v5 = vsub.f32 0.0, %v4494_v4  ;;  %v4415_v3 = vmov 1e+30  }
  0x26   : > { %4275 = vlog2.f32 %v344_v49  ;;  %216 = vst [vmem:[#allocation2] sm:$0xff] %v4415_v3  ;;  %217 = vst [vmem:[#allocation2 + $0x38] sm:$0xff] %v4415_v3 }
  0x27   : > { %4277 = vlog2.f32 %v345_v50  ;;  %218 = vst [vmem:[#allocation2 + $0x50] sm:$0xff] %v4415_v3  ;;  %219 = vst [vmem:[#allocation2 + $0x18] sm:$0xff] %v4415_v3 }
  0x28   : > { %4279 = vlog2.f32 %v346_v51  ;;  %220 = vst [vmem:[#allocation2 + $0x30] sm:$0xff] %v4415_v3  ;;  %221 = vst [vmem:[#allocation2 + $0x68] sm:$0xff] %v4415_v3 }
  0x29   : > { %4281 = vlog2.f32 %v347_v52  ;;  %222 = vst [vmem:[#allocation2 + $0x78] sm:$0xff] %v4415_v3  ;;  %223 = vst [vmem:[#allocation2 + $0x80] sm:$0xff] %v4415_v3 }
  0x2a   : > { %4283 = vlog2.f32 %v348_v53  ;;  %224 = vst [vmem:[#allocation2 + $0x8] sm:$0xff] %v4415_v3  ;;  %225 = vst [vmem:[#allocation2 + $0x88] sm:$0xff] %v4415_v3 }
  0x2b   : > { %226 = vst [vmem:[#allocation2 + $0x28] sm:$0xff] %v4415_v3  ;;  %227 = vst [vmem:[#allocation2 + $0x40] sm:$0xff] %v4415_v3 }
  0x2c   : > { %228 = vst [vmem:[#allocation2 + $0x58] sm:$0xff] %v4415_v3  ;;  %229 = vst [vmem:[#allocation2 + $0x10] sm:$0xff] %v4415_v3 }
  0x2d   : > { %230 = vst [vmem:[#allocation2 + $0x98] sm:$0xff] %v4415_v3  ;;  %231 = vst [vmem:[#allocation2 + $0x60] sm:$0xff] %v4415_v3 }
  0x2e   : > { %v4266_v55 = vpop.eup %4265  ;;  %232 = vst [vmem:[#allocation2 + $0x20] sm:$0xff] %v4415_v3  ;;  %233 = vst [vmem:[#allocation2 + $0x48] sm:$0xff] %v4415_v3 }
  0x2f   : > { %v4268_v57 = vpop.eup %4267  ;;  %v305_v59 = vmul.f32 0.6931472, %v4266_v55  ;;  %234 = vst [vmem:[#allocation2 + $0x70] sm:$0xff] %v4415_v3  ;;  %235 = vst [vmem:[#allocation2 + $0x90] sm:$0xff] %v4415_v3 }
  0x30   : > { %v4270_v60 = vpop.eup %4269  ;;  %v307_v62 = vmul.f32 0.6931472, %v4268_v57 }
  0x31   : > { %v4272_v63 = vpop.eup %4271  ;;  %v309_v6 = vmul.f32 0.6931472, %v4270_v60  ;;  %v314_v7 = vmul.f32 %v305_v59, %v299_v54 }
  0x32   : > { %v4274_v8 = vpop.eup %4273  ;;  %v311_v9 = vmul.f32 0.6931472, %v4272_v63  ;;  %v315_v10 = vmul.f32 %v307_v62, %v300_v56 }
  0x33   : > { %v4276_v11 = vpop.eup %4275  ;;  %v313_v12 = vmul.f32 0.6931472, %v4274_v8  ;;  %v316_v13 = vmul.f32 %v309_v6, %v301_v58  ;;  %v319_v14 = vsel %vm289_vm2, %v314_v7, 0.0 }
  0x34   : > { %v4278_v15 = vpop.eup %4277  ;;  %v317_v16 = vmul.f32 %v311_v9, %v302_v61  ;;  %v320_v17 = vsel %vm290_vm3, %v315_v10, 0.0  ;;  %v325_v18 = vsel %vm324_vm0, %v319_v14, 0.0  ;;  %v350_v19 = vmul.f32 0.6931472, %v4276_v11 }
  0x35   : > { %v4280_v20 = vpop.eup %4279  ;;  %v318_v21 = vmul.f32 %v313_v12, %v303_v5  ;;  %v321_v22 = vsel %vm291_vm4, %v316_v13, 0.0  ;;  %v326_v23 = vsel %vm324_vm0, %v320_v17, 0.0  ;;  %v352_v24 = vmul.f32 0.6931472, %v4278_v15 }
  0x36   : > { %v4282_v25 = vpop.eup %4281  ;;  %v322_v26 = vsel %vm292_vm5, %v317_v16, 0.0  ;;  %v327_v27 = vadd.f32 %v326_v23, %v325_v18  ;;  %v328_v28 = vsel %vm324_vm0, %v321_v22, 0.0  ;;  %v354_v29 = vmul.f32 0.6931472, %v4280_v20 }
  0x37   : > { %v4284_v30 = vpop.eup %4283  ;;  %v323_v31 = vsel %vm293_vm6, %v318_v21, 0.0  ;;  %v330_v32 = vsel %vm324_vm0, %v322_v26, 0.0  ;;  %v356_v33 = vmul.f32 0.6931472, %v4282_v25  ;;  %v359_v34 = vsub.f32 0.0, %v350_v19 }
  0x38   : > { %v329_v35 = vadd.f32 %v328_v28, %v327_v27  ;;  %v358_v36 = vmul.f32 0.6931472, %v4284_v30  ;;  %v360_v37 = vsub.f32 0.0, %v352_v24  ;;  %v332_v38 = vsel %vm324_vm0, %v323_v31, 0.0 }
  0x39   : > { %v361_v39 = vsub.f32 0.0, %v354_v29  ;;  %v362_v40 = vsub.f32 0.0, %v356_v33  ;;  %v364_v41 = vsel %vm294_vm7, %v359_v34, 0.0 }
  0x3a   : > { %v331_v42 = vadd.f32 %v330_v32, %v329_v35  ;;  %v363_v43 = vsub.f32 0.0, %v358_v36  ;;  %v365_v44 = vsel %vm295_vm8, %v360_v37, 0.0  ;;  %v369_v45 = vsel %vm324_vm0, %v364_v41, 0.0 }
  0x3b   : > { %v366_v46 = vsel %vm296_vm9, %v361_v39, 0.0  ;;  %v367_v47 = vsel %vm297_vm10, %v362_v40, 0.0  ;;  %v370_v48 = vsel %vm324_vm0, %v365_v44, 0.0 }
  0x3c   : > { %v333_v49 = vadd.f32 %v332_v38, %v331_v42  ;;  %v368_v0 = vsel %vm298_vm11, %v363_v43, 0.0  ;;  %v371_v50 = vadd.f32 %v370_v48, %v369_v45  ;;  %v372_v51 = vsel %vm324_vm0, %v366_v46, 0.0 }
  0x3d   : > { %v374_v1 = vsel %vm324_vm0, %v367_v47, 0.0  ;;  %v376_v53 = vsel %vm324_vm0, %v368_v0, 0.0 }
  0x3e   : > { %334 = vadd.xlane.f32.xlu0 %v333_v49  ;;  %v373_v52 = vadd.f32 %v372_v51, %v371_v50 }
  0x40   : > { %v375_v2 = vadd.f32 %v374_v1, %v373_v52 }
  0x42   : > { %v377_v54 = vadd.f32 %v376_v53, %v375_v2 }
  0x44   : > { %378 = vadd.xlane.f32.xlu0 %v377_v54 }
  0xa9   : > { %v408_v4 = vpop.xlane.xlu1 %407 }
  0xaa   : > { %v409_v56 = vrot.slane %v408_v4, 4 }
  0xac   : > { %v410_v60 = vadd.f32 %v409_v56, %v408_v4 }
  0xad   : > { %v436_v55 = vpop.xlane.xlu1 %435 }
  0xae   : > { %v437_v57 = vrot.slane %v436_v55, 4  ;;  %v411_v5 = vrot.slane %v410_v60, 2 }
  0xb0   : > { %v438_v61 = vadd.f32 %v437_v57, %v436_v55  ;;  %v412_v12 = vadd.f32 %v411_v5, %v410_v60 }
  0xb2   : > { %v439_v7 = vrot.slane %v438_v61, 2  ;;  %v413_v17 = vrot.slane %v412_v12, 1 }
  0xb4   : > { %v440_v13 = vadd.f32 %v439_v7, %v438_v61  ;;  %v414_v21 = vadd.f32 %v413_v17, %v412_v12 }
  0xb6   : > { %v441_v19 = vrot.slane %v440_v13, 1 }
  0xb8   : > { %v442_v22 = vadd.f32 %v441_v19, %v440_v13 }
  0xc7   : > { %v335_v58 = vpop.xlane.xlu0 %334 }
  0xc8   : > { %v336_v59 = vrot.slane %v335_v58, 4 }
  0xca   : > { %v337_v62 = vadd.f32 %v336_v59, %v335_v58 }
  0xcc   : > { %v338_v63 = vrot.slane %v337_v62, 2 }
  0xcd   : > { %v379_v6 = vpop.xlane.xlu0 %378 }
  0xce   : > { %v380_v8 = vrot.slane %v379_v6, 4  ;;  %v339_v9 = vadd.f32 %v338_v63, %v337_v62 }
  0xd0   : > { %v381_v10 = vadd.f32 %v380_v8, %v379_v6  ;;  %v340_v11 = vrot.slane %v339_v9, 1 }
  0xd2   : > { %v382_v14 = vrot.slane %v381_v10, 2  ;;  %v341_v15 = vadd.f32 %v340_v11, %v339_v9 }
  0xd4   : > { %v383_v16 = vadd.f32 %v382_v14, %v381_v10  ;;  %4211 = vpush %v341_v15 }
  0xd6   : > { %v384_v18 = vrot.slane %v383_v16, 1 }
  0xd8   : > { %v385_v20 = vadd.f32 %v384_v18, %v383_v16 }
  0xda   : > { %4213 = vpush %v385_v20 }
  0xdb   : > { %4215 = vpush %v414_v21 }
  0xdc   : > { %4217 = vpush %v442_v22 }
 0x105   : > { %s4212_s22 = spop %4211 }
 0x106   : > { %s343_s30 = smul.f32 1.3989422, %s4212_s22 }
 0x10b   : > { %s4214_s23 = spop %4213 }
 0x10c   : > { %s4216_s25 = spop %4215  ;;  %s387_s8 = smul.f32 1.3989422, %s4214_s23 }
 0x10d   : > { %s445_s27 = smax.f32 %s4416_s26, %s4216_s25  ;;  %s4218_s28 = spop %4217 }
 0x10e   : > { %v446_v23 = vstv %s445_s27  ;;  %s452_s29 = smax.f32 %s4416_s26, %s4218_s28  ;;  %p444_p5 = scmp.gt.f32.partialorder %s4216_s25, 0.0 }
 0x10f   : > { %4285 = vrcp.f32 %v446_v23  ;;  %v453_v24 = vstv %s452_s29  ;;  %p451_p6 = scmp.gt.f32.partialorder %s4218_s28, 0.0 }
 0x110   : > { %4287 = vrcp.f32 %v453_v24 }
 0x11c   : > { %v4286_v25 = vpop.eup %4285 }
 0x11d   : > { %4219 = vpush %v4286_v25  ;;  %v4288_v26 = vpop.eup %4287 }
 0x11e   : > { %4221 = vpush %v4288_v26 }
 0x14e   : > { %s4220_s6 = spop %4219 }
 0x14f   : > { %s449_s7 = smul.f32 %s4220_s6, %s343_s30  ;;  %s4222_s9 = spop %4221 }
 0x150   : > { %s456_s10 = smul.f32 %s4222_s9, %s387_s8 }
 0x151   : > { %s6650_s7 = smov (!%p444_p5, %s449_s7), 0.0 }
 0x152   : > { %s6652_s10 = smov (!%p451_p6, %s456_s10), 0.0 }
 0x153   : > { %s458_s11 = sadd.f32 %s6652_s10, %s6650_s7 }
 0x155   : > { %460 = sst [smem:[#allocation7]] %s458_s11 }
 0x156 PF: > { %v478_v27 = vld [vmem:[%s6562_s1 + $0x8] sm:$0xff]  ;;  %v758_v28 = vld [vmem:[%s6562_s1 + $0x18] sm:$0xff]  ;;  %v477_v29 = vld [vmem:[%s6562_s1] sm:$0xff]  ;;  %vm479_vm12 = vcmask 64512   ;;  %v6567_v32 = vmov 0.0   ;;  %s4418_s8 = smov 123  }
 0x157   : > { %558 = vmatprep.subr.mxu0 %v478_v27  ;;  %789 = vmatprep.subr.mxu1 %v758_v28  ;;  %v757_v30 = vld [vmem:[%s6562_s1 + $0x10] sm:$0xff]  ;;  %v4631_v31 = vld [vmem:[%s4468_s24] sm:$0xff]  ;;  %v989_v33 = vld [vmem:[%s6562_s1 + $0x28] sm:$0xff]  ;;  %p4195_p7 = scmp.ne.s32.totalorder %s4460_s19, 18 }
 0x158   : > { %559 = vmatpush1.msra.mxu0 %v477_v29  ;;  %592 = vmatprep.mubr.f32.mxu0 %v6567_v32  ;;  %v988_v34 = vld [vmem:[%s6562_s1 + $0x20] sm:$0xff]  ;;  %v1220_v35 = vld [vmem:[%s6562_s1 + $0x38] sm:$0xff]  ;;  %v4650_v36 = vld [vmem:[%s4468_s24 + $0x8] sm:$0xff]  ;;  %s4421_s22 = smov (!%p4195_p7), 1.0  }
 0x159   : > { %790 = vmatpush1.msra.mxu1 %v757_v30  ;;  %823 = vmatprep.mubr.f32.mxu1 %v6567_v32  ;;  %v1219_v37 = vld [vmem:[%s6562_s1 + $0x30] sm:$0xff]  ;;  %v1451_v38 = vld [vmem:[%s6562_s1 + $0x48] sm:$0xff]  ;;  %v1682_v39 = vld [vmem:[%s6562_s1 + $0x58] sm:$0xff] }
 0x15a   : > { %4019 = vmatmul.mubr.msk.f32.vlgmr.msra.gmra.mxu0 %vm479_vm12, %v4631_v31  ;;  %4035 = vmatmul.mubr.msk.f32.vlgmr.msra.gmra.mxu1 %vm479_vm12, %v4631_v31  ;;  %v4668_v40 = vld [vmem:[%s4468_s24 + $0x10] sm:$0xff]  ;;  %v4678_v41 = vld [vmem:[%s4468_s24 + $0x18] sm:$0xff]  ;;  %v4687_v42 = vld [vmem:[%s4468_s24 + $0x20] sm:$0xff] }
 0x15b   : > { %1020 = vmatprep.subr.mxu0 %v989_v33  ;;  %598 = vmatprep.mubr.f32.mxu0 %v6567_v32  ;;  %v4696_v43 = vld [vmem:[%s4468_s24 + $0x28] sm:$0xff]  ;;  %v4705_v44 = vld [vmem:[%s4468_s24 + $0x30] sm:$0xff]  ;;  %v4714_v45 = vld [vmem:[%s4468_s24 + $0x38] sm:$0xff] }
 0x15c   : > { %1021 = vmatpush1.msra.mxu0 %v988_v34  ;;  %829 = vmatprep.mubr.f32.mxu1 %v6567_v32  ;;  %v4723_v46 = vld [vmem:[%s4468_s24 + $0x40] sm:$0xff]  ;;  %v4732_v47 = vld [vmem:[%s4468_s24 + $0x48] sm:$0xff]  ;;  %v4741_v48 = vld [vmem:[%s4468_s24 + $0x50] sm:$0xff] }
 0x15d   : > { %1251 = vmatprep.subr.mxu1 %v1220_v35  ;;  %1482 = vmatprep.subr.mxu0 %v1451_v38  ;;  %v4750_v49 = vld [vmem:[%s4468_s24 + $0x58] sm:$0xff]  ;;  %v4759_v0 = vld [vmem:[%s4468_s24 + $0x60] sm:$0xff]  ;;  %v4768_v50 = vld [vmem:[%s4468_s24 + $0x68] sm:$0xff] }
 0x15e   : > { %4020 = vmatmul.mubr.msk.f32.gmra.mxu0 %vm479_vm12, %v4650_v36  ;;  %4036 = vmatmul.mubr.msk.f32.gmra.mxu1 %vm479_vm12, %v4650_v36  ;;  %v4777_v51 = vld [vmem:[%s4468_s24 + $0x70] sm:$0xff]  ;;  %v4786_v1 = vld [vmem:[%s4468_s24 + $0x78] sm:$0xff]  ;;  %v1450_v52 = vld [vmem:[%s6562_s1 + $0x40] sm:$0xff] }
 0x15f   : > { %1252 = vmatpush1.msra.mxu1 %v1219_v37  ;;  %604 = vmatprep.mubr.f32.mxu0 %v6567_v32  ;;  %v1681_v53 = vld [vmem:[%s6562_s1 + $0x50] sm:$0xff]  ;;  %v1913_v2 = vld [vmem:[%s6562_s1 + $0x68] sm:$0xff]  ;;  %v2144_v54 = vld [vmem:[%s6562_s1 + $0x78] sm:$0xff] }
 0x160   : > { %835 = vmatprep.mubr.f32.mxu1 %v6567_v32  ;;  %1713 = vmatprep.subr.mxu1 %v1682_v39  ;;  %v1912_v3 = vld [vmem:[%s6562_s1 + $0x60] sm:$0xff]  ;;  %v2143_v4 = vld [vmem:[%s6562_s1 + $0x70] sm:$0xff]  ;;  %v2375_v55 = vld [vmem:[%s6562_s1 + $0x88] sm:$0xff] }
 0x161   : > { %v2606_v56 = vld [vmem:[%s6562_s1 + $0x98] sm:$0xff]  ;;  %v2374_v57 = vld [vmem:[%s6562_s1 + $0x80] sm:$0xff]  ;;  %v2605_v58 = vld [vmem:[%s6562_s1 + $0x90] sm:$0xff] }
 0x162   : > { %4021 = vmatmul.mubr.msk.f32.gmra.mxu0 %vm479_vm12, %v4668_v40  ;;  %4037 = vmatmul.mubr.msk.f32.gmra.mxu1 %vm479_vm12, %v4668_v40 }
 0x163   : > { %610 = vmatprep.mubr.f32.mxu0 %v6567_v32  ;;  %841 = vmatprep.mubr.f32.mxu1 %v6567_v32 }
 0x166   : > { %4022 = vmatmul.mubr.msk.f32.gmra.mxu0 %vm479_vm12, %v4678_v41  ;;  %4038 = vmatmul.mubr.msk.f32.gmra.mxu1 %vm479_vm12, %v4678_v41 }
 0x167   : > { %616 = vmatprep.mubr.f32.mxu0 %v6567_v32  ;;  %847 = vmatprep.mubr.f32.mxu1 %v6567_v32 }
 0x16a   : > { %4023 = vmatmul.mubr.msk.f32.gmra.mxu0 %vm479_vm12, %v4687_v42  ;;  %4039 = vmatmul.mubr.msk.f32.gmra.mxu1 %vm479_vm12, %v4687_v42 }
 0x16b   : > { %622 = vmatprep.mubr.f32.mxu0 %v6567_v32  ;;  %853 = vmatprep.mubr.f32.mxu1 %v6567_v32 }
 0x16e   : > { %4024 = vmatmul.mubr.msk.f32.gmra.mxu0 %vm479_vm12, %v4696_v43  ;;  %4040 = vmatmul.mubr.msk.f32.gmra.mxu1 %vm479_vm12, %v4696_v43 }
 0x16f   : > { %628 = vmatprep.mubr.f32.mxu0 %v6567_v32  ;;  %859 = vmatprep.mubr.f32.mxu1 %v6567_v32 }
 0x172   : > { %4025 = vmatmul.mubr.msk.f32.gmra.mxu0 %vm479_vm12, %v4705_v44  ;;  %4041 = vmatmul.mubr.msk.f32.gmra.mxu1 %vm479_vm12, %v4705_v44 }
 0x173   : > { %634 = vmatprep.mubr.f32.mxu0 %v6567_v32  ;;  %865 = vmatprep.mubr.f32.mxu1 %v6567_v32 }
 0x176   : > { %4026 = vmatmul.mubr.msk.f32.gmra.mxu0 %vm479_vm12, %v4714_v45  ;;  %4042 = vmatmul.mubr.msk.f32.gmra.mxu1 %vm479_vm12, %v4714_v45 }
 0x177   : > { %640 = vmatprep.mubr.f32.mxu0 %v6567_v32  ;;  %871 = vmatprep.mubr.f32.mxu1 %v6567_v32 }
 0x17a   : > { %4027 = vmatmul.mubr.msk.f32.gmra.mxu0 %vm479_vm12, %v4723_v46  ;;  %4043 = vmatmul.mubr.msk.f32.gmra.mxu1 %vm479_vm12, %v4723_v46 }
 0x17b   : > { %646 = vmatprep.mubr.f32.mxu0 %v6567_v32  ;;  %877 = vmatprep.mubr.f32.mxu1 %v6567_v32 }
 0x17e   : > { %4028 = vmatmul.mubr.msk.f32.gmra.mxu0 %vm479_vm12, %v4732_v47  ;;  %4044 = vmatmul.mubr.msk.f32.gmra.mxu1 %vm479_vm12, %v4732_v47 }
 0x17f   : > { %652 = vmatprep.mubr.f32.mxu0 %v6567_v32  ;;  %883 = vmatprep.mubr.f32.mxu1 %v6567_v32 }
 0x182   : > { %4029 = vmatmul.mubr.msk.f32.gmra.mxu0 %vm479_vm12, %v4741_v48  ;;  %4045 = vmatmul.mubr.msk.f32.gmra.mxu1 %vm479_vm12, %v4741_v48 }
 0x183   : > { %658 = vmatprep.mubr.f32.mxu0 %v6567_v32  ;;  %889 = vmatprep.mubr.f32.mxu1 %v6567_v32 }
 0x186   : > { %4030 = vmatmul.mubr.msk.f32.gmra.mxu0 %vm479_vm12, %v4750_v49  ;;  %4046 = vmatmul.mubr.msk.f32.gmra.mxu1 %vm479_vm12, %v4750_v49 }
 0x187   : > { %664 = vmatprep.mubr.f32.mxu0 %v6567_v32  ;;  %895 = vmatprep.mubr.f32.mxu1 %v6567_v32 }
 0x18a   : > { %4031 = vmatmul.mubr.msk.f32.gmra.mxu0 %vm479_vm12, %v4759_v0  ;;  %4047 = vmatmul.mubr.msk.f32.gmra.mxu1 %vm479_vm12, %v4759_v0 }
 0x18b   : > { %670 = vmatprep.mubr.f32.mxu0 %v6567_v32  ;;  %901 = vmatprep.mubr.f32.mxu1 %v6567_v32 }
 0x18e   : > { %4032 = vmatmul.mubr.msk.f32.gmra.mxu0 %vm479_vm12, %v4768_v50  ;;  %4048 = vmatmul.mubr.msk.f32.gmra.mxu1 %vm479_vm12, %v4768_v50 }
 0x18f   : > { %676 = vmatprep.mubr.f32.mxu0 %v6567_v32  ;;  %907 = vmatprep.mubr.f32.mxu1 %v6567_v32 }
 0x192   : > { %4033 = vmatmul.mubr.msk.f32.gmra.mxu0 %vm479_vm12, %v4777_v51  ;;  %4049 = vmatmul.mubr.msk.f32.gmra.mxu1 %vm479_vm12, %v4777_v51 }
 0x193   : > { %682 = vmatprep.mubr.f32.mxu0 %v6567_v32  ;;  %913 = vmatprep.mubr.f32.mxu1 %v6567_v32 }
 0x196   : > { %4034 = vmatmul.mubr.msk.f32.gmra.mxu0 %vm479_vm12, %v4786_v1  ;;  %4050 = vmatmul.mubr.msk.f32.gmra.mxu1 %vm479_vm12, %v4786_v1 }
 0x197   : > { %1054 = vmatprep.mubr.f32.mxu0 %v6567_v32  ;;  %1285 = vmatprep.mubr.f32.mxu1 %v6567_v32 }
 0x19a   : > { %4051 = vmatmul.mubr.msk.f32.vlgmr.msra.gmra.mxu0 %vm479_vm12, %v4631_v31  ;;  %4067 = vmatmul.mubr.msk.f32.vlgmr.msra.gmra.mxu1 %vm479_vm12, %v4631_v31 }
 0x19b   : > { %1483 = vmatpush1.msra.mxu0 %v1450_v52  ;;  %1060 = vmatprep.mubr.f32.mxu0 %v6567_v32 }
 0x19c   : > { %1291 = vmatprep.mubr.f32.mxu1 %v6567_v32  ;;  %1714 = vmatpush1.msra.mxu1 %v1681_v53 }
 0x19d   : > { %1944 = vmatprep.subr.mxu0 %v1913_v2  ;;  %2175 = vmatprep.subr.mxu1 %v2144_v54 }
 0x19e   : > { %4052 = vmatmul.mubr.msk.f32.gmra.mxu0 %vm479_vm12, %v4650_v36  ;;  %4068 = vmatmul.mubr.msk.f32.gmra.mxu1 %vm479_vm12, %v4650_v36 }
 0x19f   : > { %1066 = vmatprep.mubr.f32.mxu0 %v6567_v32  ;;  %1297 = vmatprep.mubr.f32.mxu1 %v6567_v32 }
 0x1a2   : > { %4053 = vmatmul.mubr.msk.f32.gmra.mxu0 %vm479_vm12, %v4668_v40  ;;  %4069 = vmatmul.mubr.msk.f32.gmra.mxu1 %vm479_vm12, %v4668_v40 }
 0x1a3   : > { %1072 = vmatprep.mubr.f32.mxu0 %v6567_v32  ;;  %1303 = vmatprep.mubr.f32.mxu1 %v6567_v32 }
 0x1a6   : > { %4054 = vmatmul.mubr.msk.f32.gmra.mxu0 %vm479_vm12, %v4678_v41  ;;  %4070 = vmatmul.mubr.msk.f32.gmra.mxu1 %vm479_vm12, %v4678_v41 }
 0x1a7   : > { %1078 = vmatprep.mubr.f32.mxu0 %v6567_v32  ;;  %1309 = vmatprep.mubr.f32.mxu1 %v6567_v32 }
 0x1aa   : > { %4055 = vmatmul.mubr.msk.f32.gmra.mxu0 %vm479_vm12, %v4687_v42  ;;  %4071 = vmatmul.mubr.msk.f32.gmra.mxu1 %vm479_vm12, %v4687_v42 }
 0x1ab   : > { %1084 = vmatprep.mubr.f32.mxu0 %v6567_v32  ;;  %1315 = vmatprep.mubr.f32.mxu1 %v6567_v32 }
 0x1ae   : > { %4056 = vmatmul.mubr.msk.f32.gmra.mxu0 %vm479_vm12, %v4696_v43  ;;  %4072 = vmatmul.mubr.msk.f32.gmra.mxu1 %vm479_vm12, %v4696_v43 }
 0x1af   : > { %1090 = vmatprep.mubr.f32.mxu0 %v6567_v32  ;;  %1321 = vmatprep.mubr.f32.mxu1 %v6567_v32 }
 0x1b2   : > { %4057 = vmatmul.mubr.msk.f32.gmra.mxu0 %vm479_vm12, %v4705_v44  ;;  %4073 = vmatmul.mubr.msk.f32.gmra.mxu1 %vm479_vm12, %v4705_v44 }
 0x1b3   : > { %1096 = vmatprep.mubr.f32.mxu0 %v6567_v32  ;;  %1327 = vmatprep.mubr.f32.mxu1 %v6567_v32 }
 0x1b6   : > { %4058 = vmatmul.mubr.msk.f32.gmra.mxu0 %vm479_vm12, %v4714_v45  ;;  %4074 = vmatmul.mubr.msk.f32.gmra.mxu1 %vm479_vm12, %v4714_v45 }
 0x1b7   : > { %1102 = vmatprep.mubr.f32.mxu0 %v6567_v32  ;;  %1333 = vmatprep.mubr.f32.mxu1 %v6567_v32 }
 0x1ba   : > { %4059 = vmatmul.mubr.msk.f32.gmra.mxu0 %vm479_vm12, %v4723_v46  ;;  %4075 = vmatmul.mubr.msk.f32.gmra.mxu1 %vm479_vm12, %v4723_v46 }
 0x1bb   : > { %1108 = vmatprep.mubr.f32.mxu0 %v6567_v32  ;;  %1339 = vmatprep.mubr.f32.mxu1 %v6567_v32 }
 0x1be   : > { %4060 = vmatmul.mubr.msk.f32.gmra.mxu0 %vm479_vm12, %v4732_v47  ;;  %4076 = vmatmul.mubr.msk.f32.gmra.mxu1 %vm479_vm12, %v4732_v47 }
 0x1bf   : > { %1114 = vmatprep.mubr.f32.mxu0 %v6567_v32  ;;  %1345 = vmatprep.mubr.f32.mxu1 %v6567_v32 }
 0x1c2   : > { %4061 = vmatmul.mubr.msk.f32.gmra.mxu0 %vm479_vm12, %v4741_v48  ;;  %4077 = vmatmul.mubr.msk.f32.gmra.mxu1 %vm479_vm12, %v4741_v48 }
 0x1c3   : > { %1120 = vmatprep.mubr.f32.mxu0 %v6567_v32  ;;  %1351 = vmatprep.mubr.f32.mxu1 %v6567_v32 }
 0x1c6   : > { %4062 = vmatmul.mubr.msk.f32.gmra.mxu0 %vm479_vm12, %v4750_v49  ;;  %4078 = vmatmul.mubr.msk.f32.gmra.mxu1 %vm479_vm12, %v4750_v49 }
 0x1c7   : > { %1126 = vmatprep.mubr.f32.mxu0 %v6567_v32  ;;  %1357 = vmatprep.mubr.f32.mxu1 %v6567_v32 }
 0x1ca   : > { %4063 = vmatmul.mubr.msk.f32.gmra.mxu0 %vm479_vm12, %v4759_v0  ;;  %4079 = vmatmul.mubr.msk.f32.gmra.mxu1 %vm479_vm12, %v4759_v0 }
 0x1cb   : > { %1132 = vmatprep.mubr.f32.mxu0 %v6567_v32  ;;  %1363 = vmatprep.mubr.f32.mxu1 %v6567_v32 }
 0x1ce   : > { %4064 = vmatmul.mubr.msk.f32.gmra.mxu0 %vm479_vm12, %v4768_v50  ;;  %4080 = vmatmul.mubr.msk.f32.gmra.mxu1 %vm479_vm12, %v4768_v50 }
 0x1cf   : > { %1138 = vmatprep.mubr.f32.mxu0 %v6567_v32  ;;  %1369 = vmatprep.mubr.f32.mxu1 %v6567_v32 }
 0x1d2   : > { %4065 = vmatmul.mubr.msk.f32.gmra.mxu0 %vm479_vm12, %v4777_v51  ;;  %4081 = vmatmul.mubr.msk.f32.gmra.mxu1 %vm479_vm12, %v4777_v51 }
 0x1d3   : > { %1144 = vmatprep.mubr.f32.mxu0 %v6567_v32  ;;  %1375 = vmatprep.mubr.f32.mxu1 %v6567_v32 }
 0x1d6   : > { %4066 = vmatmul.mubr.msk.f32.gmra.mxu0 %vm479_vm12, %v4786_v1  ;;  %4082 = vmatmul.mubr.msk.f32.gmra.mxu1 %vm479_vm12, %v4786_v1 }
 0x1d7   : > { %1516 = vmatprep.mubr.f32.mxu0 %v6567_v32  ;;  %1747 = vmatprep.mubr.f32.mxu1 %v6567_v32 }
 0x1da   : > { %4083 = vmatmul.mubr.msk.f32.vlgmr.msra.gmra.mxu0 %vm479_vm12, %v4631_v31  ;;  %4099 = vmatmul.mubr.msk.f32.vlgmr.msra.gmra.mxu1 %vm479_vm12, %v4631_v31 }
 0x1db   : > { %1945 = vmatpush1.msra.mxu0 %v1912_v3  ;;  %1522 = vmatprep.mubr.f32.mxu0 %v6567_v32 }
 0x1dc   : > { %1753 = vmatprep.mubr.f32.mxu1 %v6567_v32  ;;  %2176 = vmatpush1.msra.mxu1 %v2143_v4 }
 0x1dd   : > { %2406 = vmatprep.subr.mxu0 %v2375_v55  ;;  %2637 = vmatprep.subr.mxu1 %v2606_v56 }
 0x1de   : > { %4084 = vmatmul.mubr.msk.f32.gmra.mxu0 %vm479_vm12, %v4650_v36  ;;  %4100 = vmatmul.mubr.msk.f32.gmra.mxu1 %vm479_vm12, %v4650_v36 }
 0x1df   : > { %1528 = vmatprep.mubr.f32.mxu0 %v6567_v32  ;;  %1759 = vmatprep.mubr.f32.mxu1 %v6567_v32 }
 0x1e2   : > { %4085 = vmatmul.mubr.msk.f32.gmra.mxu0 %vm479_vm12, %v4668_v40  ;;  %4101 = vmatmul.mubr.msk.f32.gmra.mxu1 %vm479_vm12, %v4668_v40 }
 0x1e3   : > { %1534 = vmatprep.mubr.f32.mxu0 %v6567_v32  ;;  %1765 = vmatprep.mubr.f32.mxu1 %v6567_v32 }
 0x1e6   : > { %4086 = vmatmul.mubr.msk.f32.gmra.mxu0 %vm479_vm12, %v4678_v41  ;;  %4102 = vmatmul.mubr.msk.f32.gmra.mxu1 %vm479_vm12, %v4678_v41 }
 0x1e7   : > { %1540 = vmatprep.mubr.f32.mxu0 %v6567_v32  ;;  %1771 = vmatprep.mubr.f32.mxu1 %v6567_v32 }
 0x1ea   : > { %4087 = vmatmul.mubr.msk.f32.gmra.mxu0 %vm479_vm12, %v4687_v42  ;;  %4103 = vmatmul.mubr.msk.f32.gmra.mxu1 %vm479_vm12, %v4687_v42 }
 0x1eb   : > { %1546 = vmatprep.mubr.f32.mxu0 %v6567_v32  ;;  %1777 = vmatprep.mubr.f32.mxu1 %v6567_v32 }
 0x1ee   : > { %4088 = vmatmul.mubr.msk.f32.gmra.mxu0 %vm479_vm12, %v4696_v43  ;;  %4104 = vmatmul.mubr.msk.f32.gmra.mxu1 %vm479_vm12, %v4696_v43 }
 0x1ef   : > { %1552 = vmatprep.mubr.f32.mxu0 %v6567_v32  ;;  %1783 = vmatprep.mubr.f32.mxu1 %v6567_v32 }
 0x1f2   : > { %4089 = vmatmul.mubr.msk.f32.gmra.mxu0 %vm479_vm12, %v4705_v44  ;;  %4105 = vmatmul.mubr.msk.f32.gmra.mxu1 %vm479_vm12, %v4705_v44 }
 0x1f3   : > { %1558 = vmatprep.mubr.f32.mxu0 %v6567_v32  ;;  %1789 = vmatprep.mubr.f32.mxu1 %v6567_v32 }
 0x1f6   : > { %4090 = vmatmul.mubr.msk.f32.gmra.mxu0 %vm479_vm12, %v4714_v45  ;;  %4106 = vmatmul.mubr.msk.f32.gmra.mxu1 %vm479_vm12, %v4714_v45 }
 0x1f7   : > { %1564 = vmatprep.mubr.f32.mxu0 %v6567_v32  ;;  %1795 = vmatprep.mubr.f32.mxu1 %v6567_v32 }
 0x1fa   : > { %4091 = vmatmul.mubr.msk.f32.gmra.mxu0 %vm479_vm12, %v4723_v46  ;;  %4107 = vmatmul.mubr.msk.f32.gmra.mxu1 %vm479_vm12, %v4723_v46 }
 0x1fb   : > { %1570 = vmatprep.mubr.f32.mxu0 %v6567_v32  ;;  %1801 = vmatprep.mubr.f32.mxu1 %v6567_v32 }
 0x1fe   : > { %4092 = vmatmul.mubr.msk.f32.gmra.mxu0 %vm479_vm12, %v4732_v47  ;;  %4108 = vmatmul.mubr.msk.f32.gmra.mxu1 %vm479_vm12, %v4732_v47 }
 0x1ff   : > { %1576 = vmatprep.mubr.f32.mxu0 %v6567_v32  ;;  %1807 = vmatprep.mubr.f32.mxu1 %v6567_v32 }
 0x202   : > { %4093 = vmatmul.mubr.msk.f32.gmra.mxu0 %vm479_vm12, %v4741_v48  ;;  %4109 = vmatmul.mubr.msk.f32.gmra.mxu1 %vm479_vm12, %v4741_v48 }
 0x203   : > { %1582 = vmatprep.mubr.f32.mxu0 %v6567_v32  ;;  %1813 = vmatprep.mubr.f32.mxu1 %v6567_v32 }
 0x206   : > { %4094 = vmatmul.mubr.msk.f32.gmra.mxu0 %vm479_vm12, %v4750_v49  ;;  %4110 = vmatmul.mubr.msk.f32.gmra.mxu1 %vm479_vm12, %v4750_v49 }
 0x207   : > { %1588 = vmatprep.mubr.f32.mxu0 %v6567_v32  ;;  %1819 = vmatprep.mubr.f32.mxu1 %v6567_v32 }
 0x20a   : > { %4095 = vmatmul.mubr.msk.f32.gmra.mxu0 %vm479_vm12, %v4759_v0  ;;  %4111 = vmatmul.mubr.msk.f32.gmra.mxu1 %vm479_vm12, %v4759_v0 }
 0x20b   : > { %1594 = vmatprep.mubr.f32.mxu0 %v6567_v32  ;;  %1825 = vmatprep.mubr.f32.mxu1 %v6567_v32 }
 0x20e   : > { %4096 = vmatmul.mubr.msk.f32.gmra.mxu0 %vm479_vm12, %v4768_v50  ;;  %4112 = vmatmul.mubr.msk.f32.gmra.mxu1 %vm479_vm12, %v4768_v50 }
 0x20f   : > { %1600 = vmatprep.mubr.f32.mxu0 %v6567_v32  ;;  %1831 = vmatprep.mubr.f32.mxu1 %v6567_v32 }
 0x212   : > { %4097 = vmatmul.mubr.msk.f32.gmra.mxu0 %vm479_vm12, %v4777_v51  ;;  %4113 = vmatmul.mubr.msk.f32.gmra.mxu1 %vm479_vm12, %v4777_v51 }
 0x213   : > { %1606 = vmatprep.mubr.f32.mxu0 %v6567_v32  ;;  %1837 = vmatprep.mubr.f32.mxu1 %v6567_v32 }
 0x216   : > { %4098 = vmatmul.mubr.msk.f32.gmra.mxu0 %vm479_vm12, %v4786_v1  ;;  %4114 = vmatmul.mubr.msk.f32.gmra.mxu1 %vm479_vm12, %v4786_v1 }
 0x217   : > { %1978 = vmatprep.mubr.f32.mxu0 %v6567_v32  ;;  %2209 = vmatprep.mubr.f32.mxu1 %v6567_v32 }
 0x21a   : > { %v5016_v59 = vpop.f32.mrf.mxu0  ;;  %v5018_v60 = vpop.f32.mrf.mxu1  ;;  %4115 = vmatmul.mubr.msk.f32.vlgmr.msra.gmra.mxu0 %vm479_vm12, %v4631_v31  ;;  %4131 = vmatmul.mubr.msk.f32.vlgmr.msra.gmra.mxu1 %vm479_vm12, %v4631_v31 }
 0x21b   : > { %v689_v61 = vmin.f32 %v5016_v59, 1e+30  ;;  %2407 = vmatpush1.msra.mxu0 %v2374_v57  ;;  %1984 = vmatprep.mubr.f32.mxu0 %v6567_v32 }
 0x21c   : > { %v5026_v62 = vpop.f32.mrf.mxu0  ;;  %v5028_v63 = vpop.f32.mrf.mxu1  ;;  %2215 = vmatprep.mubr.f32.mxu1 %v6567_v32  ;;  %2638 = vmatpush1.msra.mxu1 %v2605_v58 }
 0x21d   : > { %v705_v5 = vmin.f32 %v689_v61, %v5026_v62 }
 0x21e   : > { %v5032_v6 = vpop.f32.mrf.mxu0  ;;  %v5034_v7 = vpop.f32.mrf.mxu1  ;;  %4116 = vmatmul.mubr.msk.f32.gmra.mxu0 %vm479_vm12, %v4650_v36  ;;  %4132 = vmatmul.mubr.msk.f32.gmra.mxu1 %vm479_vm12, %v4650_v36 }
 0x21f   : > { %v920_v8 = vmin.f32 %v705_v5, %v5018_v60  ;;  %v690_v9 = vmin.f32 %v5032_v6, 1e+30  ;;  %1990 = vmatprep.mubr.f32.mxu0 %v6567_v32  ;;  %2221 = vmatprep.mubr.f32.mxu1 %v6567_v32 }
 0x220   : > { %v5044_v10 = vpop.f32.mrf.mxu0  ;;  %v5046_v11 = vpop.f32.mrf.mxu1 }
 0x221   : > { %v5049_v12 = vmin.f32 %v920_v8, %v5028_v63  ;;  %v706_v13 = vmin.f32 %v690_v9, %v5044_v10 }
 0x222   : > { %v5052_v14 = vpop.f32.mrf.mxu0  ;;  %v5054_v15 = vpop.f32.mrf.mxu1  ;;  %4117 = vmatmul.mubr.msk.f32.gmra.mxu0 %vm479_vm12, %v4668_v40  ;;  %4133 = vmatmul.mubr.msk.f32.gmra.mxu1 %vm479_vm12, %v4668_v40 }
 0x223   : > { %v921_v16 = vmin.f32 %v706_v13, %v5034_v7  ;;  %v691_v17 = vmin.f32 %v5052_v14, 1e+30  ;;  %1996 = vmatprep.mubr.f32.mxu0 %v6567_v32  ;;  %2227 = vmatprep.mubr.f32.mxu1 %v6567_v32 }
 0x224   : > { %v5064_v18 = vpop.f32.mrf.mxu0  ;;  %v5066_v19 = vpop.f32.mrf.mxu1 }
 0x225   : > { %v5069_v20 = vmin.f32 %v921_v16, %v5046_v11  ;;  %v707_v21 = vmin.f32 %v691_v17, %v5064_v18 }
 0x226   : > { %v5072_v22 = vpop.f32.mrf.mxu0  ;;  %v5074_v23 = vpop.f32.mrf.mxu1  ;;  %4118 = vmatmul.mubr.msk.f32.gmra.mxu0 %vm479_vm12, %v4678_v41  ;;  %4134 = vmatmul.mubr.msk.f32.gmra.mxu1 %vm479_vm12, %v4678_v41 }
 0x227   : > { %v922_v24 = vmin.f32 %v707_v21, %v5054_v15  ;;  %v692_v25 = vmin.f32 %v5072_v22, 1e+30  ;;  %2002 = vmatprep.mubr.f32.mxu0 %v6567_v32  ;;  %2233 = vmatprep.mubr.f32.mxu1 %v6567_v32 }
 0x228   : > { %v5084_v26 = vpop.f32.mrf.mxu0  ;;  %v5086_v27 = vpop.f32.mrf.mxu1 }
 0x229   : > { %v5089_v28 = vmin.f32 %v922_v24, %v5066_v19  ;;  %v708_v29 = vmin.f32 %v692_v25, %v5084_v26 }
 0x22a   : > { %v5092_v30 = vpop.f32.mrf.mxu0  ;;  %v5094_v33 = vpop.f32.mrf.mxu1  ;;  %4119 = vmatmul.mubr.msk.f32.gmra.mxu0 %vm479_vm12, %v4687_v42  ;;  %4135 = vmatmul.mubr.msk.f32.gmra.mxu1 %vm479_vm12, %v4687_v42 }
 0x22b   : > { %v923_v34 = vmin.f32 %v708_v29, %v5074_v23  ;;  %v693_v35 = vmin.f32 %v5092_v30, 1e+30  ;;  %2008 = vmatprep.mubr.f32.mxu0 %v6567_v32  ;;  %2239 = vmatprep.mubr.f32.mxu1 %v6567_v32 }
 0x22c   : > { %v5104_v37 = vpop.f32.mrf.mxu0  ;;  %v5106_v38 = vpop.f32.mrf.mxu1 }
 0x22d   : > { %v5109_v39 = vmin.f32 %v923_v34, %v5086_v27  ;;  %v709_v41 = vmin.f32 %v693_v35, %v5104_v37  ;;  %v721_v35 = vmin.f32 %v5016_v59, %v5032_v6  ;;  %v722_v6 = vmin.f32 %v5026_v62, %v5044_v10 }
 0x22e   : > { %v5112_v52 = vpop.f32.mrf.mxu0  ;;  %v5114_v42 = vpop.f32.mrf.mxu1  ;;  %4120 = vmatmul.mubr.msk.f32.gmra.mxu0 %vm479_vm12, %v4696_v43  ;;  %4136 = vmatmul.mubr.msk.f32.gmra.mxu1 %vm479_vm12, %v4696_v43 }
 0x22f   : > { %v924_v53 = vmin.f32 %v709_v41, %v5094_v33  ;;  %v694_v2 = vmin.f32 %v5112_v52, 1e+30  ;;  %2014 = vmatprep.mubr.f32.mxu0 %v6567_v32  ;;  %2245 = vmatprep.mubr.f32.mxu1 %v6567_v32  ;;  %v952_v41 = vmin.f32 %v5018_v60, %v5034_v7  ;;  %v953_v7 = vmin.f32 %v5028_v63, %v5046_v11 }
 0x230   : > { %v5124_v54 = vpop.f32.mrf.mxu0  ;;  %v5126_v3 = vpop.f32.mrf.mxu1  ;;  %v724_v63 = vmin.f32 %v722_v6, %v5064_v18 }
 0x231   : > { %v5129_v4 = vmin.f32 %v924_v53, %v5106_v38  ;;  %v710_v55 = vmin.f32 %v694_v2, %v5124_v54  ;;  %v955_v10 = vmin.f32 %v953_v7, %v5066_v19 }
 0x232   : > { %v5132_v56 = vpop.f32.mrf.mxu0  ;;  %v5134_v43 = vpop.f32.mrf.mxu1  ;;  %4121 = vmatmul.mubr.msk.f32.gmra.mxu0 %vm479_vm12, %v4705_v44  ;;  %4137 = vmatmul.mubr.msk.f32.gmra.mxu1 %vm479_vm12, %v4705_v44 }
 0x233   : > { %v925_v57 = vmin.f32 %v710_v55, %v5114_v42  ;;  %v695_v58 = vmin.f32 %v5132_v56, 1e+30  ;;  %2020 = vmatprep.mubr.f32.mxu0 %v6567_v32  ;;  %2251 = vmatprep.mubr.f32.mxu1 %v6567_v32 }
 0x234   : > { %v5144_v61 = vpop.f32.mrf.mxu0  ;;  %v5146_v5 = vpop.f32.mrf.mxu1 }
 0x235   : > { %v5149_v8 = vmin.f32 %v925_v57, %v5126_v3  ;;  %v711_v9 = vmin.f32 %v695_v58, %v5144_v61  ;;  %v954_v58 = vmin.f32 %v952_v41, %v5054_v15  ;;  %v726_v41 = vmin.f32 %v724_v63, %v5084_v26 }
 0x236   : > { %v5152_v13 = vpop.f32.mrf.mxu0  ;;  %v5154_v44 = vpop.f32.mrf.mxu1  ;;  %4122 = vmatmul.mubr.msk.f32.gmra.mxu0 %vm479_vm12, %v4714_v45  ;;  %4138 = vmatmul.mubr.msk.f32.gmra.mxu1 %vm479_vm12, %v4714_v45 }
 0x237   : > { %v926_v16 = vmin.f32 %v711_v9, %v5134_v43  ;;  %v696_v17 = vmin.f32 %v5152_v13, 1e+30  ;;  %2026 = vmatprep.mubr.f32.mxu0 %v6567_v32  ;;  %2257 = vmatprep.mubr.f32.mxu1 %v6567_v32  ;;  %v956_v15 = vmin.f32 %v954_v58, %v5074_v23  ;;  %v728_v26 = vmin.f32 %v726_v41, %v5104_v37 }
 0x238   : > { %v5164_v21 = vpop.f32.mrf.mxu0  ;;  %v5166_v24 = vpop.f32.mrf.mxu1 }
 0x239   : > { %v5169_v25 = vmin.f32 %v926_v16, %v5146_v5  ;;  %v712_v29 = vmin.f32 %v696_v17, %v5164_v21  ;;  %v730_v7 = vmin.f32 %v728_v26, %v5124_v54 }
 0x23a   : > { %v5172_v34 = vpop.f32.mrf.mxu0  ;;  %v5174_v45 = vpop.f32.mrf.mxu1  ;;  %4123 = vmatmul.mubr.msk.f32.gmra.mxu0 %vm479_vm12, %v4723_v46  ;;  %4139 = vmatmul.mubr.msk.f32.gmra.mxu1 %vm479_vm12, %v4723_v46  ;;  %v723_v46 = vmin.f32 %v721_v35, %v5052_v14 }
 0x23b   : > { %v927_v53 = vmin.f32 %v712_v29, %v5154_v44  ;;  %v697_v2 = vmin.f32 %v5172_v34, 1e+30  ;;  %2032 = vmatprep.mubr.f32.mxu0 %v6567_v32  ;;  %2263 = vmatprep.mubr.f32.mxu1 %v6567_v32  ;;  %v732_v54 = vmin.f32 %v730_v7, %v5144_v61 }
 0x23c   : > { %v5188_v55 = vpop.f32.mrf.mxu0  ;;  %v5190_v57 = vpop.f32.mrf.mxu1  ;;  %v725_v14 = vmin.f32 %v723_v46, %v5072_v22  ;;  %v958_v22 = vmin.f32 %v956_v15, %v5094_v33 }
 0x23d   : > { %v5195_v59 = vmin.f32 %v927_v53, %v5166_v24  ;;  %v713_v60 = vmin.f32 %v697_v2, %v5188_v55  ;;  %v957_v53 = vmin.f32 %v955_v10, %v5086_v27 }
 0x23e   : > { %v5202_v9 = vpop.f32.mrf.mxu0  ;;  %v5204_v16 = vpop.f32.mrf.mxu1  ;;  %4124 = vmatmul.mubr.msk.f32.gmra.mxu0 %vm479_vm12, %v4732_v47  ;;  %4140 = vmatmul.mubr.msk.f32.gmra.mxu1 %vm479_vm12, %v4732_v47  ;;  %v727_v47 = vmin.f32 %v725_v14, %v5092_v30  ;;  %v960_v30 = vmin.f32 %v958_v22, %v5114_v42 }
 0x23f   : > { %v928_v17 = vmin.f32 %v713_v60, %v5174_v45  ;;  %v698_v62 = vmin.f32 %v5202_v9, 1e+30  ;;  %2038 = vmatprep.mubr.f32.mxu0 %v6567_v32  ;;  %2269 = vmatprep.mubr.f32.mxu1 %v6567_v32  ;;  %v959_v27 = vmin.f32 %v957_v53, %v5106_v38 }
 0x240   : > { %v5218_v11 = vpop.f32.mrf.mxu0  ;;  %v5220_v29 = vpop.f32.mrf.mxu1  ;;  %v729_v19 = vmin.f32 %v727_v47, %v5112_v52 }
 0x241   : > { %v5225_v23 = vmin.f32 %v928_v17, %v5190_v57  ;;  %v714_v35 = vmin.f32 %v698_v62, %v5218_v11  ;;  %v961_v14 = vmin.f32 %v959_v27, %v5126_v3 }
 0x242   : > { %v654_v18 = vpop.f32.mrf.mxu0  ;;  %v885_v2 = vpop.f32.mrf.mxu1  ;;  %4125 = vmatmul.mubr.msk.f32.gmra.mxu0 %vm479_vm12, %v4741_v48  ;;  %4141 = vmatmul.mubr.msk.f32.gmra.mxu1 %vm479_vm12, %v4741_v48  ;;  %v731_v6 = vmin.f32 %v729_v19, %v5132_v56  ;;  %v962_v48 = vmin.f32 %v960_v30, %v5134_v43 }
 0x243   : > { %v929_v33 = vmin.f32 %v714_v35, %v5204_v16  ;;  %v699_v46 = vmin.f32 %v654_v18, 1e+30  ;;  %2044 = vmatprep.mubr.f32.mxu0 %v6567_v32  ;;  %2275 = vmatprep.mubr.f32.mxu1 %v6567_v32  ;;  %v963_v3 = vmin.f32 %v961_v14, %v5146_v5 }
 0x244   : > { %v656_v58 = vpop.f32.mrf.mxu0  ;;  %v887_v60 = vpop.f32.mrf.mxu1  ;;  %v733_v37 = vmin.f32 %v731_v6, %v5152_v13  ;;  %v964_v38 = vmin.f32 %v962_v48, %v5154_v44  ;;  %v734_v44 = vmin.f32 %v732_v54, %v5164_v21 }
 0x245   : > { %v5244_v52 = vmin.f32 %v929_v33, %v5220_v29  ;;  %v715_v42 = vmin.f32 %v699_v46, %v656_v58  ;;  %v965_v22 = vmin.f32 %v963_v3, %v5166_v24 }
 0x246   : > { %v660_v15 = vpop.f32.mrf.mxu0  ;;  %v891_v17 = vpop.f32.mrf.mxu1  ;;  %4126 = vmatmul.mubr.msk.f32.gmra.mxu0 %vm479_vm12, %v4750_v49  ;;  %4142 = vmatmul.mubr.msk.f32.gmra.mxu1 %vm479_vm12, %v4750_v49  ;;  %v735_v10 = vmin.f32 %v733_v37, %v5172_v34  ;;  %v966_v49 = vmin.f32 %v964_v38, %v5174_v45  ;;  %v736_v21 = vmin.f32 %v734_v44, %v5188_v55 }
 0x247   : > { %v930_v56 = vmin.f32 %v715_v42, %v885_v2  ;;  %v700_v43 = vmin.f32 %v660_v15, 1e+30  ;;  %2050 = vmatprep.mubr.f32.mxu0 %v6567_v32  ;;  %2281 = vmatprep.mubr.f32.mxu1 %v6567_v32  ;;  %v967_v24 = vmin.f32 %v965_v22, %v5190_v57 }
 0x248   : > { %v662_v62 = vpop.f32.mrf.mxu0  ;;  %v893_v63 = vpop.f32.mrf.mxu1  ;;  %v737_v61 = vmin.f32 %v735_v10, %v5202_v9  ;;  %v968_v5 = vmin.f32 %v966_v49, %v5204_v16  ;;  %v738_v9 = vmin.f32 %v736_v21, %v5218_v11 }
 0x249   : > { %v5260_v47 = vmin.f32 %v930_v56, %v887_v60  ;;  %v716_v13 = vmin.f32 %v700_v43, %v662_v62  ;;  %v969_v16 = vmin.f32 %v967_v24, %v5220_v29 }
 0x24a   : > { %v666_v35 = vpop.f32.mrf.mxu0  ;;  %v897_v41 = vpop.f32.mrf.mxu1  ;;  %4127 = vmatmul.mubr.msk.f32.gmra.mxu0 %vm479_vm12, %v4759_v0  ;;  %4143 = vmatmul.mubr.msk.f32.gmra.mxu1 %vm479_vm12, %v4759_v0  ;;  %v739_v30 = vmin.f32 %v737_v61, %v654_v18  ;;  %v970_v33 = vmin.f32 %v968_v5, %v885_v2  ;;  %v740_v2 = vmin.f32 %v738_v9, %v656_v58  ;;  %v982_v5 = vld [vmem:[#allocation2 + $0x50] sm:$0xff] }
 0x24b   : > { %v931_v34 = vmin.f32 %v716_v13, %v891_v17  ;;  %v701_v45 = vmin.f32 %v666_v35, 1e+30  ;;  %2056 = vmatprep.mubr.f32.mxu0 %v6567_v32  ;;  %2287 = vmatprep.mubr.f32.mxu1 %v6567_v32  ;;  %v971_v11 = vmin.f32 %v969_v16, %v887_v60 }
 0x24c   : > { %v668_v53 = vpop.f32.mrf.mxu0  ;;  %v899_v19 = vpop.f32.mrf.mxu1  ;;  %v741_v55 = vmin.f32 %v739_v30, %v660_v15  ;;  %v972_v57 = vmin.f32 %v970_v33, %v891_v17  ;;  %v742_v38 = vmin.f32 %v740_v2, %v662_v62 }
 0x24d   : > { %v5274_v46 = vmin.f32 %v931_v34, %v893_v63  ;;  %v717_v0 = vmin.f32 %v701_v45, %v668_v53  ;;  %v973_v56 = vmin.f32 %v971_v11, %v893_v63 }
 0x24e   : > { %v672_v26 = vpop.f32.mrf.mxu0  ;;  %v903_v27 = vpop.f32.mrf.mxu1  ;;  %4128 = vmatmul.mubr.msk.f32.gmra.mxu0 %vm479_vm12, %v4768_v50  ;;  %4144 = vmatmul.mubr.msk.f32.gmra.mxu1 %vm479_vm12, %v4768_v50  ;;  %v743_v42 = vmin.f32 %v741_v55, %v666_v35  ;;  %v974_v7 = vmin.f32 %v972_v57, %v897_v41  ;;  %v744_v54 = vmin.f32 %v742_v38, %v668_v53  ;;  %v983_v55 = vld [vmem:[#allocation2 + $0x18] sm:$0xff] }
 0x24f   : > { %v932_v6 = vmin.f32 %v717_v0, %v897_v41  ;;  %v702_v18 = vmin.f32 %v672_v26, 1e+30  ;;  %2062 = vmatprep.mubr.f32.mxu0 %v6567_v32  ;;  %2293 = vmatprep.mubr.f32.mxu1 %v6567_v32  ;;  %v975_v3 = vmin.f32 %v973_v56, %v899_v19  ;;  %v751_v41 = vld [vmem:[#allocation2] sm:$0xff] }
 0x250   : > { %v674_v48 = vpop.f32.mrf.mxu0  ;;  %v905_v29 = vpop.f32.mrf.mxu1  ;;  %v745_v17 = vmin.f32 %v743_v42, %v672_v26  ;;  %v976_v58 = vmin.f32 %v974_v7, %v903_v27 }
 0x251   : > { %v5284_v14 = vmin.f32 %v932_v6, %v899_v19  ;;  %v718_v37 = vmin.f32 %v702_v18, %v674_v48  ;;  %v746_v22 = vmin.f32 %v744_v54, %v674_v48  ;;  %v977_v35 = vmin.f32 %v975_v3, %v905_v29 }
 0x252   : > { %v678_v50 = vpop.f32.mrf.mxu0  ;;  %v909_v15 = vpop.f32.mrf.mxu1  ;;  %4129 = vmatmul.mubr.msk.f32.gmra.mxu0 %vm479_vm12, %v4777_v51  ;;  %4145 = vmatmul.mubr.msk.f32.gmra.mxu1 %vm479_vm12, %v4777_v51 }
 0x253   : > { %v933_v60 = vmin.f32 %v718_v37, %v903_v27  ;;  %v703_v43 = vmin.f32 %v678_v50, 1e+30  ;;  %2068 = vmatprep.mubr.f32.mxu0 %v6567_v32  ;;  %2299 = vmatprep.mubr.f32.mxu1 %v6567_v32  ;;  %v747_v49 = vmin.f32 %v745_v17, %v678_v50  ;;  %v978_v13 = vmin.f32 %v976_v58, %v909_v15  ;;  %v752_v27 = vld [vmem:[#allocation2 + $0x38] sm:$0xff] }
 0x254   : > { %v680_v62 = vpop.f32.mrf.mxu0  ;;  %v911_v63 = vpop.f32.mrf.mxu1 }
 0x255   : > { %v5292_v10 = vmin.f32 %v933_v60, %v905_v29  ;;  %v719_v44 = vmin.f32 %v703_v43, %v680_v62  ;;  %v748_v53 = vmin.f32 %v746_v22, %v680_v62  ;;  %v979_v19 = vmin.f32 %v977_v35, %v911_v63 }
 0x256   : > { %v684_v51 = vpop.f32.mrf.mxu0  ;;  %v915_v61 = vpop.f32.mrf.mxu1  ;;  %4130 = vmatmul.mubr.msk.f32.gmra.mxu0 %vm479_vm12, %v4786_v1  ;;  %4146 = vmatmul.mubr.msk.f32.gmra.mxu1 %vm479_vm12, %v4786_v1 }
 0x257   : > { %v934_v34 = vmin.f32 %v719_v44, %v909_v15  ;;  %v704_v45 = vmin.f32 %v684_v51, 1e+30  ;;  %v749_v21 = vmin.f32 %v747_v49, %v684_v51  ;;  %v980_v24 = vmin.f32 %v978_v13, %v915_v61  ;;  %2440 = vmatprep.mubr.f32.mxu0 %v6567_v32  ;;  %2671 = vmatprep.mubr.f32.mxu1 %v6567_v32  ;;  %v4329_v44 = vld [vmem:[%s4468_s24 + $0x18] sm:$0xff] }
 0x258   : > { %v686_v30 = vpop.f32.mrf.mxu0  ;;  %v917_v33 = vpop.f32.mrf.mxu1 }
 0x259   : > { %v5300_v0 = vmin.f32 %v934_v34, %v911_v63  ;;  %v753_v9 = vmin.f32 %v751_v41, %v749_v21  ;;  %v984_v16 = vmin.f32 %v982_v5, %v980_v24  ;;  %v720_v26 = vmin.f32 %v704_v45, %v686_v30  ;;  %v4330_v45 = vld [vmem:[%s4468_s24 + $0x20] sm:$0xff] }
 0x25a   : > { %v750_v1 = vmin.f32 %v748_v53, %v686_v30  ;;  %v981_v57 = vmin.f32 %v979_v19, %v917_v33  ;;  %v5302_v6 = vpop.f32.mrf.mxu0  ;;  %v5304_v18 = vpop.f32.mrf.mxu1  ;;  %4147 = vmatmul.mubr.msk.f32.vlgmr.msra.gmra.mxu0 %vm479_vm12, %v4631_v31  ;;  %4163 = vmatmul.mubr.msk.f32.vlgmr.msra.gmra.mxu1 %vm479_vm12, %v4631_v31 }
 0x25b   : > { %755 = vst [vmem:[#allocation2] sm:$0xff] %v753_v9  ;;  %986 = vst [vmem:[#allocation2 + $0x50] sm:$0xff] %v984_v16  ;;  %v935_v2 = vmin.f32 %v720_v26, %v915_v61  ;;  %v1151_v11 = vmin.f32 %v5049_v12, %v5302_v6  ;;  %2446 = vmatprep.mubr.f32.mxu0 %v6567_v32  ;;  %2677 = vmatprep.mubr.f32.mxu1 %v6567_v32  ;;  %v4331_v16 = vld [vmem:[%s4468_s24 + $0x28] sm:$0xff] }
 0x25c   : > { %v754_v48 = vmin.f32 %v752_v27, %v750_v1  ;;  %v985_v29 = vmin.f32 %v983_v55, %v981_v57  ;;  %v5314_v42 = vpop.f32.mrf.mxu0  ;;  %v5316_v7 = vpop.f32.mrf.mxu1 }
 0x25d   : > { %v5318_v37 = vmin.f32 %v935_v2, %v917_v33  ;;  %v1167_v31 = vmin.f32 %v1151_v11, %v5314_v42 }
 0x25e   : > { %756 = vst [vmem:[#allocation2 + $0x38] sm:$0xff] %v754_v48  ;;  %987 = vst [vmem:[#allocation2 + $0x18] sm:$0xff] %v985_v29  ;;  %v5321_v38 = vpop.f32.mrf.mxu0  ;;  %v5323_v56 = vpop.f32.mrf.mxu1  ;;  %4148 = vmatmul.mubr.msk.f32.gmra.mxu0 %vm479_vm12, %v4650_v36  ;;  %4164 = vmatmul.mubr.msk.f32.gmra.mxu1 %vm479_vm12, %v4650_v36  ;;  %v4332_v48 = vld [vmem:[%s4468_s24 + $0x30] sm:$0xff] }
 0x25f   : > { %v1382_v12 = vmin.f32 %v1167_v31, %v5304_v18  ;;  %v1152_v50 = vmin.f32 %v5069_v20, %v5321_v38  ;;  %2452 = vmatprep.mubr.f32.mxu0 %v6567_v32  ;;  %2683 = vmatprep.mubr.f32.mxu1 %v6567_v32 }
 0x260   : > { %v5333_v15 = vpop.f32.mrf.mxu0  ;;  %v5335_v17 = vpop.f32.mrf.mxu1 }
 0x261   : > { %v5339_v58 = vmin.f32 %v1382_v12, %v5316_v7  ;;  %v1168_v60 = vmin.f32 %v1152_v50, %v5333_v15 }
 0x262   : > { %v5342_v36 = vpop.f32.mrf.mxu0  ;;  %v5344_v43 = vpop.f32.mrf.mxu1  ;;  %4149 = vmatmul.mubr.msk.f32.gmra.mxu0 %vm479_vm12, %v4668_v40  ;;  %4165 = vmatmul.mubr.msk.f32.gmra.mxu1 %vm479_vm12, %v4668_v40 }
 0x263   : > { %v1383_v20 = vmin.f32 %v1168_v60, %v5323_v56  ;;  %v1153_v54 = vmin.f32 %v5089_v28, %v5342_v36  ;;  %2458 = vmatprep.mubr.f32.mxu0 %v6567_v32  ;;  %2689 = vmatprep.mubr.f32.mxu1 %v6567_v32 }
 0x264   : > { %v5354_v3 = vpop.f32.mrf.mxu0  ;;  %v5356_v62 = vpop.f32.mrf.mxu1 }
 0x265   : > { %v5360_v63 = vmin.f32 %v1383_v20, %v5335_v17  ;;  %v1169_v49 = vmin.f32 %v1153_v54, %v5354_v3 }
 0x266   : > { %v5363_v40 = vpop.f32.mrf.mxu0  ;;  %v5365_v13 = vpop.f32.mrf.mxu1  ;;  %4150 = vmatmul.mubr.msk.f32.gmra.mxu0 %vm479_vm12, %v4329_v44  ;;  %4166 = vmatmul.mubr.msk.f32.gmra.mxu1 %vm479_vm12, %v4329_v44 }
 0x267   : > { %v1384_v28 = vmin.f32 %v1169_v49, %v5344_v43  ;;  %v1154_v22 = vmin.f32 %v5109_v39, %v5363_v40  ;;  %2464 = vmatprep.mubr.f32.mxu0 %v6567_v32  ;;  %2695 = vmatprep.mubr.f32.mxu1 %v6567_v32  ;;  %v4333_v49 = vld [vmem:[%s4468_s24 + $0x38] sm:$0xff] }
 0x268   : > { %v5374_v35 = vpop.f32.mrf.mxu0  ;;  %v5376_v51 = vpop.f32.mrf.mxu1 }
 0x269   : > { %v5380_v41 = vmin.f32 %v1384_v28, %v5356_v62  ;;  %v1170_v61 = vmin.f32 %v1154_v22, %v5374_v35 }
 0x26a   : > { %v5383_v5 = vpop.f32.mrf.mxu0  ;;  %v5385_v34 = vpop.f32.mrf.mxu1  ;;  %4151 = vmatmul.mubr.msk.f32.gmra.mxu0 %vm479_vm12, %v4330_v45  ;;  %4167 = vmatmul.mubr.msk.f32.gmra.mxu1 %vm479_vm12, %v4330_v45 }
 0x26b   : > { %v1385_v39 = vmin.f32 %v1170_v61, %v5365_v13  ;;  %v1155_v21 = vmin.f32 %v5129_v4, %v5383_v5  ;;  %2470 = vmatprep.mubr.f32.mxu0 %v6567_v32  ;;  %2701 = vmatprep.mubr.f32.mxu1 %v6567_v32 }
 0x26c   : > { %v5394_v24 = vpop.f32.mrf.mxu0  ;;  %v5396_v53 = vpop.f32.mrf.mxu1 }
 0x26d   : > { %v5400_v19 = vmin.f32 %v1385_v39, %v5376_v51  ;;  %v1171_v30 = vmin.f32 %v1155_v21, %v5394_v24 }
 0x26e   : > { %v5403_v33 = vpop.f32.mrf.mxu0  ;;  %v5405_v9 = vpop.f32.mrf.mxu1  ;;  %4152 = vmatmul.mubr.msk.f32.gmra.mxu0 %vm479_vm12, %v4331_v16  ;;  %4168 = vmatmul.mubr.msk.f32.gmra.mxu1 %vm479_vm12, %v4331_v16  ;;  %v1414_v16 = vmin.f32 %v5304_v18, %v5323_v56  ;;  %v1415_v56 = vmin.f32 %v5316_v7, %v5335_v17 }
 0x26f   : > { %v1386_v4 = vmin.f32 %v1171_v30, %v5385_v34  ;;  %v1156_v26 = vmin.f32 %v5149_v8, %v5403_v33  ;;  %2476 = vmatprep.mubr.f32.mxu0 %v6567_v32  ;;  %2707 = vmatprep.mubr.f32.mxu1 %v6567_v32  ;;  %v4334_v30 = vld [vmem:[%s4468_s24 + $0x40] sm:$0xff] }
 0x270   : > { %v5414_v27 = vpop.f32.mrf.mxu0  ;;  %v5416_v55 = vpop.f32.mrf.mxu1 }
 0x271   : > { %v5420_v1 = vmin.f32 %v1386_v4, %v5396_v53  ;;  %v1172_v57 = vmin.f32 %v1156_v26, %v5414_v27 }
 0x272   : > { %v5423_v2 = vpop.f32.mrf.mxu0  ;;  %v5425_v11 = vpop.f32.mrf.mxu1  ;;  %4153 = vmatmul.mubr.msk.f32.gmra.mxu0 %vm479_vm12, %v4332_v48  ;;  %4169 = vmatmul.mubr.msk.f32.gmra.mxu1 %vm479_vm12, %v4332_v48 }
 0x273   : > { %v1387_v8 = vmin.f32 %v1172_v57, %v5405_v9  ;;  %v1157_v29 = vmin.f32 %v5169_v25, %v5423_v2  ;;  %2482 = vmatprep.mubr.f32.mxu0 %v6567_v32  ;;  %2713 = vmatprep.mubr.f32.mxu1 %v6567_v32 }
 0x274   : > { %v5434_v31 = vpop.f32.mrf.mxu0  ;;  %v5436_v12 = vpop.f32.mrf.mxu1 }
 0x275   : > { %v5440_v50 = vmin.f32 %v1387_v8, %v5416_v55  ;;  %v1173_v60 = vmin.f32 %v1157_v29, %v5434_v31 }
 0x276   : > { %v5443_v20 = vpop.f32.mrf.mxu0  ;;  %v5445_v54 = vpop.f32.mrf.mxu1  ;;  %4154 = vmatmul.mubr.msk.f32.gmra.mxu0 %vm479_vm12, %v4333_v49  ;;  %4170 = vmatmul.mubr.msk.f32.gmra.mxu1 %vm479_vm12, %v4333_v49  ;;  %v4335_v49 = vld [vmem:[%s4468_s24 + $0x48] sm:$0xff] }
 0x277   : > { %v1388_v25 = vmin.f32 %v1173_v60, %v5425_v11  ;;  %v1158_v44 = vmin.f32 %v5195_v59, %v5443_v20  ;;  %2488 = vmatprep.mubr.f32.mxu0 %v6567_v32  ;;  %2719 = vmatprep.mubr.f32.mxu1 %v6567_v32  ;;  %v1183_v59 = vmin.f32 %v5302_v6, %v5321_v38 }
 0x278   : > { %v5454_v28 = vpop.f32.mrf.mxu0  ;;  %v5456_v22 = vpop.f32.mrf.mxu1  ;;  %v1416_v6 = vmin.f32 %v1414_v16, %v5344_v43  ;;  %v4336_v16 = vld [vmem:[%s4468_s24 + $0x50] sm:$0xff] }
 0x279   : > { %v5460_v61 = vmin.f32 %v1388_v25, %v5436_v12  ;;  %v1174_v45 = vmin.f32 %v1158_v44, %v5454_v28  ;;  %v1185_v8 = vmin.f32 %v1183_v59, %v5342_v36 }
 0x27a   : > { %v5463_v39 = vpop.f32.mrf.mxu0  ;;  %v5465_v21 = vpop.f32.mrf.mxu1  ;;  %4155 = vmatmul.mubr.msk.f32.gmra.mxu0 %vm479_vm12, %v4334_v30  ;;  %4171 = vmatmul.mubr.msk.f32.gmra.mxu1 %vm479_vm12, %v4334_v30  ;;  %v1418_v43 = vmin.f32 %v1416_v6, %v5365_v13 }
 0x27b   : > { %v1389_v4 = vmin.f32 %v1174_v45, %v5445_v54  ;;  %v1159_v26 = vmin.f32 %v5225_v23, %v5463_v39  ;;  %2494 = vmatprep.mubr.f32.mxu0 %v6567_v32  ;;  %2725 = vmatprep.mubr.f32.mxu1 %v6567_v32  ;;  %v1184_v23 = vmin.f32 %v5314_v42, %v5333_v15 }
 0x27c   : > { %v5478_v57 = vpop.f32.mrf.mxu0  ;;  %v5480_v48 = vpop.f32.mrf.mxu1  ;;  %v1187_v36 = vmin.f32 %v1185_v8, %v5363_v40  ;;  %v1417_v15 = vmin.f32 %v1415_v56, %v5356_v62  ;;  %v1420_v13 = vmin.f32 %v1418_v43, %v5385_v34 }
 0x27d   : > { %v5486_v38 = vmin.f32 %v1389_v4, %v5456_v22  ;;  %v1175_v18 = vmin.f32 %v1159_v26, %v5478_v57  ;;  %v1186_v7 = vmin.f32 %v1184_v23, %v5354_v3 }
 0x27e   : > { %v5493_v29 = vpop.f32.mrf.mxu0  ;;  %v5495_v60 = vpop.f32.mrf.mxu1  ;;  %4156 = vmatmul.mubr.msk.f32.gmra.mxu0 %vm479_vm12, %v4335_v49  ;;  %4172 = vmatmul.mubr.msk.f32.gmra.mxu1 %vm479_vm12, %v4335_v49  ;;  %v1189_v40 = vmin.f32 %v1187_v36, %v5383_v5  ;;  %v1419_v3 = vmin.f32 %v1417_v15, %v5376_v51  ;;  %v1422_v34 = vmin.f32 %v1420_v13, %v5405_v9  ;;  %v4337_v36 = vld [vmem:[%s4468_s24 + $0x58] sm:$0xff] }
 0x27f   : > { %v1390_v25 = vmin.f32 %v1175_v18, %v5465_v21  ;;  %v1160_v42 = vmin.f32 %v5244_v52, %v5493_v29  ;;  %2500 = vmatprep.mubr.f32.mxu0 %v6567_v32  ;;  %2731 = vmatprep.mubr.f32.mxu1 %v6567_v32  ;;  %v1188_v30 = vmin.f32 %v1186_v7, %v5374_v35 }
 0x280   : > { %v5508_v17 = vpop.f32.mrf.mxu0  ;;  %v5510_v44 = vpop.f32.mrf.mxu1  ;;  %v1191_v5 = vmin.f32 %v1189_v40, %v5403_v33  ;;  %v1421_v51 = vmin.f32 %v1419_v3, %v5396_v53  ;;  %v1424_v33 = vmin.f32 %v1422_v34, %v5425_v11 }
 0x281   : > { %v5516_v45 = vmin.f32 %v1390_v25, %v5480_v48  ;;  %v1176_v52 = vmin.f32 %v1160_v42, %v5508_v17  ;;  %v1190_v35 = vmin.f32 %v1188_v30, %v5394_v24 }
 0x282   : > { %v1116_v62 = vpop.f32.mrf.mxu0  ;;  %v1347_v59 = vpop.f32.mrf.mxu1  ;;  %4157 = vmatmul.mubr.msk.f32.gmra.mxu0 %vm479_vm12, %v4336_v16  ;;  %4173 = vmatmul.mubr.msk.f32.gmra.mxu1 %vm479_vm12, %v4336_v16  ;;  %v1193_v18 = vmin.f32 %v1191_v5, %v5423_v2  ;;  %v1423_v56 = vmin.f32 %v1421_v51, %v5416_v55  ;;  %v1426_v2 = vmin.f32 %v1424_v33, %v5445_v54  ;;  %v4339_v51 = vld [vmem:[%s4468_s24 + $0x68] sm:$0xff] }
 0x283   : > { %v1391_v4 = vmin.f32 %v1176_v52, %v5495_v60  ;;  %v1161_v26 = vmin.f32 %v5260_v47, %v1116_v62  ;;  %2506 = vmatprep.mubr.f32.mxu0 %v6567_v32  ;;  %2737 = vmatprep.mubr.f32.mxu1 %v6567_v32  ;;  %v1192_v47 = vmin.f32 %v1190_v35, %v5414_v27 }
 0x284   : > { %v1118_v8 = vpop.f32.mrf.mxu0  ;;  %v1349_v6 = vpop.f32.mrf.mxu1  ;;  %v1195_v53 = vmin.f32 %v1193_v18, %v5443_v20  ;;  %v1425_v55 = vmin.f32 %v1423_v56, %v5436_v12  ;;  %v1428_v20 = vmin.f32 %v1426_v2, %v5465_v21 }
 0x285   : > { %v5535_v9 = vmin.f32 %v1391_v4, %v5510_v44  ;;  %v1177_v23 = vmin.f32 %v1161_v26, %v1118_v8  ;;  %v1194_v27 = vmin.f32 %v1192_v47, %v5434_v31  ;;  %v4338_v31 = vld [vmem:[%s4468_s24 + $0x60] sm:$0xff] }
 0x286   : > { %v1122_v49 = vpop.f32.mrf.mxu0  ;;  %v1353_v24 = vpop.f32.mrf.mxu1  ;;  %4158 = vmatmul.mubr.msk.f32.gmra.mxu0 %vm479_vm12, %v4337_v36  ;;  %4174 = vmatmul.mubr.msk.f32.gmra.mxu1 %vm479_vm12, %v4337_v36  ;;  %v1197_v7 = vmin.f32 %v1195_v53, %v5463_v39  ;;  %v1430_v39 = vmin.f32 %v1428_v20, %v5495_v60 }
 0x287   : > { %v1392_v11 = vmin.f32 %v1177_v23, %v1347_v59  ;;  %v1162_v43 = vmin.f32 %v5274_v46, %v1122_v49  ;;  %2512 = vmatprep.mubr.f32.mxu0 %v6567_v32  ;;  %2743 = vmatprep.mubr.f32.mxu1 %v6567_v32  ;;  %v1196_v40 = vmin.f32 %v1194_v27, %v5454_v28 }
 0x288   : > { %v1124_v25 = vpop.f32.mrf.mxu0  ;;  %v1355_v42 = vpop.f32.mrf.mxu1  ;;  %v1427_v46 = vmin.f32 %v1425_v55, %v5456_v22  ;;  %v1199_v12 = vmin.f32 %v1197_v7, %v5493_v29  ;;  %v1432_v34 = vmin.f32 %v1430_v39, %v1347_v59  ;;  %v4341_v39 = vld [vmem:[%s4468_s24 + $0x78] sm:$0xff] }
 0x289   : > { %v5551_v15 = vmin.f32 %v1392_v11, %v1349_v6  ;;  %v1178_v54 = vmin.f32 %v1162_v43, %v1124_v25  ;;  %v1198_v28 = vmin.f32 %v1196_v40, %v5478_v57  ;;  %v4340_v11 = vld [vmem:[%s4468_s24 + $0x70] sm:$0xff] }
 0x28a   : > { %v1128_v13 = vpop.f32.mrf.mxu0  ;;  %v1359_v52 = vpop.f32.mrf.mxu1  ;;  %4159 = vmatmul.mubr.msk.f32.gmra.mxu0 %vm479_vm12, %v4338_v31  ;;  %4175 = vmatmul.mubr.msk.f32.gmra.mxu1 %vm479_vm12, %v4338_v31  ;;  %v1429_v22 = vmin.f32 %v1427_v46, %v5480_v48  ;;  %v1201_v5 = vmin.f32 %v1199_v12, %v1116_v62  ;;  %v1434_v48 = vmin.f32 %v1432_v34, %v1353_v24  ;;  %v1213_v31 = vld [vmem:[#allocation2 + $0x30] sm:$0xff] }
 0x28b   : > { %v1393_v30 = vmin.f32 %v1178_v54, %v1353_v24  ;;  %v1163_v21 = vmin.f32 %v5284_v14, %v1128_v13  ;;  %2518 = vmatprep.mubr.f32.mxu0 %v6567_v32  ;;  %2749 = vmatprep.mubr.f32.mxu1 %v6567_v32  ;;  %v1200_v60 = vmin.f32 %v1198_v28, %v5508_v17 }
 0x28c   : > { %v1130_v3 = vpop.f32.mrf.mxu0  ;;  %v1361_v16 = vpop.f32.mrf.mxu1  ;;  %v1431_v26 = vmin.f32 %v1429_v22, %v5510_v44  ;;  %v1203_v57 = vmin.f32 %v1201_v5, %v1122_v49  ;;  %v1436_v47 = vmin.f32 %v1434_v48, %v1359_v52 }
 0x28d   : > { %v5565_v4 = vmin.f32 %v1393_v30, %v1355_v42  ;;  %v1179_v29 = vmin.f32 %v1163_v21, %v1130_v3  ;;  %v1202_v59 = vmin.f32 %v1200_v60, %v1118_v8 }
 0x28e   : > { %v1134_v14 = vpop.f32.mrf.mxu0  ;;  %v1365_v35 = vpop.f32.mrf.mxu1  ;;  %4160 = vmatmul.mubr.msk.f32.gmra.mxu0 %vm479_vm12, %v4339_v51  ;;  %4176 = vmatmul.mubr.msk.f32.gmra.mxu1 %vm479_vm12, %v4339_v51  ;;  %v1433_v33 = vmin.f32 %v1431_v26, %v1349_v6  ;;  %v1205_v44 = vmin.f32 %v1203_v57, %v1128_v13  ;;  %v1445_v51 = vld [vmem:[#allocation2 + $0x80] sm:$0xff] }
 0x28f   : > { %v1394_v18 = vmin.f32 %v1179_v29, %v1359_v52  ;;  %v1164_v62 = vmin.f32 %v5292_v10, %v1134_v14  ;;  %2524 = vmatprep.mubr.f32.mxu0 %v6567_v32  ;;  %2755 = vmatprep.mubr.f32.mxu1 %v6567_v32  ;;  %v1204_v53 = vmin.f32 %v1202_v59, %v1124_v25 }
 0x290   : > { %v1136_v17 = vpop.f32.mrf.mxu0  ;;  %v1367_v23 = vpop.f32.mrf.mxu1  ;;  %v1435_v49 = vmin.f32 %v1433_v33, %v1355_v42  ;;  %v1207_v10 = vmin.f32 %v1205_v44, %v1134_v14  ;;  %v1438_v8 = vmin.f32 %v1436_v47, %v1365_v35 }
 0x291   : > { %v5575_v56 = vmin.f32 %v1394_v18, %v1361_v16  ;;  %v1180_v36 = vmin.f32 %v1164_v62, %v1136_v17  ;;  %v1206_v27 = vmin.f32 %v1204_v53, %v1130_v3 }
 0x292   : > { %v1140_v24 = vpop.f32.mrf.mxu0  ;;  %v1371_v2 = vpop.f32.mrf.mxu1  ;;  %4161 = vmatmul.mubr.msk.f32.gmra.mxu0 %vm479_vm12, %v4340_v11  ;;  %4177 = vmatmul.mubr.msk.f32.gmra.mxu1 %vm479_vm12, %v4340_v11  ;;  %v1437_v55 = vmin.f32 %v1435_v49, %v1361_v16 }
 0x293   : > { %v1395_v6 = vmin.f32 %v1180_v36, %v1365_v35  ;;  %v1165_v43 = vmin.f32 %v5300_v0, %v1140_v24  ;;  %2530 = vmatprep.mubr.f32.mxu0 %v6567_v32  ;;  %2761 = vmatprep.mubr.f32.mxu1 %v6567_v32  ;;  %v1209_v20 = vmin.f32 %v1207_v10, %v1140_v24  ;;  %v1444_v0 = vld [vmem:[#allocation2 + $0x78] sm:$0xff]  ;;  %v1214_v35 = vld [vmem:[#allocation2 + $0x68] sm:$0xff] }
 0x294   : > { %v1142_v7 = vpop.f32.mrf.mxu0  ;;  %v1373_v25 = vpop.f32.mrf.mxu1  ;;  %v1440_v54 = vmin.f32 %v1438_v8, %v1371_v2  ;;  %v1208_v46 = vmin.f32 %v1206_v27, %v1136_v17  ;;  %v1439_v13 = vmin.f32 %v1437_v55, %v1367_v23 }
 0x295   : > { %v5583_v42 = vmin.f32 %v1395_v6, %v1367_v23  ;;  %v1181_v40 = vmin.f32 %v1165_v43, %v1142_v7 }
 0x296   : > { %v1146_v52 = vpop.f32.mrf.mxu0  ;;  %v1377_v12 = vpop.f32.mrf.mxu1  ;;  %4162 = vmatmul.mubr.msk.f32.gmra.mxu0 %vm479_vm12, %v4341_v39  ;;  %4178 = vmatmul.mubr.msk.f32.gmra.mxu1 %vm479_vm12, %v4341_v39  ;;  %v1210_v3 = vmin.f32 %v1208_v46, %v1142_v7  ;;  %v1441_v16 = vmin.f32 %v1439_v13, %v1373_v25  ;;  %vm3012_vm12 = vcmask 7168  }
 0x297   : > { %v1396_v30 = vmin.f32 %v1181_v40, %v1371_v2  ;;  %v1166_v21 = vmin.f32 %v5318_v37, %v1146_v52  ;;  %v1211_v28 = vmin.f32 %v1209_v20, %v1146_v52  ;;  %v1442_v22 = vmin.f32 %v1440_v54, %v1377_v12 }
 0x298   : > { %v1148_v5 = vpop.f32.mrf.mxu0  ;;  %v1379_v34 = vpop.f32.mrf.mxu1 }
 0x299   : > { %v5589_v29 = vmin.f32 %v1396_v30, %v1373_v25  ;;  %v1215_v60 = vmin.f32 %v1213_v31, %v1211_v28  ;;  %v1446_v26 = vmin.f32 %v1444_v0, %v1442_v22  ;;  %v1182_v14 = vmin.f32 %v1166_v21, %v1148_v5 }
 0x29a   : > { %v1212_v57 = vmin.f32 %v1210_v3, %v1148_v5  ;;  %v1443_v48 = vmin.f32 %v1441_v16, %v1379_v34  ;;  %v5591_v18 = vpop.f32.mrf.mxu0  ;;  %v5593_v62 = vpop.f32.mrf.mxu1 }
 0x29b   : > { %1217 = vst [vmem:[#allocation2 + $0x30] sm:$0xff] %v1215_v60  ;;  %1448 = vst [vmem:[#allocation2 + $0x78] sm:$0xff] %v1446_v26  ;;  %v1397_v37 = vmin.f32 %v1182_v14, %v1377_v12  ;;  %v1613_v59 = vmin.f32 %v5339_v58, %v5591_v18 }
 0x29c   : > { %v1216_v33 = vmin.f32 %v1214_v35, %v1212_v57  ;;  %v1447_v17 = vmin.f32 %v1445_v51, %v1443_v48  ;;  %v5597_v23 = vpop.f32.mrf.mxu0  ;;  %v5599_v44 = vpop.f32.mrf.mxu1 }
 0x29d   : > { %v5601_v47 = vmin.f32 %v1397_v37, %v1379_v34  ;;  %v1629_v36 = vmin.f32 %v1613_v59, %v5597_v23 }
 0x29e   : > { %1218 = vst [vmem:[#allocation2 + $0x68] sm:$0xff] %v1216_v33  ;;  %1449 = vst [vmem:[#allocation2 + $0x80] sm:$0xff] %v1447_v17  ;;  %v5604_v53 = vpop.f32.mrf.mxu0  ;;  %v5606_v49 = vpop.f32.mrf.mxu1 }
 0x29f   : > { %v1844_v24 = vmin.f32 %v1629_v36, %v5593_v62  ;;  %v1614_v58 = vmin.f32 %v5360_v63, %v5604_v53 }
 0x2a0   : > { %v5611_v2 = vpop.f32.mrf.mxu0  ;;  %v5613_v11 = vpop.f32.mrf.mxu1 }
 0x2a1   : > { %v5616_v10 = vmin.f32 %v1844_v24, %v5599_v44  ;;  %v1630_v8 = vmin.f32 %v1614_v58, %v5611_v2 }
 0x2a2   : > { %v1530_v6 = vpop.f32.mrf.mxu0  ;;  %v1761_v43 = vpop.f32.mrf.mxu1 }
 0x2a3   : > { %v1845_v27 = vmin.f32 %v1630_v8, %v5606_v49  ;;  %v1615_v55 = vmin.f32 %v5380_v41, %v1530_v6 }
 0x2a4   : > { %v5621_v7 = vpop.f32.mrf.mxu0  ;;  %v5623_v25 = vpop.f32.mrf.mxu1 }
 0x2a5   : > { %v5626_v63 = vmin.f32 %v1845_v27, %v5613_v11  ;;  %v1631_v20 = vmin.f32 %v1615_v55, %v5621_v7 }
 0x2a6   : > { %v5629_v54 = vpop.f32.mrf.mxu0  ;;  %v5631_v40 = vpop.f32.mrf.mxu1 }
 0x2a7   : > { %v1846_v46 = vmin.f32 %v1631_v20, %v1761_v43  ;;  %v1616_v13 = vmin.f32 %v5400_v19, %v5629_v54 }
 0x2a8   : > { %v5635_v52 = vpop.f32.mrf.mxu0  ;;  %v5637_v41 = vpop.f32.mrf.mxu1 }
 0x2a9   : > { %v5640_v31 = vmin.f32 %v1846_v46, %v5623_v25  ;;  %v1632_v12 = vmin.f32 %v1616_v13, %v5635_v52 }
 0x2aa   : > { %v1542_v0 = vpop.f32.mrf.mxu0  ;;  %v1773_v39 = vpop.f32.mrf.mxu1 }
 0x2ab   : > { %v1847_v30 = vmin.f32 %v1632_v12, %v5631_v40  ;;  %v1617_v21 = vmin.f32 %v5420_v1, %v1542_v0  ;;  %v1645_v12 = vmin.f32 %v5591_v18, %v5604_v53  ;;  %v1877_v18 = vmin.f32 %v5599_v44, %v5613_v11 }
 0x2ac   : > { %v5645_v28 = vpop.f32.mrf.mxu0  ;;  %v5647_v22 = vpop.f32.mrf.mxu1 }
 0x2ad   : > { %v5650_v19 = vmin.f32 %v1847_v30, %v5637_v41  ;;  %v1633_v3 = vmin.f32 %v1617_v21, %v5645_v28  ;;  %v1876_v30 = vmin.f32 %v5593_v62, %v5606_v49 }
 0x2ae   : > { %v5653_v16 = vpop.f32.mrf.mxu0  ;;  %v5655_v5 = vpop.f32.mrf.mxu1 }
 0x2af   : > { %v1848_v34 = vmin.f32 %v1633_v3, %v1773_v39  ;;  %v1618_v60 = vmin.f32 %v5440_v50, %v5653_v16 }
 0x2b0   : > { %v5659_v26 = vpop.f32.mrf.mxu0  ;;  %v5661_v1 = vpop.f32.mrf.mxu1 }
 0x2b1   : > { %v5664_v14 = vmin.f32 %v1848_v34, %v5647_v22  ;;  %v1634_v35 = vmin.f32 %v1618_v60, %v5659_v26  ;;  %v1647_v60 = vmin.f32 %v1645_v12, %v1530_v6 }
 0x2b2   : > { %v1554_v51 = vpop.f32.mrf.mxu0  ;;  %v1785_v57 = vpop.f32.mrf.mxu1 }
 0x2b3   : > { %v1849_v48 = vmin.f32 %v1634_v35, %v5655_v5  ;;  %v1619_v37 = vmin.f32 %v5460_v61, %v1554_v51  ;;  %v1878_v35 = vmin.f32 %v1876_v30, %v1761_v43  ;;  %v1649_v49 = vmin.f32 %v1647_v60, %v5629_v54 }
 0x2b4   : > { %v5669_v59 = vpop.f32.mrf.mxu0  ;;  %v5671_v33 = vpop.f32.mrf.mxu1 }
 0x2b5   : > { %v5674_v50 = vmin.f32 %v1849_v48, %v5661_v1  ;;  %v1635_v17 = vmin.f32 %v1619_v37, %v5669_v59 }
 0x2b6   : > { %v5677_v36 = vpop.f32.mrf.mxu0  ;;  %v5679_v24 = vpop.f32.mrf.mxu1 }
 0x2b7   : > { %v1850_v58 = vmin.f32 %v1635_v17, %v1785_v57  ;;  %v1620_v8 = vmin.f32 %v5486_v38, %v5677_v36  ;;  %v1646_v17 = vmin.f32 %v5597_v23, %v5611_v2  ;;  %v1651_v23 = vmin.f32 %v1649_v49, %v1542_v0 }
 0x2b8   : > { %v5683_v27 = vpop.f32.mrf.mxu0  ;;  %v5685_v61 = vpop.f32.mrf.mxu1 }
 0x2b9   : > { %v5688_v55 = vmin.f32 %v1850_v58, %v5671_v33  ;;  %v1636_v20 = vmin.f32 %v1620_v8, %v5683_v27  ;;  %v1648_v43 = vmin.f32 %v1646_v17, %v5621_v7  ;;  %v1879_v8 = vmin.f32 %v1877_v18, %v5623_v25 }
 0x2ba   : > { %v1566_v46 = vpop.f32.mrf.mxu0  ;;  %v1797_v13 = vpop.f32.mrf.mxu1  ;;  %v1653_v7 = vmin.f32 %v1651_v23, %v5653_v16 }
 0x2bb   : > { %v1851_v21 = vmin.f32 %v1636_v20, %v5679_v24  ;;  %v1621_v38 = vmin.f32 %v5516_v45, %v1566_v46  ;;  %v1880_v45 = vmin.f32 %v1878_v35, %v5631_v40  ;;  %v1650_v54 = vmin.f32 %v1648_v43, %v5635_v52 }
 0x2bc   : > { %v1568_v3 = vpop.f32.mrf.mxu0  ;;  %v1799_v34 = vpop.f32.mrf.mxu1  ;;  %v1881_v40 = vmin.f32 %v1879_v8, %v5637_v41 }
 0x2bd   : > { %v5698_v48 = vmin.f32 %v1851_v21, %v5685_v61  ;;  %v1637_v37 = vmin.f32 %v1621_v38, %v1568_v3  ;;  %v1882_v2 = vmin.f32 %v1880_v45, %v1773_v39  ;;  %v1652_v0 = vmin.f32 %v1650_v54, %v5645_v28 }
 0x2be   : > { %v1572_v53 = vpop.f32.mrf.mxu0  ;;  %v1803_v62 = vpop.f32.mrf.mxu1  ;;  %v1883_v39 = vmin.f32 %v1881_v40, %v5647_v22 }
 0x2bf   : > { %6588 = vst [vmem:[#allocation11_spill] sm:$0xff] %v5698_v48  ;;  %v1852_v58 = vmin.f32 %v1637_v37, %v1797_v13  ;;  %v1622_v6 = vmin.f32 %v5535_v9, %v1572_v53  ;;  %v1884_v25 = vmin.f32 %v1882_v2, %v5655_v5  ;;  %v1655_v37 = vmin.f32 %v1653_v7, %v1554_v51 }
 0x2c0   : > { %v5709_v20 = vpop.f32.mrf.mxu0  ;;  %v5711_v12 = vpop.f32.mrf.mxu1  ;;  %v1654_v18 = vmin.f32 %v1652_v0, %v5659_v26  ;;  %v1885_v16 = vmin.f32 %v1883_v39, %v5661_v1 }
 0x2c1   : > { %v5713_v44 = vmin.f32 %v1852_v58, %v1799_v34  ;;  %v1638_v11 = vmin.f32 %v1622_v6, %v5709_v20  ;;  %v1886_v17 = vmin.f32 %v1884_v25, %v1785_v57 }
 0x2c2   : > { %v1578_v30 = vpop.f32.mrf.mxu0  ;;  %v1809_v9 = vpop.f32.mrf.mxu1  ;;  %v1656_v51 = vmin.f32 %v1654_v18, %v5669_v59  ;;  %v1887_v57 = vmin.f32 %v1885_v16, %v5671_v33 }
 0x2c3   : > { %6589 = vst [vmem:[#allocation12_spill] sm:$0xff] %v5713_v44  ;;  %v1853_v21 = vmin.f32 %v1638_v11, %v1803_v62  ;;  %v1623_v38 = vmin.f32 %v5551_v15, %v1578_v30  ;;  %v1657_v15 = vmin.f32 %v1655_v37, %v5677_v36  ;;  %v1888_v28 = vmin.f32 %v1886_v17, %v5679_v24 }
 0x2c4   : > { %v1580_v60 = vpop.f32.mrf.mxu0  ;;  %v1811_v35 = vpop.f32.mrf.mxu1  ;;  %v1658_v23 = vmin.f32 %v1656_v51, %v5683_v27  ;;  %v1889_v36 = vmin.f32 %v1887_v57, %v5685_v61 }
 0x2c5   : > { %v5724_v52 = vmin.f32 %v1853_v21, %v5711_v12  ;;  %v1639_v41 = vmin.f32 %v1623_v38, %v1580_v60  ;;  %v1659_v43 = vmin.f32 %v1657_v15, %v1566_v46  ;;  %v1890_v8 = vmin.f32 %v1888_v28, %v1797_v13 }
 0x2c6   : > { %v1584_v5 = vpop.f32.mrf.mxu0  ;;  %v1815_v49 = vpop.f32.mrf.mxu1  ;;  %v1660_v40 = vmin.f32 %v1658_v23, %v1568_v3  ;;  %v1891_v33 = vmin.f32 %v1889_v36, %v1799_v34 }
 0x2c7   : > { %6590 = vst [vmem:[#allocation13_spill] sm:$0xff] %v5724_v52  ;;  %v1854_v45 = vmin.f32 %v1639_v41, %v1809_v9  ;;  %v1624_v22 = vmin.f32 %v5565_v4, %v1584_v5  ;;  %v1661_v11 = vmin.f32 %v1659_v43, %v1572_v53  ;;  %v1892_v54 = vmin.f32 %v1890_v8, %v1803_v62 }
 0x2c8   : > { %v1586_v58 = vpop.f32.mrf.mxu0  ;;  %v1817_v6 = vpop.f32.mrf.mxu1  ;;  %v1662_v27 = vmin.f32 %v1660_v40, %v5709_v20  ;;  %v1893_v61 = vmin.f32 %v1891_v33, %v5711_v12 }
 0x2c9   : > { %v5733_v26 = vmin.f32 %v1854_v45, %v1811_v35  ;;  %v1640_v1 = vmin.f32 %v1624_v22, %v1586_v58  ;;  %v1663_v46 = vmin.f32 %v1661_v11, %v1578_v30  ;;  %v1894_v13 = vmin.f32 %v1892_v54, %v1809_v9 }
 0x2ca   : > { %v1590_v2 = vpop.f32.mrf.mxu0  ;;  %v1821_v24 = vpop.f32.mrf.mxu1  ;;  %v1664_v3 = vmin.f32 %v1662_v27, %v1580_v60  ;;  %v1895_v34 = vmin.f32 %v1893_v61, %v1811_v35  ;;  %v1676_v27 = vld [vmem:[#allocation2 + $0x88] sm:$0xff]  ;;  %v1907_v61 = vld [vmem:[#allocation2 + $0x40] sm:$0xff] }
 0x2cb   : > { %6591 = vst [vmem:[#allocation14_spill] sm:$0xff] %v5733_v26  ;;  %v1855_v4 = vmin.f32 %v1640_v1, %v1815_v49  ;;  %v1625_v59 = vmin.f32 %v5575_v56, %v1590_v2  ;;  %v1665_v53 = vmin.f32 %v1663_v46, %v1584_v5  ;;  %v1896_v62 = vmin.f32 %v1894_v13, %v1815_v49 }
 0x2cc   : > { %v1592_v7 = vpop.f32.mrf.mxu0  ;;  %v1823_v25 = vpop.f32.mrf.mxu1  ;;  %v1666_v15 = vmin.f32 %v1664_v3, %v1586_v58  ;;  %v1897_v20 = vmin.f32 %v1895_v34, %v1817_v6 }
 0x2cd   : > { %v5738_v21 = vmin.f32 %v1855_v4, %v1817_v6  ;;  %v1641_v38 = vmin.f32 %v1625_v59, %v1592_v7  ;;  %v1667_v30 = vmin.f32 %v1665_v53, %v1590_v2  ;;  %v1898_v9 = vmin.f32 %v1896_v62, %v1821_v24  ;;  %v1675_v6 = vld [vmem:[#allocation2 + $0x8] sm:$0xff] }
 0x2ce   : > { %v1596_v0 = vpop.f32.mrf.mxu0  ;;  %v1827_v39 = vpop.f32.mrf.mxu1  ;;  %v1668_v51 = vmin.f32 %v1666_v15, %v1592_v7 }
 0x2cf   : > { %6592 = vst [vmem:[#allocation15_spill] sm:$0xff] %v5738_v21  ;;  %v1856_v37 = vmin.f32 %v1641_v38, %v1821_v24  ;;  %v1626_v56 = vmin.f32 %v5583_v42, %v1596_v0  ;;  %v1669_v45 = vmin.f32 %v1667_v30, %v1596_v0  ;;  %v1900_v22 = vmin.f32 %v1898_v9, %v1827_v39  ;;  %v1906_v24 = vld [vmem:[#allocation2 + $0x28] sm:$0xff] }
 0x2d0   : > { %v1598_v17 = vpop.f32.mrf.mxu0  ;;  %v1829_v41 = vpop.f32.mrf.mxu1  ;;  %v1899_v42 = vmin.f32 %v1897_v20, %v1823_v25 }
 0x2d1   : > { %v5743_v18 = vmin.f32 %v1856_v37, %v1823_v25  ;;  %v1642_v16 = vmin.f32 %v1626_v56, %v1598_v17  ;;  %v1670_v23 = vmin.f32 %v1668_v51, %v1598_v17 }
 0x2d2   : > { %v1602_v28 = vpop.f32.mrf.mxu0  ;;  %v1833_v12 = vpop.f32.mrf.mxu1  ;;  %v1901_v36 = vmin.f32 %v1899_v42, %v1829_v41 }
 0x2d3   : > { %6593 = vst [vmem:[#allocation16_spill] sm:$0xff] %v5743_v18  ;;  %v1857_v5 = vmin.f32 %v1642_v16, %v1827_v39  ;;  %v1627_v49 = vmin.f32 %v5589_v29, %v1602_v28  ;;  %v1671_v43 = vmin.f32 %v1669_v45, %v1602_v28  ;;  %v1902_v8 = vmin.f32 %v1900_v22, %v1833_v12 }
 0x2d4   : > { %v1604_v60 = vpop.f32.mrf.mxu0  ;;  %v1835_v35 = vpop.f32.mrf.mxu1 }
 0x2d5   : > { %v5746_v57 = vmin.f32 %v1857_v5, %v1829_v41  ;;  %v1643_v1 = vmin.f32 %v1627_v49, %v1604_v60  ;;  %v1672_v59 = vmin.f32 %v1670_v23, %v1604_v60  ;;  %v1903_v40 = vmin.f32 %v1901_v36, %v1835_v35 }
 0x2d6   : > { %v1608_v58 = vpop.f32.mrf.mxu0  ;;  %v1839_v2 = vpop.f32.mrf.mxu1 }
 0x2d7   : > { %6594 = vst [vmem:[#allocation17_spill] sm:$0xff] %v5746_v57  ;;  %v1858_v11 = vmin.f32 %v1643_v1, %v1833_v12  ;;  %v1628_v54 = vmin.f32 %v5601_v47, %v1608_v58  ;;  %v1673_v4 = vmin.f32 %v1671_v43, %v1608_v58  ;;  %v1904_v29 = vmin.f32 %v1902_v8, %v1839_v2 }
 0x2d8   : > { %v1610_v33 = vpop.f32.mrf.mxu0  ;;  %v1841_v7 = vpop.f32.mrf.mxu1 }
 0x2d9   : > { %v5749_v25 = vmin.f32 %v1858_v11, %v1835_v35  ;;  %v1677_v46 = vmin.f32 %v1675_v6, %v1673_v4  ;;  %v1908_v13 = vmin.f32 %v1906_v24, %v1904_v29  ;;  %v1644_v38 = vmin.f32 %v1628_v54, %v1610_v33 }
 0x2da   : > { %v1674_v0 = vmin.f32 %v1672_v59, %v1610_v33  ;;  %v1905_v39 = vmin.f32 %v1903_v40, %v1841_v7  ;;  %v5751_v53 = vpop.f32.mrf.mxu0  ;;  %v5753_v62 = vpop.f32.mrf.mxu1 }
 0x2db   : > { %6595 = vst [vmem:[#allocation18_spill] sm:$0xff] %v5749_v25  ;;  %1679 = vst [vmem:[#allocation2 + $0x8] sm:$0xff] %v1677_v46  ;;  %v1859_v47 = vmin.f32 %v1644_v38, %v1839_v2 }
 0x2dc   : > { %1910 = vst [vmem:[#allocation2 + $0x28] sm:$0xff] %v1908_v13  ;;  %v1678_v37 = vmin.f32 %v1676_v27, %v1674_v0  ;;  %v1909_v56 = vmin.f32 %v1907_v61, %v1905_v39  ;;  %v5755_v3 = vpop.f32.mrf.mxu0  ;;  %v5757_v34 = vpop.f32.mrf.mxu1 }
 0x2dd   : > { %v5759_v17 = vmin.f32 %v1859_v47, %v1841_v7 }
 0x2de   : > { %1680 = vst [vmem:[#allocation2 + $0x88] sm:$0xff] %v1678_v37  ;;  %1911 = vst [vmem:[#allocation2 + $0x40] sm:$0xff] %v1909_v56  ;;  %v5761_v41 = vpop.f32.mrf.mxu0  ;;  %v5763_v30 = vpop.f32.mrf.mxu1 }
 0x2df   : > { %v2107_v40 = vmin.f32 %v5751_v53, %v5761_v41  ;;  %v2338_v33 = vmin.f32 %v5753_v62, %v5763_v30 }
 0x2e0   : > { %v5765_v9 = vpop.f32.mrf.mxu0  ;;  %v5767_v16 = vpop.f32.mrf.mxu1 }
 0x2e1   : > { %v2108_v27 = vmin.f32 %v5755_v3, %v5765_v9  ;;  %v2339_v61 = vmin.f32 %v5757_v34, %v5767_v16 }
 0x2e2   : > { %v5769_v15 = vpop.f32.mrf.mxu0  ;;  %v5771_v20 = vpop.f32.mrf.mxu1 }
 0x2e3   : > { %v2109_v13 = vmin.f32 %v2107_v40, %v5769_v15  ;;  %v2340_v38 = vmin.f32 %v2338_v33, %v5771_v20 }
 0x2e4   : > { %v5773_v28 = vpop.f32.mrf.mxu0  ;;  %v5775_v12 = vpop.f32.mrf.mxu1 }
 0x2e5   : > { %v2110_v56 = vmin.f32 %v2108_v27, %v5773_v28  ;;  %v2341_v40 = vmin.f32 %v2339_v61, %v5775_v12 }
 0x2e6   : > { %v5777_v45 = vpop.f32.mrf.mxu0  ;;  %v5779_v22 = vpop.f32.mrf.mxu1 }
 0x2e7   : > { %v2111_v47 = vmin.f32 %v2109_v13, %v5777_v45  ;;  %v2342_v37 = vmin.f32 %v2340_v38, %v5779_v22 }
 0x2e8   : > { %v5781_v5 = vpop.f32.mrf.mxu0  ;;  %v5783_v49 = vpop.f32.mrf.mxu1 }
 0x2e9   : > { %v2112_v18 = vmin.f32 %v2110_v56, %v5781_v5  ;;  %v2343_v21 = vmin.f32 %v2341_v40, %v5783_v49 }
 0x2ea   : > { %v5785_v51 = vpop.f32.mrf.mxu0  ;;  %v5787_v42 = vpop.f32.mrf.mxu1 }
 0x2eb   : > { %6596 = vst [vmem:[#allocation19_spill] sm:$0xff] %v5787_v42  ;;  %v2113_v25 = vmin.f32 %v2111_v47, %v5785_v51  ;;  %v2344_v57 = vmin.f32 %v2342_v37, %v5787_v42 }
 0x2ec   : > { %v5789_v60 = vpop.f32.mrf.mxu0  ;;  %v5791_v35 = vpop.f32.mrf.mxu1 }
 0x2ed   : > { %6597 = vst [vmem:[#allocation20_spill] sm:$0xff] %v5791_v35  ;;  %v2114_v61 = vmin.f32 %v2112_v18, %v5789_v60  ;;  %v2345_v52 = vmin.f32 %v2343_v21, %v5791_v35 }
 0x2ee   : > { %v5793_v43 = vpop.f32.mrf.mxu0  ;;  %v5795_v8 = vpop.f32.mrf.mxu1 }
 0x2ef   : > { %6598 = vst [vmem:[#allocation21_spill] sm:$0xff] %v5795_v8  ;;  %v2115_v38 = vmin.f32 %v2113_v25, %v5793_v43  ;;  %v2346_v27 = vmin.f32 %v2344_v57, %v5795_v8 }
 0x2f0   : > { %v5797_v1 = vpop.f32.mrf.mxu0  ;;  %v5799_v23 = vpop.f32.mrf.mxu1 }
 0x2f1   : > { %6599 = vst [vmem:[#allocation22_spill] sm:$0xff] %v5799_v23  ;;  %v2116_v40 = vmin.f32 %v2114_v61, %v5797_v1  ;;  %v2347_v48 = vmin.f32 %v2345_v52, %v5799_v23 }
 0x2f2   : > { %v5801_v36 = vpop.f32.mrf.mxu0  ;;  %v5803_v58 = vpop.f32.mrf.mxu1 }
 0x2f3   : > { %6600 = vst [vmem:[#allocation23_spill] sm:$0xff] %v5803_v58  ;;  %v2117_v37 = vmin.f32 %v2115_v38, %v5801_v36  ;;  %v2348_v56 = vmin.f32 %v2346_v27, %v5803_v58 }
 0x2f4   : > { %v5805_v6 = vpop.f32.mrf.mxu0  ;;  %v5807_v2 = vpop.f32.mrf.mxu1 }
 0x2f5   : > { %v2118_v57 = vmin.f32 %v2116_v40, %v5805_v6  ;;  %v2349_v35 = vmin.f32 %v2347_v48, %v5807_v2 }
 0x2f6   : > { %v5809_v24 = vpop.f32.mrf.mxu0  ;;  %v5811_v11 = vpop.f32.mrf.mxu1 }
 0x2f7   : > { %6601 = vst [vmem:[#allocation24_spill] sm:$0xff] %v5811_v11  ;;  %v2119_v18 = vmin.f32 %v2117_v37, %v5809_v24  ;;  %v2350_v21 = vmin.f32 %v2348_v56, %v5811_v11  ;;  %v2075_v56 = vmin.f32 %v5616_v10, %v5751_v53 }
 0x2f8   : > { %v5813_v54 = vpop.f32.mrf.mxu0  ;;  %v5815_v4 = vpop.f32.mrf.mxu1 }
 0x2f9   : > { %6602 = vst [vmem:[#allocation25_spill] sm:$0xff] %v5815_v4  ;;  %v2120_v61 = vmin.f32 %v2118_v57, %v5813_v54  ;;  %v2351_v58 = vmin.f32 %v2349_v35, %v5815_v4 }
 0x2fa   : > { %v5817_v29 = vpop.f32.mrf.mxu0  ;;  %v5819_v59 = vpop.f32.mrf.mxu1 }
 0x2fb   : > { %6603 = vst [vmem:[#allocation26_spill] sm:$0xff] %v5819_v59  ;;  %v2121_v27 = vmin.f32 %v2119_v18, %v5817_v29  ;;  %v2352_v52 = vmin.f32 %v2350_v21, %v5819_v59 }
 0x2fc   : > { %v5825_v7 = vpop.f32.mrf.mxu0  ;;  %v5827_v46 = vpop.f32.mrf.mxu1 }
 0x2fd   : > { %6604 = vst [vmem:[#allocation27_spill] sm:$0xff] %v5827_v46  ;;  %v2122_v11 = vmin.f32 %v2120_v61, %v5825_v7  ;;  %v2353_v18 = vmin.f32 %v2351_v58, %v5827_v46  ;;  %v2076_v46 = vmin.f32 %v5626_v63, %v5761_v41 }
 0x2fe   : > { %v5835_v0 = vpop.f32.mrf.mxu0  ;;  %v5837_v39 = vpop.f32.mrf.mxu1 }
 0x2ff   : > { %v2123_v48 = vmin.f32 %v2121_v27, %v5835_v0  ;;  %v2354_v40 = vmin.f32 %v2352_v52, %v5837_v39  ;;  %v2091_v52 = vmin.f32 %v2075_v56, %v5755_v3 }
 0x300   : > { %v5843_v32 = vpop.f32.mrf.mxu0  ;;  %v5845_v33 = vpop.f32.mrf.mxu1 }
 0x301   : > { %6605 = vst [vmem:[#allocation28_spill] sm:$0xff] %v5845_v33  ;;  %v2124_v4 = vmin.f32 %v2122_v11, %v5843_v32  ;;  %v2355_v10 = vmin.f32 %v2353_v18, %v5845_v33  ;;  %v2306_v63 = vmin.f32 %v2091_v52, %v5753_v62 }
 0x302   : > { %v5851_v26 = vpop.f32.mrf.mxu0  ;;  %v5853_v13 = vpop.f32.mrf.mxu1 }
 0x303   : > { %6606 = vst [vmem:[#allocation29_spill] sm:$0xff] %v5853_v13  ;;  %v2125_v35 = vmin.f32 %v2123_v48, %v5851_v26  ;;  %v2356_v59 = vmin.f32 %v2354_v40, %v5853_v13 }
 0x304   : > { %v5859_v44 = vpop.f32.mrf.mxu0  ;;  %v5861_v47 = vpop.f32.mrf.mxu1 }
 0x305   : > { %v2126_v48 = vmin.f32 %v2124_v4, %v5859_v44  ;;  %v2357_v40 = vmin.f32 %v2355_v10, %v5861_v47  ;;  %v2092_v10 = vmin.f32 %v2076_v46, %v5765_v9  ;;  %v2137_v46 = vld [vmem:[#allocation2 + $0x58] sm:$0xff] }
 0x306   : > { %v5867_v42 = vpop.f32.mrf.mxu0  ;;  %v5869_v25 = vpop.f32.mrf.mxu1 }
 0x307   : > { %v2127_v58 = vmin.f32 %v2125_v35, %v5867_v42  ;;  %v2358_v61 = vmin.f32 %v2356_v59, %v5869_v25 }
 0x308   : > { %v5875_v8 = vpop.f32.mrf.mxu0  ;;  %v5877_v38 = vpop.f32.mrf.mxu1 }
 0x309   : > { %6607 = vst [vmem:[#allocation30_spill] sm:$0xff] %v5877_v38  ;;  %v2128_v3 = vmin.f32 %v2126_v48, %v5875_v8  ;;  %v2359_v56 = vmin.f32 %v2357_v40, %v5877_v38 }
 0x30a   : > { %v5883_v23 = vpop.f32.mrf.mxu0  ;;  %v5885_v37 = vpop.f32.mrf.mxu1 }
 0x30b   : > { %6608 = vst [vmem:[#allocation31_spill] sm:$0xff] %v5885_v37  ;;  %v2129_v13 = vmin.f32 %v2127_v58, %v5883_v23  ;;  %v2360_v33 = vmin.f32 %v2358_v61, %v5885_v37  ;;  %v2077_v58 = vmin.f32 %v5640_v31, %v5769_v15  ;;  %v2368_v31 = vld [vmem:[#allocation2 + $0x98] sm:$0xff]  ;;  %v2322_v15 = vmin.f32 %v2306_v63, %v5757_v34  ;;  %v2138_v63 = vld [vmem:[#allocation2 + $0x10] sm:$0xff] }
 0x30c   : > { %v5893_v21 = vpop.f32.mrf.mxu0  ;;  %v5895_v57 = vpop.f32.mrf.mxu1 }
 0x30d   : > { %6609 = vst [vmem:[#allocation32_spill] sm:$0xff] %v5895_v57  ;;  %v2130_v61 = vmin.f32 %v2128_v3, %v5893_v21  ;;  %v2361_v48 = vmin.f32 %v2359_v56, %v5895_v57  ;;  %v2307_v57 = vmin.f32 %v2092_v10, %v5763_v30 }
 0x30e   : > { %v5901_v53 = vpop.f32.mrf.mxu0  ;;  %v5903_v27 = vpop.f32.mrf.mxu1 }
 0x30f   : > { %6610 = vst [vmem:[#allocation33_spill] sm:$0xff] %v5903_v27  ;;  %v2131_v41 = vmin.f32 %v2129_v13, %v5901_v53  ;;  %v2362_v4 = vmin.f32 %v2360_v33, %v5903_v27 }
 0x310   : > { %v5912_v11 = vpop.f32.mrf.mxu0  ;;  %v5914_v18 = vpop.f32.mrf.mxu1 }
 0x311   : > { %6611 = vst [vmem:[#allocation34_spill] sm:$0xff] %v5912_v11  ;;  %6612 = vst [vmem:[#allocation35_spill] sm:$0xff] %v5914_v18  ;;  %v2132_v13 = vmin.f32 %v2130_v61, %v5912_v11  ;;  %v2363_v33 = vmin.f32 %v2361_v48, %v5914_v18  ;;  %v2078_v18 = vmin.f32 %v5650_v19, %v5777_v45 }
 0x312   : > { %v5920_v59 = vpop.f32.mrf.mxu0  ;;  %v5922_v35 = vpop.f32.mrf.mxu1 }
 0x313   : > { %6613 = vst [vmem:[#allocation36_spill] sm:$0xff] %v5920_v59  ;;  %6614 = vst [vmem:[#allocation37_spill] sm:$0xff] %v5922_v35  ;;  %v2133_v38 = vmin.f32 %v2131_v41, %v5920_v59  ;;  %v2364_v62 = vmin.f32 %v2362_v4, %v5922_v35  ;;  %v2093_v41 = vmin.f32 %v2077_v58, %v5773_v28 }
 0x314   : > { %v5932_v40 = vpop.f32.mrf.mxu0  ;;  %v5934_v37 = vpop.f32.mrf.mxu1  ;;  %v2323_v58 = vmin.f32 %v2307_v57, %v5767_v16 }
 0x315   : > { %v2134_v4 = vmin.f32 %v2132_v13, %v5932_v40  ;;  %v2365_v61 = vmin.f32 %v2363_v33, %v5934_v37  ;;  %v2308_v19 = vmin.f32 %v2093_v41, %v5771_v20 }
 0x316   : > { %v2070_v9 = vpop.f32.mrf.mxu0  ;;  %v2301_v52 = vpop.f32.mrf.mxu1 }
 0x317   : > { %v2090_v3 = vmin.f32 %v5759_v17, %v2070_v9  ;;  %v2135_v56 = vmin.f32 %v2133_v38, %v2070_v9  ;;  %v2366_v27 = vmin.f32 %v2364_v62, %v2301_v52  ;;  %v2369_v17 = vld [vmem:[#allocation2 + $0x60] sm:$0xff] }
 0x318   : > { %v2072_v35 = vpop.f32.mrf.mxu0  ;;  %v2303_v48 = vpop.f32.mrf.mxu1 }
 0x319   : > { %v2139_v59 = vmin.f32 %v2137_v46, %v2135_v56  ;;  %v2370_v11 = vmin.f32 %v2368_v31, %v2366_v27  ;;  %v2106_v34 = vmin.f32 %v2090_v3, %v2072_v35  ;;  %v2136_v38 = vmin.f32 %v2134_v4, %v2072_v35 }
 0x31a   : > { %v2367_v62 = vmin.f32 %v2365_v61, %v2303_v48  ;;  %v5948_v9 = vpop.f32.mrf.mxu0  ;;  %v5950_v30 = vpop.f32.mrf.mxu1  ;;  %v2094_v35 = vmin.f32 %v2078_v18, %v5781_v5  ;;  %v2079_v46 = vmin.f32 %v5664_v14, %v5785_v51  ;;  %v2324_v31 = vmin.f32 %v2308_v19, %v5775_v12 }
 0x31b   : > { %2141 = vst [vmem:[#allocation2 + $0x58] sm:$0xff] %v2139_v59  ;;  %2372 = vst [vmem:[#allocation2 + $0x98] sm:$0xff] %v2370_v11  ;;  %v2321_v28 = vmin.f32 %v2106_v34, %v2301_v52  ;;  %v2537_v10 = vmin.f32 %v2322_v15, %v5948_v9  ;;  %v2140_v45 = vmin.f32 %v2138_v63, %v2136_v38  ;;  %v6615_v34 = vld [vmem:[#allocation19_spill] sm:$0xff] }
 0x31c   : > { %v2371_v27 = vmin.f32 %v2369_v17, %v2367_v62  ;;  %v5955_v13 = vpop.f32.mrf.mxu0  ;;  %v5957_v33 = vpop.f32.mrf.mxu1  ;;  %v2080_v5 = vmin.f32 %v5674_v50, %v5793_v43  ;;  %v2309_v18 = vmin.f32 %v2094_v35, %v5779_v22  ;;  %v2095_v15 = vmin.f32 %v2079_v46, %v5789_v60  ;;  %v6618_v35 = vld [vmem:[#allocation11_spill] sm:$0xff] }
 0x31d   : > { %v5962_v59 = vmin.f32 %v2321_v28, %v2303_v48  ;;  %v2553_v11 = vmin.f32 %v2537_v10, %v5955_v13  ;;  %2142 = vst [vmem:[#allocation2 + $0x10] sm:$0xff] %v2140_v45  ;;  %v2081_v22 = vmin.f32 %v5688_v55, %v5801_v36  ;;  %v6616_v36 = vld [vmem:[#allocation21_spill] sm:$0xff]  ;;  %v6617_v45 = vld [vmem:[#allocation20_spill] sm:$0xff]  ;;  %v2082_v46 = vmin.f32 %v6618_v35, %v5809_v24 }
 0x31e   : > { %2373 = vst [vmem:[#allocation2 + $0x60] sm:$0xff] %v2371_v27  ;;  %v5965_v16 = vpop.f32.mrf.mxu0  ;;  %v5967_v20 = vpop.f32.mrf.mxu1  ;;  %v2096_v43 = vmin.f32 %v2080_v5, %v5797_v1  ;;  %v2325_v48 = vmin.f32 %v2309_v18, %v5783_v49  ;;  %v2310_v63 = vmin.f32 %v2095_v15, %v6615_v34  ;;  %v6619_v18 = vld [vmem:[#allocation22_spill] sm:$0xff] }
 0x31f   : > { %v2538_v57 = vmin.f32 %v2323_v58, %v5965_v16  ;;  %v2768_v52 = vmin.f32 %v2553_v11, %v5950_v30  ;;  %v2097_v58 = vmin.f32 %v2081_v22, %v5805_v6 }
 0x320   : > { %v5974_v14 = vpop.f32.mrf.mxu0  ;;  %v5976_v51 = vpop.f32.mrf.mxu1  ;;  %v2311_v10 = vmin.f32 %v2096_v43, %v6616_v36  ;;  %v2326_v27 = vmin.f32 %v2310_v63, %v6617_v45  ;;  %v6621_v43 = vld [vmem:[#allocation12_spill] sm:$0xff] }
 0x321   : > { %v2554_v3 = vmin.f32 %v2538_v57, %v5974_v14  ;;  %v2784_v56 = vmin.f32 %v2768_v52, %v5957_v33  ;;  %v2083_v22 = vmin.f32 %v6621_v43, %v5817_v29 }
 0x322   : > { %v5982_v41 = vpop.f32.mrf.mxu0  ;;  %v5984_v4 = vpop.f32.mrf.mxu1  ;;  %v2327_v15 = vmin.f32 %v2311_v10, %v6619_v18 }
 0x323   : > { %v2539_v12 = vmin.f32 %v2324_v31, %v5982_v41  ;;  %2836 = vmin.xlane.f32.xlu0 %v2784_v56  ;;  %v2769_v50 = vmin.f32 %v2554_v3, %v5967_v20  ;;  %v6620_v3 = vld [vmem:[#allocation23_spill] sm:$0xff] }
 0x324   : > { %v5991_v61 = vpop.f32.mrf.mxu0  ;;  %v5993_v60 = vpop.f32.mrf.mxu1  ;;  %v2312_v56 = vmin.f32 %v2097_v58, %v6620_v3  ;;  %v6623_v58 = vld [vmem:[#allocation24_spill] sm:$0xff]  ;;  %v6625_v3 = vld [vmem:[#allocation25_spill] sm:$0xff] }
 0x325   : > { %v2555_v17 = vmin.f32 %v2539_v12, %v5991_v61  ;;  %v2785_v38 = vmin.f32 %v2769_v50, %v5976_v51  ;;  %v2098_v50 = vmin.f32 %v2082_v46, %v5813_v54  ;;  %v6622_v54 = vld [vmem:[#allocation13_spill] sm:$0xff] }
 0x326   : > { %v5999_v62 = vpop.f32.mrf.mxu0  ;;  %v6001_v28 = vpop.f32.mrf.mxu1  ;;  %v2084_v36 = vmin.f32 %v6622_v54, %v5835_v0 }
 0x327   : > { %v2540_v1 = vmin.f32 %v2325_v48, %v5999_v62  ;;  %2838 = vmin.xlane.f32.xlu0 %v2785_v38  ;;  %v2770_v55 = vmin.f32 %v2555_v17, %v5984_v4  ;;  %v2313_v45 = vmin.f32 %v2098_v50, %v6623_v58  ;;  %v6626_v50 = vld [vmem:[#allocation26_spill] sm:$0xff] }
 0x328   : > { %v6007_v49 = vpop.f32.mrf.mxu0  ;;  %v6009_v19 = vpop.f32.mrf.mxu1 }
 0x329   : > { %v2556_v11 = vmin.f32 %v2540_v1, %v6007_v49  ;;  %v2786_v57 = vmin.f32 %v2770_v55, %v5993_v60  ;;  %v2328_v55 = vmin.f32 %v2312_v56, %v5807_v2  ;;  %v2329_v56 = vmin.f32 %v2313_v45, %v6625_v3 }
 0x32a   : > { %v6016_v52 = vpop.f32.mrf.mxu0  ;;  %v6018_v31 = vpop.f32.mrf.mxu1 }
 0x32b   : > { %v2541_v5 = vmin.f32 %v2326_v27, %v6016_v52  ;;  %2840 = vmin.xlane.f32.xlu1 %v2786_v57  ;;  %v2771_v6 = vmin.f32 %v2556_v11, %v6001_v28  ;;  %v2099_v27 = vmin.f32 %v2083_v22, %v5825_v7 }
 0x32c   : > { %v6024_v12 = vpop.f32.mrf.mxu0  ;;  %v6026_v24 = vpop.f32.mrf.mxu1 }
 0x32d   : > { %v2557_v48 = vmin.f32 %v2541_v5, %v6024_v12  ;;  %v2787_v34 = vmin.f32 %v2771_v6, %v6009_v19  ;;  %v2100_v5 = vmin.f32 %v2084_v36, %v5843_v32  ;;  %v6624_v6 = vld [vmem:[#allocation14_spill] sm:$0xff]  ;;  %v2314_v43 = vmin.f32 %v2099_v27, %v6626_v50  ;;  %v6628_v27 = vld [vmem:[#allocation27_spill] sm:$0xff]  ;;  %v6630_v50 = vld [vmem:[#allocation28_spill] sm:$0xff] }
 0x32e   : > { %v6033_v63 = vpop.f32.mrf.mxu0  ;;  %v6035_v17 = vpop.f32.mrf.mxu1  ;;  %v2085_v18 = vmin.f32 %v6624_v6, %v5851_v26 }
 0x32f   : > { %v2542_v38 = vmin.f32 %v2327_v15, %v6033_v63  ;;  %2842 = vmin.xlane.f32.xlu1 %v2787_v34  ;;  %v2772_v1 = vmin.f32 %v2557_v48, %v6018_v31  ;;  %v6627_v34 = vld [vmem:[#allocation15_spill] sm:$0xff]  ;;  %v2315_v54 = vmin.f32 %v2100_v5, %v5837_v39  ;;  %v2800_v5 = vmin.f32 %v5950_v30, %v5967_v20 }
 0x330   : > { %v6042_v10 = vpop.f32.mrf.mxu0  ;;  %v6044_v29 = vpop.f32.mrf.mxu1  ;;  %v2101_v36 = vmin.f32 %v2085_v18, %v5859_v44  ;;  %v2569_v44 = vmin.f32 %v5948_v9, %v5965_v16 }
 0x331   : > { %v2558_v35 = vmin.f32 %v2542_v38, %v6042_v10  ;;  %v2788_v46 = vmin.f32 %v2772_v1, %v6026_v24  ;;  %v2086_v38 = vmin.f32 %v6627_v34, %v5867_v42  ;;  %v2802_v30 = vmin.f32 %v2800_v5, %v5984_v4 }
 0x332   : > { %v6050_v11 = vpop.f32.mrf.mxu0  ;;  %v6052_v57 = vpop.f32.mrf.mxu1  ;;  %v2571_v9 = vmin.f32 %v2569_v44, %v5982_v41 }
 0x333   : > { %v2543_v2 = vmin.f32 %v2328_v55, %v6050_v11  ;;  %2844 = vmin.xlane.f32.xlu0 %v2788_v46  ;;  %v2773_v0 = vmin.f32 %v2558_v35, %v6035_v17  ;;  %v2330_v35 = vmin.f32 %v2314_v43, %v6628_v27  ;;  %v6631_v43 = vld [vmem:[#allocation29_spill] sm:$0xff]  ;;  %v2804_v4 = vmin.f32 %v2802_v30, %v6001_v28 }
 0x334   : > { %v6059_v15 = vpop.f32.mrf.mxu0  ;;  %v6061_v7 = vpop.f32.mrf.mxu1  ;;  %v2573_v41 = vmin.f32 %v2571_v9, %v5999_v62  ;;  %v6632_v27 = vld [vmem:[#allocation17_spill] sm:$0xff] }
 0x335   : > { %v2559_v22 = vmin.f32 %v2543_v2, %v6059_v15  ;;  %v2789_v48 = vmin.f32 %v2773_v0, %v6044_v29  ;;  %v2102_v2 = vmin.f32 %v2086_v38, %v5875_v8  ;;  %v6629_v0 = vld [vmem:[#allocation16_spill] sm:$0xff]  ;;  %v2331_v8 = vmin.f32 %v2315_v54, %v6630_v50  ;;  %v6635_v50 = vld [vmem:[#allocation34_spill] sm:$0xff] }
 0x336   : > { %v6069_v1 = vpop.f32.mrf.mxu0  ;;  %v6071_v32 = vpop.f32.mrf.mxu1  ;;  %v2087_v6 = vmin.f32 %v6629_v0, %v5883_v23  ;;  %v2570_v23 = vmin.f32 %v5955_v13, %v5974_v14  ;;  %v2575_v62 = vmin.f32 %v2573_v41, %v6016_v52  ;;  %v2806_v28 = vmin.f32 %v2804_v4, %v6018_v31 }
 0x337   : > { %v2544_v26 = vmin.f32 %v2329_v56, %v6069_v1  ;;  %2846 = vmin.xlane.f32.xlu1 %v2789_v48  ;;  %v2774_v55 = vmin.f32 %v2559_v22, %v6052_v57  ;;  %v2316_v22 = vmin.f32 %v2101_v36, %v6631_v43  ;;  %v2317_v38 = vmin.f32 %v2102_v2, %v5869_v25  ;;  %v6636_v43 = vld [vmem:[#allocation36_spill] sm:$0xff] }
 0x338   : > { %v6077_v58 = vpop.f32.mrf.mxu0  ;;  %v6079_v45 = vpop.f32.mrf.mxu1  ;;  %v2572_v13 = vmin.f32 %v2570_v23, %v5991_v61  ;;  %v2808_v52 = vmin.f32 %v2806_v28, %v6035_v17 }
 0x339   : > { %v2560_v42 = vmin.f32 %v2544_v26, %v6077_v58  ;;  %v2790_v46 = vmin.f32 %v2774_v55, %v6061_v7  ;;  %v2103_v26 = vmin.f32 %v2087_v6, %v5893_v21  ;;  %v2801_v55 = vmin.f32 %v5957_v33, %v5976_v51  ;;  %v6634_v6 = vld [vmem:[#allocation31_spill] sm:$0xff] }
 0x33a   : > { %v6087_v3 = vpop.f32.mrf.mxu0  ;;  %v6089_v39 = vpop.f32.mrf.mxu1  ;;  %v2332_v21 = vmin.f32 %v2316_v22, %v5861_v47  ;;  %v2088_v33 = vmin.f32 %v6632_v27, %v5901_v53  ;;  %v2574_v61 = vmin.f32 %v2572_v13, %v6007_v49  ;;  %v6633_v47 = vld [vmem:[#allocation30_spill] sm:$0xff] }
 0x33b   : > { %v2545_v18 = vmin.f32 %v2330_v35, %v6087_v3  ;;  %2848 = vmin.xlane.f32.xlu0 %v2790_v46  ;;  %v2775_v56 = vmin.f32 %v2560_v42, %v6071_v32  ;;  %v2803_v51 = vmin.f32 %v2801_v55, %v5993_v60  ;;  %v2333_v0 = vmin.f32 %v2317_v38, %v6633_v47  ;;  %v6637_v22 = vld [vmem:[#allocation18_spill] sm:$0xff]  ;;  %v6638_v38 = vld [vmem:[#allocation32_spill] sm:$0xff] }
 0x33c   : > { %v6101_v48 = vpop.f32.mrf.mxu0  ;;  %v6103_v34 = vpop.f32.mrf.mxu1  ;;  %v2318_v53 = vmin.f32 %v2103_v26, %v6634_v6  ;;  %v2576_v49 = vmin.f32 %v2574_v61, %v6024_v12  ;;  %v2089_v23 = vmin.f32 %v6637_v22, %v6636_v43 }
 0x33d   : > { %v2561_v16 = vmin.f32 %v2545_v18, %v6101_v48  ;;  %v2791_v20 = vmin.f32 %v2775_v56, %v6079_v45  ;;  %v2805_v60 = vmin.f32 %v2803_v51, %v6009_v19  ;;  %v2577_v18 = vmin.f32 %v2575_v62, %v6033_v63 }
 0x33e   : > { %v6114_v14 = vpop.f32.mrf.mxu0  ;;  %v6116_v54 = vpop.f32.mrf.mxu1  ;;  %v2578_v19 = vmin.f32 %v2576_v49, %v6042_v10  ;;  %v2810_v63 = vmin.f32 %v2808_v52, %v6052_v57  ;;  %v2334_v26 = vmin.f32 %v2318_v53, %v6638_v38 }
 0x33f   : > { %v2546_v36 = vmin.f32 %v2331_v8, %v6114_v14  ;;  %2850 = vmin.xlane.f32.xlu1 %v2791_v20  ;;  %v2776_v25 = vmin.f32 %v2561_v16, %v6089_v39  ;;  %v2104_v8 = vmin.f32 %v2088_v33, %v6635_v50  ;;  %v2807_v9 = vmin.f32 %v2805_v60, %v6026_v24 }
 0x340   : > { %v6127_v35 = vpop.f32.mrf.mxu0  ;;  %v6129_v42 = vpop.f32.mrf.mxu1  ;;  %v2579_v16 = vmin.f32 %v2577_v18, %v6050_v11  ;;  %v2580_v13 = vmin.f32 %v2578_v19, %v6059_v15  ;;  %v2812_v10 = vmin.f32 %v2810_v63, %v6071_v32 }
 0x341   : > { %v2562_v46 = vmin.f32 %v2546_v36, %v6127_v35  ;;  %v2792_v2 = vmin.f32 %v2776_v25, %v6103_v34  ;;  %v2809_v55 = vmin.f32 %v2807_v9, %v6044_v29  ;;  %v6639_v25 = vld [vmem:[#allocation33_spill] sm:$0xff] }
 0x342   : > { %v2502_v44 = vpop.f32.mrf.mxu0  ;;  %v2733_v5 = vpop.f32.mrf.mxu1  ;;  %v2581_v24 = vmin.f32 %v2579_v16, %v6069_v1  ;;  %v2319_v57 = vmin.f32 %v2104_v8, %v6639_v25  ;;  %v2582_v33 = vmin.f32 %v2580_v13, %v6077_v58  ;;  %v2814_v61 = vmin.f32 %v2812_v10, %v6089_v39 }
 0x343   : > { %v2547_v56 = vmin.f32 %v2332_v21, %v2502_v44  ;;  %2852 = vmin.xlane.f32.xlu0 %v2792_v2  ;;  %v2777_v31 = vmin.f32 %v2562_v46, %v6116_v54  ;;  %v2105_v21 = vmin.f32 %v2089_v23, %v5932_v40  ;;  %v2811_v27 = vmin.f32 %v2809_v55, %v6061_v7 }
 0x344   : > { %v2504_v12 = vpop.f32.mrf.mxu0  ;;  %v2735_v30 = vpop.f32.mrf.mxu1  ;;  %v2583_v15 = vmin.f32 %v2581_v24, %v6087_v3  ;;  %v2584_v28 = vmin.f32 %v2582_v33, %v6101_v48  ;;  %v2816_v7 = vmin.f32 %v2814_v61, %v6116_v54  ;;  %v6641_v3 = vld [vmem:[#allocation37_spill] sm:$0xff] }
 0x345   : > { %v2563_v17 = vmin.f32 %v2547_v56, %v2504_v12  ;;  %v2793_v20 = vmin.f32 %v2777_v31, %v6129_v42  ;;  %v2813_v32 = vmin.f32 %v2811_v27, %v6079_v45  ;;  %v2320_v53 = vmin.f32 %v2105_v21, %v6641_v3  ;;  %v2599_v27 = vld [vmem:[#allocation2 + $0x20] sm:$0xff] }
 0x346   : > { %v2508_v41 = vpop.f32.mrf.mxu0  ;;  %v2739_v4 = vpop.f32.mrf.mxu1  ;;  %v2585_v40 = vmin.f32 %v2583_v15, %v6114_v14  ;;  %v2586_v60 = vmin.f32 %v2584_v28, %v6127_v35  ;;  %v2818_v18 = vmin.f32 %v2816_v7, %v2733_v5  ;;  %v2600_v28 = vld [vmem:[#allocation2 + $0x48] sm:$0xff] }
 0x347   : > { %v2548_v36 = vmin.f32 %v2333_v0, %v2508_v41  ;;  %2854 = vmin.xlane.f32.xlu1 %v2793_v20  ;;  %v2778_v11 = vmin.f32 %v2563_v17, %v2733_v5  ;;  %v6640_v0 = vld [vmem:[#allocation35_spill] sm:$0xff]  ;;  %v2815_v39 = vmin.f32 %v2813_v32, %v6103_v34  ;;  %v2336_v34 = vmin.f32 %v2320_v53, %v5934_v37  ;;  %v6178_v53 = vld [vmem:[%s4468_s24 + $0x10] sm:$0xff] }
 0x348   : > { %v2510_v29 = vpop.f32.mrf.mxu0  ;;  %v2741_v51 = vpop.f32.mrf.mxu1  ;;  %v2335_v6 = vmin.f32 %v2319_v57, %v6640_v0  ;;  %v2587_v48 = vmin.f32 %v2585_v40, %v2502_v44  ;;  %v2588_v54 = vmin.f32 %v2586_v60, %v2504_v12  ;;  %v2820_v43 = vmin.f32 %v2818_v18, %v2739_v4  ;;  %v6196_v18 = vld [vmem:[%s4468_s24 + $0x38] sm:$0xff] }
 0x349   : > { %v2564_v1 = vmin.f32 %v2548_v36, %v2510_v29  ;;  %v2794_v62 = vmin.f32 %v2778_v11, %v2735_v30  ;;  %v2817_v14 = vmin.f32 %v2815_v39, %v6129_v42  ;;  %vm2886_vm13 = vcmp.gt.f32.partialorder %v6178_v53, 0.5  ;;  %v6182_v39 = vld [vmem:[%s4468_s24 + $0x18] sm:$0xff] }
 0x34a   : > { %v2514_v46 = vpop.f32.mrf.mxu0  ;;  %v2745_v2 = vpop.f32.mrf.mxu1  ;;  %v2589_v8 = vmin.f32 %v2587_v48, %v2508_v41  ;;  %v2590_v35 = vmin.f32 %v2588_v54, %v2510_v29  ;;  %v2830_v29 = vld [vmem:[#allocation2 + $0x70] sm:$0xff]  ;;  %vm2887_vm14 = vcmp.gt.f32.partialorder %v6182_v39, 0.5  ;;  %v6642_v60 = vmov 0.0  }
 0x34b   : > { %v2549_v47 = vmin.f32 %v2334_v26, %v2514_v46  ;;  %2856 = vmin.xlane.f32.xlu0 %v2794_v62  ;;  %v2779_v58 = vmin.f32 %v2564_v1, %v2739_v4  ;;  %v2819_v9 = vmin.f32 %v2817_v14, %v2735_v30  ;;  %v2822_v5 = vmin.f32 %v2820_v43, %v2745_v2  ;;  %v6192_v48 = vld [vmem:[%s4468_s24 + $0x30] sm:$0xff] }
 0x34c   : > { %v2516_v45 = vpop.f32.mrf.mxu0  ;;  %v2747_v49 = vpop.f32.mrf.mxu1  ;;  %v2591_v44 = vmin.f32 %v2589_v8, %v2514_v46  ;;  %vm2890_vm15 = vcmp.gt.f32.partialorder %v6192_v48, 0.5  ;;  %vm2891_vm0 = vcmp.gt.f32.partialorder %v6196_v18, 0.5 }
 0x34d   : > { %v2565_v52 = vmin.f32 %v2549_v47, %v2516_v45  ;;  %v2795_v56 = vmin.f32 %v2779_v58, %v2741_v51  ;;  %v2821_v20 = vmin.f32 %v2819_v9, %v2741_v51  ;;  %v2592_v42 = vmin.f32 %v2590_v35, %v2516_v45  ;;  %v2831_v47 = vld [vmem:[#allocation2 + $0x90] sm:$0xff] }
 0x34e   : > { %v2520_v31 = vpop.f32.mrf.mxu0  ;;  %v2751_v50 = vpop.f32.mrf.mxu1  ;;  %v4181_v45 = vsel %vm2886_vm13, 1.0, %v6642_v60  ;;  %v4186_v14 = vsel %vm2891_vm0, 1.0, %v6642_v60 }
 0x34f   : > { %v2550_v22 = vmin.f32 %v2335_v6, %v2520_v31  ;;  %2858 = vmin.xlane.f32.xlu1 %v2795_v56  ;;  %v2780_v23 = vmin.f32 %v2565_v52, %v2745_v2  ;;  %v2593_v26 = vmin.f32 %v2591_v44, %v2520_v31  ;;  %v2824_v55 = vmin.f32 %v2822_v5, %v2751_v50  ;;  %v4346_v31 = vld [vmem:[%s4468_s24] sm:$0xff] }
 0x350   : > { %v2522_v19 = vpop.f32.mrf.mxu0  ;;  %v2753_v16 = vpop.f32.mrf.mxu1  ;;  %v2823_v4 = vmin.f32 %v2821_v20, %v2747_v49  ;;  %v4185_v56 = vsel %vm2890_vm15, 1.0, %v6642_v60  ;;  %vm2884_vm1 = vcmp.gt.f32.partialorder %v4346_v31, 0.5 }
 0x351   : > { %v2566_v63 = vmin.f32 %v2550_v22, %v2522_v19  ;;  %v2796_v17 = vmin.f32 %v2780_v23, %v2747_v49  ;;  %v2594_v24 = vmin.f32 %v2592_v42, %v2522_v19  ;;  %v4182_v49 = vsel %vm2887_vm14, 1.0, %v6642_v60  ;;  %v4348_v22 = vld [vmem:[%s4468_s24 + $0x20] sm:$0xff]  ;;  %v4349_v23 = vld [vmem:[%s4468_s24 + $0x28] sm:$0xff] }
 0x352   : > { %v2526_v12 = vpop.f32.mrf.mxu0  ;;  %v2757_v38 = vpop.f32.mrf.mxu1  ;;  %v2825_v57 = vmin.f32 %v2823_v4, %v2753_v16  ;;  %v4294_v52 = vpack.i.bf16 %v4182_v49, %v4181_v45  ;;  %v4304_v54 = vpack.i.bf16 %v4186_v14, %v4185_v56  ;;  %v4179_v8 = vsel %vm2884_vm1, 1.0, %v6642_v60  ;;  %v4350_v19 = vld [vmem:[%s4468_s24 + $0x40] sm:$0xff] }
 0x353   : > { %v2551_v13 = vmin.f32 %v2336_v34, %v2526_v12  ;;  %2860 = vmin.xlane.f32.xlu0 %v2796_v17  ;;  %v2781_v41 = vmin.f32 %v2566_v63, %v2751_v50  ;;  %v2595_v10 = vmin.f32 %v2593_v26, %v2526_v12  ;;  %v2826_v36 = vmin.f32 %v2824_v55, %v2757_v38  ;;  %v4347_v50 = vld [vmem:[%s4468_s24 + $0x8] sm:$0xff]  ;;  %v4352_v26 = vld [vmem:[%s4468_s24 + $0x50] sm:$0xff]  ;;  %v4353_v55 = vld [vmem:[%s4468_s24 + $0x58] sm:$0xff] }
 0x354   : > { %v2528_v37 = vpop.f32.mrf.mxu0  ;;  %v2759_v30 = vpop.f32.mrf.mxu1  ;;  %vm2885_vm2 = vcmp.gt.f32.partialorder %v4347_v50, 0.5  ;;  %vm2888_vm3 = vcmp.gt.f32.partialorder %v4348_v22, 0.5  ;;  %vm2889_vm4 = vcmp.gt.f32.partialorder %v4349_v23, 0.5  ;;  %vm2892_vm5 = vcmp.gt.f32.partialorder %v4350_v19, 0.5  ;;  %v4354_v14 = vld [vmem:[%s4468_s24 + $0x60] sm:$0xff]  ;;  %v3031_v23 = vld [vmem:[#allocation4 + $0x10] sm:$0xff] }
 0x355   : > { %v2567_v11 = vmin.f32 %v2551_v13, %v2528_v37  ;;  %v2797_v25 = vmin.f32 %v2781_v41, %v2753_v16  ;;  %v2596_v51 = vmin.f32 %v2594_v24, %v2528_v37  ;;  %v2827_v62 = vmin.f32 %v2825_v57, %v2759_v30  ;;  %v4351_v16 = vld [vmem:[%s4468_s24 + $0x48] sm:$0xff]  ;;  %v4356_v19 = vld [vmem:[%s4468_s24 + $0x70] sm:$0xff] }
 0x356   : > { %v6171_v21 = vpop.f32.mrf.mxu0  ;;  %v6173_v33 = vpop.f32.mrf.mxu1  ;;  %v4180_v43 = vsel %vm2885_vm2, 1.0, %v6642_v60  ;;  %v4183_v9 = vsel %vm2888_vm3, 1.0, %v6642_v60  ;;  %v4184_v35 = vsel %vm2889_vm4, 1.0, %v6642_v60  ;;  %vm2893_vm6 = vcmp.gt.f32.partialorder %v4351_v16, 0.5 }
 0x357   : > { %v2597_v15 = vmin.f32 %v2595_v10, %v6171_v21  ;;  %v2828_v61 = vmin.f32 %v2826_v36, %v6173_v33  ;;  %2862 = vmin.xlane.f32.xlu1 %v2797_v25  ;;  %v2782_v1 = vmin.f32 %v2567_v11, %v2757_v38  ;;  %v4289_v34 = vpack.i.bf16 %v4180_v43, %v4179_v8  ;;  %v4355_v8 = vld [vmem:[%s4468_s24 + $0x68] sm:$0xff] }
 0x358   : > { %v2534_v32 = vpop.f32.mrf.mxu0  ;;  %v2765_v46 = vpop.f32.mrf.mxu1  ;;  %v4299_v44 = vpack.i.bf16 %v4184_v35, %v4183_v9  ;;  %v4187_v5 = vsel %vm2892_vm5, 1.0, %v6642_v60  ;;  %v4188_v63 = vsel %vm2893_vm6, 1.0, %v6642_v60  ;;  %v2552_v20 = vmin.f32 %v5962_v59, %v6171_v21 }
 0x359   : > { %v2601_v2 = vmin.f32 %v2599_v27, %v2597_v15  ;;  %v2832_v40 = vmin.f32 %v2830_v29, %v2828_v61  ;;  %v2598_v7 = vmin.f32 %v2596_v51, %v2534_v32  ;;  %v2829_v58 = vmin.f32 %v2827_v62, %v2765_v46 }
 0x35a   : > { %v2798_v0 = vmin.f32 %v2782_v1, %v2759_v30  ;;  %v4309_v17 = vpack.i.bf16 %v4188_v63, %v4187_v5  ;;  %v2568_v42 = vmin.f32 %v2552_v20, %v2534_v32  ;;  %vm2894_vm7 = vcmp.gt.f32.partialorder %v4352_v26, 0.5  ;;  %v3035_v20 = vld [vmem:[#allocation4 + $0x30] sm:$0xff]  ;;  %v3029_v26 = vld [vmem:[#allocation4] sm:$0xff] }
 0x35b   : > { %2603 = vst [vmem:[#allocation2 + $0x20] sm:$0xff] %v2601_v2  ;;  %2834 = vst [vmem:[#allocation2 + $0x70] sm:$0xff] %v2832_v40  ;;  %v2602_v6 = vmin.f32 %v2600_v28, %v2598_v7  ;;  %v2833_v3 = vmin.f32 %v2831_v47, %v2829_v58  ;;  %vm2895_vm8 = vcmp.gt.f32.partialorder %v4353_v55, 0.5  ;;  %v4189_v13 = vsel %vm2894_vm7, 1.0, %v6642_v60  ;;  %v3030_v55 = vld [vmem:[#allocation4 + $0x8] sm:$0xff] }
 0x35c   : > { %2864 = vmin.xlane.f32.xlu0 %v2798_v0  ;;  %v2783_v12 = vmin.f32 %v2568_v42, %v6173_v33  ;;  %v4190_v41 = vsel %vm2895_vm8, 1.0, %v6642_v60  ;;  %vm2896_vm9 = vcmp.gt.f32.partialorder %v4354_v14, 0.5  ;;  %vm2897_vm10 = vcmp.gt.f32.partialorder %v4355_v8, 0.5  ;;  %v3036_v42 = vld [vmem:[#allocation4 + $0x38] sm:$0xff] }
 0x35d   : > { %2604 = vst [vmem:[#allocation2 + $0x48] sm:$0xff] %v2602_v6  ;;  %2835 = vst [vmem:[#allocation2 + $0x90] sm:$0xff] %v2833_v3  ;;  %v4314_v4 = vpack.i.bf16 %v4190_v41, %v4189_v13  ;;  %vm2898_vm11 = vcmp.gt.f32.partialorder %v4356_v19, 0.5  ;;  %v4191_v16 = vsel %vm2896_vm9, 1.0, %v6642_v60  ;;  %v4192_v5 = vsel %vm2897_vm10, 1.0, %v6642_v60  ;;  %v2908_v19 = vld [vmem:[#allocation3 + $0x40] sm:$0xff] }
 0x35e   : > { %v2799_v38 = vmin.f32 %v2783_v12, %v2765_v46  ;;  %v4319_v41 = vpack.i.bf16 %v4192_v5, %v4191_v16  ;;  %v2909_v5 = vld [vmem:[#allocation3 + $0x48] sm:$0xff] }
 0x368   : > { %4295 = vrot.lane.b32.xlu1 %v4294_v52, %s4418_s8 }
 0x36c   : > { %4305 = vrot.lane.b32.xlu1 %v4304_v54, %s4418_s8 }
 0x372   : > { %4290 = vrot.lane.b32.xlu0 %v4289_v34, %s4418_s8  ;;  %v3032_v34 = vld [vmem:[#allocation4 + $0x18] sm:$0xff] }
 0x376   : > { %4300 = vrot.lane.b32.xlu0 %v4299_v44, %s4418_s8 }
 0x37a   : > { %4310 = vrot.lane.b32.xlu0 %v4309_v17, %s4418_s8 }
 0x390   : > { %2866 = vmin.xlane.f32.xlu1 %v2799_v38 }
 0x3a1   : > { %4315 = vrot.lane.b32.xlu1 %v4314_v4, %s4418_s8 }
 0x3ac   : > { %v2837_v24 = vpop.xlane.xlu0 %2836 }
 0x3ad   : > { %v2868_v59 = vmax.f32 %v2837_v24, 0.0 }
 0x3af   : > { %v2916_v37 = vsel %vm2884_vm1, %v2868_v59, 0.0 }
 0x3b0   : > { %v2839_v30 = vpop.xlane.xlu0 %2838  ;;  %2948 = vrot.lane.b32.xlu0 %v2916_v37, %s4418_s8 }
 0x3b1   : > { %v2869_v10 = vmax.f32 %v2839_v30, 0.0  ;;  %v3033_v30 = vld [vmem:[#allocation4 + $0x20] sm:$0xff] }
 0x3b3   : > { %v2917_v36 = vsel %vm2885_vm2, %v2869_v10, 0.0  ;;  %v3034_v10 = vld [vmem:[#allocation4 + $0x28] sm:$0xff] }
 0x3b4   : > { %v2841_v11 = vpop.xlane.xlu1 %2840  ;;  %2950 = vrot.lane.b32.xlu1 %v2917_v36, %s4418_s8 }
 0x3b5   : > { %v2870_v25 = vmax.f32 %v2841_v11, 0.0 }
 0x3b7   : > { %v2918_v57 = vsel %vm2886_vm13, %v2870_v25, 0.0 }
 0x3b8   : > { %v2843_v21 = vpop.xlane.xlu1 %2842  ;;  %2952 = vrot.lane.b32.xlu1 %v2918_v57, %s4418_s8  ;;  %v3037_v57 = vld [vmem:[#allocation4 + $0x40] sm:$0xff] }
 0x3b9   : > { %v2871_v27 = vmax.f32 %v2843_v21, 0.0  ;;  %v3038_v21 = vld [vmem:[#allocation4 + $0x48] sm:$0xff] }
 0x3bb   : > { %v2919_v33 = vsel %vm2887_vm14, %v2871_v27, 0.0 }
 0x3bc   : > { %v2845_v29 = vpop.xlane.xlu0 %2844  ;;  %2954 = vrot.lane.b32.xlu1 %v2919_v33, %s4418_s8 }
 0x3bd   : > { %v2872_v51 = vmax.f32 %v2845_v29, 0.0 }
 0x3bf   : > { %v2920_v15 = vsel %vm2888_vm3, %v2872_v51, 0.0 }
 0x3c0   : > { %v2847_v61 = vpop.xlane.xlu1 %2846  ;;  %2956 = vrot.lane.b32.xlu0 %v2920_v15, %s4418_s8  ;;  %v4357_v15 = vld [vmem:[%s4468_s24 + $0x78] sm:$0xff] }
 0x3c1   : > { %v2873_v1 = vmax.f32 %v2847_v61, 0.0  ;;  %vm2899_vm13 = vcmp.gt.f32.partialorder %v4357_v15, 0.5  ;;  %v4193_v61 = vsel %vm2898_vm11, 1.0, %v6642_v60  ;;  %v3043_v15 = vld [vmem:[#allocation4 + $0x70] sm:$0xff] }
 0x3c3   : > { %v2921_v62 = vsel %vm2889_vm4, %v2873_v1, 0.0 }
 0x3c4   : > { %v2849_v32 = vpop.xlane.xlu0 %2848  ;;  %2958 = vrot.lane.b32.xlu1 %v2921_v62, %s4418_s8  ;;  %v4194_v62 = vsel %vm2899_vm13, 1.0, %v6642_v60 }
 0x3c5   : > { %v2874_v28 = vmax.f32 %v2849_v32, 0.0 }
 0x3c7   : > { %v2922_v46 = vsel %vm2890_vm15, %v2874_v28, 0.0  ;;  %v4324_v28 = vpack.i.bf16 %v4194_v62, %v4193_v61  ;;  %v3044_v61 = vld [vmem:[#allocation4 + $0x78] sm:$0xff] }
 0x3c8   : > { %v2851_v2 = vpop.xlane.xlu1 %2850  ;;  %2960 = vrot.lane.b32.xlu0 %v2922_v46, %s4418_s8  ;;  %v3039_v46 = vld [vmem:[#allocation4 + $0x50] sm:$0xff] }
 0x3c9   : > { %v2875_v40 = vmax.f32 %v2851_v2, 0.0  ;;  %v3040_v2 = vld [vmem:[#allocation4 + $0x58] sm:$0xff] }
 0x3cb   : > { %v2923_v7 = vsel %vm2891_vm0, %v2875_v40, 0.0 }
 0x3cc   : > { %v2853_v47 = vpop.xlane.xlu0 %2852  ;;  %2962 = vrot.lane.b32.xlu1 %v2923_v7, %s4418_s8  ;;  %v2900_v7 = vld [vmem:[#allocation3] sm:$0xff] }
 0x3cd   : > { %v2876_v58 = vmax.f32 %v2853_v47, 0.0 }
 0x3cf   : > { %v2924_v0 = vsel %vm2892_vm5, %v2876_v58, 0.0 }
 0x3d0   : > { %v2855_v6 = vpop.xlane.xlu1 %2854  ;;  %2964 = vrot.lane.b32.xlu0 %v2924_v0, %s4418_s8 }
 0x3d1   : > { %v2877_v3 = vmax.f32 %v2855_v6, 0.0 }
 0x3d3   : > { %v2925_v53 = vsel %vm2893_vm6, %v2877_v3, 0.0  ;;  %v2901_v3 = vld [vmem:[#allocation3 + $0x8] sm:$0xff] }
 0x3d4   : > { %v2857_v39 = vpop.xlane.xlu0 %2856  ;;  %2966 = vrot.lane.b32.xlu1 %v2925_v53, %s4418_s8 }
 0x3d5   : > { %v2878_v45 = vmax.f32 %v2857_v39, 0.0  ;;  %v2902_v39 = vld [vmem:[#allocation3 + $0x10] sm:$0xff] }
 0x3d7   : > { %v2926_v49 = vsel %vm2894_vm7, %v2878_v45, 0.0 }
 0x3d8   : > { %v2859_v48 = vpop.xlane.xlu1 %2858  ;;  %2968 = vrot.lane.b32.xlu0 %v2926_v49, %s4418_s8 }
 0x3d9   : > { %v2879_v18 = vmax.f32 %v2859_v48, 0.0  ;;  %v2903_v48 = vld [vmem:[#allocation3 + $0x18] sm:$0xff] }
 0x3db   : > { %v2927_v52 = vsel %vm2895_vm8, %v2879_v18, 0.0 }
 0x3dc   : > { %v2861_v56 = vpop.xlane.xlu0 %2860  ;;  %2970 = vrot.lane.b32.xlu1 %v2927_v52, %s4418_s8 }
 0x3dd   : > { %v2880_v54 = vmax.f32 %v2861_v56, 0.0  ;;  %v2904_v56 = vld [vmem:[#allocation3 + $0x20] sm:$0xff] }
 0x3df   : > { %v2928_v31 = vsel %vm2896_vm9, %v2880_v54, 0.0 }
 0x3e0   : > { %v2863_v50 = vpop.xlane.xlu1 %2862  ;;  %2972 = vrot.lane.b32.xlu0 %v2928_v31, %s4418_s8  ;;  %v2905_v31 = vld [vmem:[#allocation3 + $0x28] sm:$0xff] }
 0x3e1   : > { %v2881_v43 = vmax.f32 %v2863_v50, 0.0 }
 0x3e3   : > { %v2929_v22 = vsel %vm2897_vm10, %v2881_v43, 0.0  ;;  %v2906_v43 = vld [vmem:[#allocation3 + $0x30] sm:$0xff] }
 0x3e4   : > { %v4296_v9 = vpop.permute.xlu1 %4295  ;;  %2974 = vrot.lane.b32.xlu1 %v2929_v22, %s4418_s8 }
 0x3e5   : > { %v2865_v35 = vpop.xlane.xlu0 %2864  ;;  %v4362_v63 = vadd.high.f32.bf16 %v3032_v34, %v4296_v9  ;;  %v4363_v17 = vadd.low.f32.bf16 %v3031_v23, %v4296_v9  ;;  %v2907_v34 = vld [vmem:[#allocation3 + $0x38] sm:$0xff] }
 0x3e6   : > { %v2882_v44 = vmax.f32 %v2865_v35, 0.0 }
 0x3e7   : > { %3160 = vst.msk [vmem:[#allocation4 + $0x18] sm:$0xff] %vm3012_vm12, %v4362_v63  ;;  %3159 = vst.msk [vmem:[#allocation4 + $0x10] sm:$0xff] %vm3012_vm12, %v4363_v17 }
 0x3e8   : > { %v4306_v12 = vpop.permute.xlu1 %4305  ;;  %v2930_v38 = vsel %vm2898_vm11, %v2882_v44, 0.0 }
 0x3e9   : > { %2976 = vrot.lane.b32.xlu0 %v2930_v38, %s4418_s8  ;;  %v4291_v13 = vpop.permute.xlu0 %4290  ;;  %v4364_v4 = vadd.high.f32.bf16 %v3036_v42, %v4306_v12  ;;  %v4365_v24 = vadd.low.f32.bf16 %v3035_v20, %v4306_v12  ;;  %v2910_v20 = vld [vmem:[#allocation3 + $0x50] sm:$0xff]  ;;  %v2911_v38 = vld [vmem:[#allocation3 + $0x58] sm:$0xff] }
 0x3ea   : > { %v4366_v59 = vadd.high.f32.bf16 %v3030_v55, %v4291_v13  ;;  %v4367_v37 = vadd.low.f32.bf16 %v3029_v26, %v4291_v13  ;;  %v2912_v13 = vld [vmem:[#allocation3 + $0x60] sm:$0xff] }
 0x3eb   : > { %3164 = vst.msk [vmem:[#allocation4 + $0x38] sm:$0xff] %vm3012_vm12, %v4364_v4  ;;  %3163 = vst.msk [vmem:[#allocation4 + $0x30] sm:$0xff] %vm3012_vm12, %v4365_v24  ;;  %v2913_v24 = vld [vmem:[#allocation3 + $0x68] sm:$0xff] }
 0x3ec   : > { %3158 = vst.msk [vmem:[#allocation4 + $0x8] sm:$0xff] %vm3012_vm12, %v4366_v59  ;;  %3157 = vst.msk [vmem:[#allocation4] sm:$0xff] %vm3012_vm12, %v4367_v37 }
 0x3ed   : > { %v4301_v36 = vpop.permute.xlu0 %4300  ;;  %4320 = vrot.lane.b32.xlu0 %v4319_v41, %s4418_s8 }
 0x3ee   : > { %v4368_v11 = vadd.high.f32.bf16 %v3034_v10, %v4301_v36  ;;  %v4369_v25 = vadd.low.f32.bf16 %v3033_v30, %v4301_v36  ;;  %v2914_v30 = vld [vmem:[#allocation3 + $0x70] sm:$0xff] }
 0x3f0   : > { %3162 = vst.msk [vmem:[#allocation4 + $0x28] sm:$0xff] %vm3012_vm12, %v4368_v11  ;;  %3161 = vst.msk [vmem:[#allocation4 + $0x20] sm:$0xff] %vm3012_vm12, %v4369_v25  ;;  %v3041_v11 = vld [vmem:[#allocation4 + $0x60] sm:$0xff]  ;;  %v3042_v25 = vld [vmem:[#allocation4 + $0x68] sm:$0xff] }
 0x3f1   : > { %v4311_v27 = vpop.permute.xlu0 %4310 }
 0x3f2   : > { %v4370_v33 = vadd.high.f32.bf16 %v3038_v21, %v4311_v27  ;;  %v4371_v29 = vadd.low.f32.bf16 %v3037_v57, %v4311_v27 }
 0x3f4   : > { %3166 = vst.msk [vmem:[#allocation4 + $0x48] sm:$0xff] %vm3012_vm12, %v4370_v33  ;;  %3165 = vst.msk [vmem:[#allocation4 + $0x40] sm:$0xff] %vm3012_vm12, %v4371_v29  ;;  %v2915_v33 = vld [vmem:[#allocation3 + $0x78] sm:$0xff] }
 0x419   : > { %v2867_v51 = vpop.xlane.xlu1 %2866 }
 0x41a   : > { %v2883_v1 = vmax.f32 %v2867_v51, 0.0 }
 0x41c   : > { %v2931_v32 = vsel %vm2899_vm13, %v2883_v1, 0.0 }
 0x41d   : > { %2978 = vrot.lane.b32.xlu1 %v2931_v32, %s4418_s8  ;;  %v4316_v40 = vpop.permute.xlu1 %4315 }
 0x41e   : > { %v4372_v47 = vadd.high.f32.bf16 %v3040_v2, %v4316_v40  ;;  %v4373_v58 = vadd.low.f32.bf16 %v3039_v46, %v4316_v40 }
 0x420   : > { %3168 = vst.msk [vmem:[#allocation4 + $0x58] sm:$0xff] %vm3012_vm12, %v4372_v47  ;;  %3167 = vst.msk [vmem:[#allocation4 + $0x50] sm:$0xff] %vm3012_vm12, %v4373_v58 }
 0x421   : > { %4325 = vrot.lane.b32.xlu1 %v4324_v28, %s4418_s8 }
 0x422   : > { %v2949_v0 = vpop.permute.xlu0 %2948 }
 0x423   : > { %v2996_v6 = vadd.f32 %v2949_v0, %v2900_v7 }
 0x425   : > { %3013 = vst.msk [vmem:[#allocation3] sm:$0xff] %vm3012_vm12, %v2996_v6 }
 0x426   : > { %v2951_v60 = vpop.permute.xlu1 %2950 }
 0x427   : > { %v2997_v53 = vadd.f32 %v2951_v60, %v2901_v3 }
 0x429   : > { %3014 = vst.msk [vmem:[#allocation3 + $0x8] sm:$0xff] %vm3012_vm12, %v2997_v53 }
 0x42a   : > { %v2953_v45 = vpop.permute.xlu1 %2952 }
 0x42b   : > { %v2998_v49 = vadd.f32 %v2953_v45, %v2902_v39 }
 0x42d   : > { %3015 = vst.msk [vmem:[#allocation3 + $0x10] sm:$0xff] %vm3012_vm12, %v2998_v49 }
 0x42e   : > { %v2955_v18 = vpop.permute.xlu1 %2954 }
 0x42f   : > { %v2999_v52 = vadd.f32 %v2955_v18, %v2903_v48 }
 0x431   : > { %3016 = vst.msk [vmem:[#allocation3 + $0x18] sm:$0xff] %vm3012_vm12, %v2999_v52 }
 0x432   : > { %v2957_v14 = vpop.permute.xlu0 %2956 }
 0x433   : > { %v3000_v54 = vadd.f32 %v2957_v14, %v2904_v56 }
 0x435   : > { %3017 = vst.msk [vmem:[#allocation3 + $0x20] sm:$0xff] %vm3012_vm12, %v3000_v54 }
 0x436   : > { %v2959_v50 = vpop.permute.xlu1 %2958 }
 0x437   : > { %v3001_v8 = vadd.f32 %v2959_v50, %v2905_v31 }
 0x439   : > { %3018 = vst.msk [vmem:[#allocation3 + $0x28] sm:$0xff] %vm3012_vm12, %v3001_v8 }
 0x43a   : > { %v2961_v22 = vpop.permute.xlu0 %2960 }
 0x43b   : > { %v3002_v23 = vadd.f32 %v2961_v22, %v2906_v43 }
 0x43d   : > { %3019 = vst.msk [vmem:[#allocation3 + $0x30] sm:$0xff] %vm3012_vm12, %v3002_v23 }
 0x43e   : > { %v2963_v9 = vpop.permute.xlu1 %2962 }
 0x43f   : > { %v3003_v35 = vadd.f32 %v2963_v9, %v2907_v34 }
 0x441   : > { %3020 = vst.msk [vmem:[#allocation3 + $0x38] sm:$0xff] %vm3012_vm12, %v3003_v35 }
 0x442   : > { %v2965_v16 = vpop.permute.xlu0 %2964 }
 0x443   : > { %v3004_v44 = vadd.f32 %v2965_v16, %v2908_v19 }
 0x445   : > { %3021 = vst.msk [vmem:[#allocation3 + $0x40] sm:$0xff] %vm3012_vm12, %v3004_v44 }
 0x446   : > { %v2967_v63 = vpop.permute.xlu1 %2966 }
 0x447   : > { %v3005_v17 = vadd.f32 %v2967_v63, %v2909_v5 }
 0x449   : > { %3022 = vst.msk [vmem:[#allocation3 + $0x48] sm:$0xff] %vm3012_vm12, %v3005_v17 }
 0x44a   : > { %v2969_v42 = vpop.permute.xlu0 %2968 }
 0x44b   : > { %v3006_v12 = vadd.f32 %v2969_v42, %v2910_v20 }
 0x44d   : > { %3023 = vst.msk [vmem:[#allocation3 + $0x50] sm:$0xff] %vm3012_vm12, %v3006_v12 }
 0x44e   : > { %v2971_v26 = vpop.permute.xlu1 %2970 }
 0x44f   : > { %v3007_v55 = vadd.f32 %v2971_v26, %v2911_v38 }
 0x451   : > { %3024 = vst.msk [vmem:[#allocation3 + $0x58] sm:$0xff] %vm3012_vm12, %v3007_v55 }
 0x452   : > { %v2973_v41 = vpop.permute.xlu0 %2972 }
 0x453   : > { %v3008_v4 = vadd.f32 %v2973_v41, %v2912_v13 }
 0x455   : > { %3025 = vst.msk [vmem:[#allocation3 + $0x60] sm:$0xff] %vm3012_vm12, %v3008_v4 }
 0x456   : > { %v2975_v59 = vpop.permute.xlu1 %2974 }
 0x457   : > { %v3009_v37 = vadd.f32 %v2975_v59, %v2913_v24 }
 0x459   : > { %3026 = vst.msk [vmem:[#allocation3 + $0x68] sm:$0xff] %vm3012_vm12, %v3009_v37 }
 0x45b   : > { %v2977_v10 = vpop.permute.xlu0 %2976 }
 0x45c   : > { %v3010_v36 = vadd.f32 %v2977_v10, %v2914_v30 }
 0x45e   : > { %3027 = vst.msk [vmem:[#allocation3 + $0x70] sm:$0xff] %vm3012_vm12, %v3010_v36 }
 0x45f   : > { %v4321_v57 = vpop.permute.xlu0 %4320 }
 0x460   : > { %v4374_v21 = vadd.high.f32.bf16 %v3042_v25, %v4321_v57  ;;  %v4375_v27 = vadd.low.f32.bf16 %v3041_v11, %v4321_v57 }
 0x462   : > { %3170 = vst.msk [vmem:[#allocation4 + $0x68] sm:$0xff] %vm3012_vm12, %v4374_v21  ;;  %3169 = vst.msk [vmem:[#allocation4 + $0x60] sm:$0xff] %vm3012_vm12, %v4375_v27 }
 0x48f   : > { %v2979_v29 = vpop.permute.xlu1 %2978 }
 0x490   : > { %v3011_v51 = vadd.f32 %v2979_v29, %v2915_v33 }
 0x492   : > { %3028 = vst.msk [vmem:[#allocation3 + $0x78] sm:$0xff] %vm3012_vm12, %v3011_v51  ;;  %3176 = sbr.rel (%p4195_p7) target bundleno = 1557 (0x615), region = 44 }
 0x493   : > { %v4326_v1 = vpop.permute.xlu1 %4325 }
 0x494   : > { %v4376_v62 = vadd.high.f32.bf16 %v3044_v61, %v4326_v1  ;;  %v4377_v32 = vadd.low.f32.bf16 %v3043_v15, %v4326_v1 }
 0x496   : > { %3172 = vst.msk [vmem:[#allocation4 + $0x78] sm:$0xff] %vm3012_vm12, %v4376_v62  ;;  %3171 = vst.msk [vmem:[#allocation4 + $0x70] sm:$0xff] %vm3012_vm12, %v4377_v32 }
 0x497   : > { %v3177_v28 = vld [vmem:[#allocation3] sm:$0xff]  ;;  %v3178_v46 = vld [vmem:[#allocation3 + $0x8] sm:$0xff]  ;;  %v3179_v2 = vld [vmem:[#allocation3 + $0x10] sm:$0xff]  ;;  %v4419_v63 = vmov 1966171168   ;;  %v3489_v36 = vlaneseq  ;;  %vm3713_vm15 = vcmask 1040384  }
 0x498   : > { %v3180_v40 = vld [vmem:[#allocation3 + $0x18] sm:$0xff]  ;;  %v3193_v7 = vsel %vm3012_vm12, %v3177_v28, 0.0  ;;  %v3194_v47 = vsel %vm3012_vm12, %v3178_v46, 0.0  ;;  %v3196_v58 = vsel %vm3012_vm12, %v3179_v2, 0.0  ;;  %v3181_v0 = vld [vmem:[#allocation3 + $0x20] sm:$0xff]  ;;  %v3182_v60 = vld [vmem:[#allocation3 + $0x28] sm:$0xff]  ;;  %v6329_v17 = vunpack.c.l.s4 %v4419_v63 }
 0x499   : > { %v3195_v6 = vadd.f32 %v3194_v47, %v3193_v7  ;;  %v3198_v3 = vsel %vm3012_vm12, %v3180_v40, 0.0  ;;  %v3200_v39 = vsel %vm3012_vm12, %v3181_v0, 0.0  ;;  %v3233_v45 = vld [vmem:[#allocation4] sm:$0xff]  ;;  %v3234_v49 = vld [vmem:[#allocation4 + $0x8] sm:$0xff]  ;;  %v3183_v48 = vld [vmem:[#allocation3 + $0x30] sm:$0xff]  ;;  %v3202_v31 = vsel %vm3012_vm12, %v3182_v60, 0.0 }
 0x49a   : > { %v3235_v52 = vld [vmem:[#allocation4 + $0x10] sm:$0xff]  ;;  %v3236_v56 = vld [vmem:[#allocation4 + $0x18] sm:$0xff]  ;;  %v3249_v14 = vsel %vm3012_vm12, %v3233_v45, 0.0  ;;  %v3250_v54 = vsel %vm3012_vm12, %v3234_v49, 0.0  ;;  %v3237_v50 = vld [vmem:[#allocation4 + $0x20] sm:$0xff]  ;;  %v3204_v9 = vsel %vm3012_vm12, %v3183_v48, 0.0  ;;  %v3488_v29 = vunpack.c.0.s8 %v6329_v17 }
 0x49b   : > { %v3197_v53 = vadd.f32 %v3196_v58, %v3195_v6  ;;  %v3251_v8 = vadd.f32 %v3250_v54, %v3249_v14  ;;  %v3252_v43 = vsel %vm3012_vm12, %v3235_v52, 0.0  ;;  %v3184_v22 = vld [vmem:[#allocation3 + $0x38] sm:$0xff]  ;;  %v3254_v34 = vsel %vm3012_vm12, %v3236_v56, 0.0  ;;  %v3238_v35 = vld [vmem:[#allocation4 + $0x28] sm:$0xff]  ;;  %v3185_v16 = vld [vmem:[#allocation3 + $0x40] sm:$0xff] }
 0x49c   : > { %v3256_v5 = vsel %vm3012_vm12, %v3237_v50, 0.0  ;;  %v3186_v20 = vld [vmem:[#allocation3 + $0x48] sm:$0xff]  ;;  %v3206_v42 = vsel %vm3012_vm12, %v3184_v22, 0.0  ;;  %v3239_v12 = vld [vmem:[#allocation4 + $0x30] sm:$0xff]  ;;  %v3188_v55 = vld [vmem:[#allocation3 + $0x58] sm:$0xff]  ;;  %v3258_v41 = vsel %vm3012_vm12, %v3238_v35, 0.0 }
 0x49d   : > { %v3199_v18 = vadd.f32 %v3198_v3, %v3197_v53  ;;  %v3253_v19 = vadd.f32 %v3252_v43, %v3251_v8  ;;  %v3187_v26 = vld [vmem:[#allocation3 + $0x50] sm:$0xff]  ;;  %v3289_v4 = vld [vmem:[#allocation2] sm:$0xff]  ;;  %v3208_v59 = vsel %vm3012_vm12, %v3185_v16, 0.0  ;;  %v3240_v37 = vld [vmem:[#allocation4 + $0x38] sm:$0xff]  ;;  %v3210_v27 = vsel %vm3012_vm12, %v3186_v20, 0.0 }
 0x49e   : > { %v3189_v24 = vld [vmem:[#allocation3 + $0x60] sm:$0xff]  ;;  %v3290_v10 = vld [vmem:[#allocation2 + $0x38] sm:$0xff]  ;;  %v3190_v11 = vld [vmem:[#allocation3 + $0x68] sm:$0xff]  ;;  %v3260_v33 = vsel %vm3012_vm12, %v3239_v12, 0.0  ;;  %v3212_v51 = vsel %vm3012_vm12, %v3187_v26, 0.0  ;;  %v3214_v15 = vsel %vm3012_vm12, %v3188_v55, 0.0 }
 0x49f   : > { %v3201_v23 = vadd.f32 %v3200_v39, %v3199_v18  ;;  %v3255_v38 = vadd.f32 %v3254_v34, %v3253_v19  ;;  %v3191_v25 = vld [vmem:[#allocation3 + $0x70] sm:$0xff]  ;;  %v3192_v57 = vld [vmem:[#allocation3 + $0x78] sm:$0xff]  ;;  %v3241_v61 = vld [vmem:[#allocation4 + $0x40] sm:$0xff]  ;;  %v3309_v28 = vrot.slane %v3289_v4, 4  ;;  %v3216_v2 = vsel %vm3012_vm12, %v3189_v24, 0.0 }
 0x4a0   : > { %v3242_v1 = vld [vmem:[#allocation4 + $0x48] sm:$0xff]  ;;  %v3291_v32 = vld [vmem:[#allocation2 + $0x50] sm:$0xff]  ;;  %v3262_v40 = vsel %vm3012_vm12, %v3240_v37, 0.0  ;;  %v3292_v7 = vld [vmem:[#allocation2 + $0x18] sm:$0xff]  ;;  %v3315_v58 = vrot.slane %v3290_v10, 4  ;;  %v3218_v0 = vsel %vm3012_vm12, %v3190_v11, 0.0 }
 0x4a1   : > { %v3203_v44 = vadd.f32 %v3202_v31, %v3201_v23  ;;  %v3257_v30 = vadd.f32 %v3256_v5, %v3255_v38  ;;  %v3293_v47 = vld [vmem:[#allocation2 + $0x30] sm:$0xff]  ;;  %v3220_v6 = vsel %vm3012_vm12, %v3191_v25, 0.0  ;;  %v6344_v3 = vsel %vm3012_vm12, %v3192_v57, 0.0  ;;  %v3294_v39 = vld [vmem:[#allocation2 + $0x68] sm:$0xff]  ;;  %v3244_v49 = vld [vmem:[#allocation4 + $0x58] sm:$0xff] }
 0x4a2   : > { %v3243_v60 = vld [vmem:[#allocation4 + $0x50] sm:$0xff]  ;;  %v3245_v48 = vld [vmem:[#allocation4 + $0x60] sm:$0xff]  ;;  %v3246_v18 = vld [vmem:[#allocation4 + $0x68] sm:$0xff]  ;;  %v3264_v52 = vsel %vm3012_vm12, %v3241_v61, 0.0  ;;  %v3266_v56 = vsel %vm3012_vm12, %v3242_v1, 0.0  ;;  %v3321_v14 = vrot.slane %v3291_v32, 4  ;;  %v3310_v8 = vmin.f32 %v3289_v4, %v3309_v28 }
 0x4a3   : > { %v3205_v13 = vadd.f32 %v3204_v9, %v3203_v44  ;;  %v3259_v62 = vadd.f32 %v3258_v41, %v3257_v30  ;;  %v3247_v54 = vld [vmem:[#allocation4 + $0x70] sm:$0xff]  ;;  %v3248_v31 = vld [vmem:[#allocation4 + $0x78] sm:$0xff]  ;;  %v3327_v43 = vrot.slane %v3292_v7, 4  ;;  %v3333_v22 = vrot.slane %v3293_v47, 4  ;;  %v3296_v38 = vld [vmem:[#allocation2 + $0x80] sm:$0xff] }
 0x4a4   : > { %v3268_v34 = vsel %vm3012_vm12, %v3243_v60, 0.0  ;;  %v3316_v9 = vmin.f32 %v3290_v10, %v3315_v58  ;;  %v3339_v35 = vrot.slane %v3294_v39, 4  ;;  %v3270_v16 = vsel %vm3012_vm12, %v3244_v49, 0.0  ;;  %v3295_v63 = vld [vmem:[#allocation2 + $0x78] sm:$0xff]  ;;  %v3297_v26 = vld [vmem:[#allocation2 + $0x8] sm:$0xff]  ;;  %v3300_v24 = vld [vmem:[#allocation2 + $0x40] sm:$0xff] }
 0x4a5   : > { %v3207_v21 = vadd.f32 %v3206_v42, %v3205_v13  ;;  %v3261_v53 = vadd.f32 %v3260_v33, %v3259_v62  ;;  %v3272_v44 = vsel %vm3012_vm12, %v3245_v48, 0.0  ;;  %v3274_v5 = vsel %vm3012_vm12, %v3246_v18, 0.0  ;;  %v3298_v55 = vld [vmem:[#allocation2 + $0x88] sm:$0xff] }
 0x4a6   : > { %v3276_v42 = vsel %vm3012_vm12, %v3247_v54, 0.0  ;;  %v3278_v12 = vsel %vm3012_vm12, %v3248_v31, 0.0  ;;  %v3322_v13 = vmin.f32 %v3291_v32, %v3321_v14  ;;  %v3299_v4 = vld [vmem:[#allocation2 + $0x28] sm:$0xff]  ;;  %v3328_v37 = vmin.f32 %v3292_v7, %v3327_v43 }
 0x4a7   : > { %v3209_v46 = vadd.f32 %v3208_v59, %v3207_v21  ;;  %v3263_v50 = vadd.f32 %v3262_v40, %v3261_v53  ;;  %v3311_v59 = vrot.slane %v3310_v8, 2  ;;  %v3334_v30 = vmin.f32 %v3293_v47, %v3333_v22  ;;  %v3301_v53 = vld [vmem:[#allocation2 + $0x58] sm:$0xff] }
 0x4a8   : > { %v3317_v11 = vrot.slane %v3316_v9, 2  ;;  %v3340_v25 = vmin.f32 %v3294_v39, %v3339_v35  ;;  %v3345_v57 = vrot.slane %v3295_v63, 4  ;;  %v3357_v33 = vrot.slane %v3297_v26, 4 }
 0x4a9   : > { %v3211_v45 = vadd.f32 %v3210_v27, %v3209_v46  ;;  %v3265_v19 = vadd.f32 %v3264_v52, %v3263_v50  ;;  %v3351_v27 = vrot.slane %v3296_v38, 4  ;;  %v3323_v61 = vrot.slane %v3322_v13, 2  ;;  %v3302_v50 = vld [vmem:[#allocation2 + $0x10] sm:$0xff] }
 0x4aa   : > { %v3369_v1 = vrot.slane %v3299_v4, 4  ;;  %v3375_v62 = vrot.slane %v3300_v24, 4  ;;  %v3312_v32 = vmin.f32 %v3310_v8, %v3311_v59  ;;  %v3329_v46 = vrot.slane %v3328_v37, 2 }
 0x4ab   : > { %v3213_v23 = vadd.f32 %v3212_v51, %v3211_v45  ;;  %v3267_v41 = vadd.f32 %v3266_v56, %v3265_v19  ;;  %v3363_v51 = vrot.slane %v3298_v55, 4  ;;  %v3335_v40 = vrot.slane %v3334_v30, 2 }
 0x4ac   : > { %v3318_v60 = vmin.f32 %v3316_v9, %v3317_v11  ;;  %v3341_v7 = vrot.slane %v3340_v25, 2  ;;  %v3346_v47 = vmin.f32 %v3295_v63, %v3345_v57  ;;  %v3352_v39 = vmin.f32 %v3296_v38, %v3351_v27  ;;  %v3304_v9 = vld [vmem:[#allocation2 + $0x60] sm:$0xff] }
 0x4ad   : > { %v3215_v20 = vadd.f32 %v3214_v15, %v3213_v23  ;;  %v3269_v21 = vadd.f32 %v3268_v34, %v3267_v41  ;;  %v3358_v45 = vmin.f32 %v3297_v26, %v3357_v33  ;;  %v3364_v49 = vmin.f32 %v3298_v55, %v3363_v51  ;;  %v3303_v34 = vld [vmem:[#allocation2 + $0x98] sm:$0xff]  ;;  %v3305_v51 = vld [vmem:[#allocation2 + $0x20] sm:$0xff] }
 0x4ae   : > { %v3324_v18 = vmin.f32 %v3322_v13, %v3323_v61  ;;  %v3376_v52 = vmin.f32 %v3300_v24, %v3375_v62  ;;  %v3313_v14 = vrot.slane %v3312_v32, 1  ;;  %v3330_v54 = vmin.f32 %v3328_v37, %v3329_v46 }
 0x4af   : > { %v3217_v10 = vadd.f32 %v3216_v2, %v3215_v20  ;;  %v3271_v28 = vadd.f32 %v3270_v16, %v3269_v21  ;;  %v3336_v31 = vmin.f32 %v3334_v30, %v3335_v40  ;;  %v3342_v8 = vmin.f32 %v3340_v25, %v3341_v7 }
 0x4b0   : > { %v3347_v43 = vrot.slane %v3346_v47, 2  ;;  %v3381_v22 = vrot.slane %v3301_v53, 4  ;;  %v3353_v35 = vrot.slane %v3352_v39, 2  ;;  %v3359_v19 = vrot.slane %v3358_v45, 2 }
 0x4b1   : > { %v3219_v15 = vadd.f32 %v3218_v0, %v3217_v10  ;;  %v3273_v2 = vadd.f32 %v3272_v44, %v3271_v28  ;;  %v3370_v0 = vmin.f32 %v3299_v4, %v3369_v1  ;;  %v3365_v16 = vrot.slane %v3364_v49, 2 }
 0x4b2   : > { %v3377_v63 = vrot.slane %v3376_v52, 2  ;;  %v3382_v20 = vmin.f32 %v3301_v53, %v3381_v22  ;;  %v6355_v38 = vmin.f32 %v3312_v32, %v3313_v14  ;;  %v3331_v26 = vrot.slane %v3330_v54, 1 }
 0x4b3   : > { %v3221_v58 = vadd.f32 %v3220_v6, %v3219_v15  ;;  %v3275_v56 = vadd.f32 %v3274_v5, %v3273_v2  ;;  %v3319_v6 = vrot.slane %v3318_v60, 1  ;;  %v3371_v44 = vrot.slane %v3370_v0, 2  ;;  %v3306_v15 = vld [vmem:[#allocation2 + $0x48] sm:$0xff] }
 0x4b4   : > { %v3387_v55 = vrot.slane %v3302_v50, 4  ;;  %v3348_v13 = vmin.f32 %v3346_v47, %v3347_v43  ;;  %v3383_v41 = vrot.slane %v3382_v20, 2  ;;  %v3393_v4 = vrot.slane %v3303_v34, 4 }
 0x4b5   : > { %v3223_v48 = vadd.f32 %v6344_v3, %v3221_v58  ;;  %v3277_v23 = vadd.f32 %v3276_v42, %v3275_v56  ;;  %v3325_v3 = vrot.slane %v3324_v18, 1  ;;  %v3399_v24 = vrot.slane %v3304_v9, 4 }
 0x4b6   : > { %v3354_v42 = vmin.f32 %v3352_v39, %v3353_v35  ;;  %v3360_v59 = vmin.f32 %v3358_v45, %v3359_v19  ;;  %v3366_v37 = vmin.f32 %v3364_v49, %v3365_v16  ;;  %v3388_v30 = vmin.f32 %v3302_v50, %v3387_v55 }
 0x4b7   : > { %3224 = vadd.xlane.f32.xlu0 %v3223_v48  ;;  %v3279_v5 = vadd.f32 %v3278_v12, %v3277_v23  ;;  %v3372_v10 = vmin.f32 %v3370_v0, %v3371_v44  ;;  %v3378_v11 = vmin.f32 %v3376_v52, %v3377_v63  ;;  %v3394_v25 = vmin.f32 %v3303_v34, %v3393_v4  ;;  %v3307_v48 = vld [vmem:[#allocation2 + $0x70] sm:$0xff] }
 0x4b8   : > { %v3400_v57 = vmin.f32 %v3304_v9, %v3399_v24  ;;  %v6357_v21 = vmin.f32 %v3318_v60, %v3319_v6  ;;  %v3337_v12 = vrot.slane %v3336_v31, 1  ;;  %v3343_v27 = vrot.slane %v3342_v8, 1  ;;  %v3308_v0 = vld [vmem:[#allocation2 + $0x90] sm:$0xff] }
 0x4b9   : > { %v3389_v33 = vrot.slane %v3388_v30, 2  ;;  %v3349_v61 = vrot.slane %v3348_v13, 1  ;;  %v3384_v1 = vmin.f32 %v3382_v20, %v3383_v41  ;;  %v3395_v62 = vrot.slane %v3394_v25, 2 }
 0x4ba   : > { %v3401_v28 = vrot.slane %v3400_v57, 2  ;;  %v3355_v32 = vrot.slane %v3354_v42, 1  ;;  %v3361_v46 = vrot.slane %v3360_v59, 1  ;;  %v3367_v40 = vrot.slane %v3366_v37, 1 }
 0x4bb   : > { %3280 = vadd.xlane.f32.xlu0 %v3279_v5  ;;  %v3390_v58 = vmin.f32 %v3388_v30, %v3389_v33  ;;  %v3373_v7 = vrot.slane %v3372_v10, 1  ;;  %v3379_v47 = vrot.slane %v3378_v11, 1  ;;  %v3396_v2 = vmin.f32 %v3394_v25, %v3395_v62 }
 0x4bc   : > { %v3402_v53 = vmin.f32 %v3400_v57, %v3401_v28  ;;  %v3326_v39 = vmin.f32 %v3324_v18, %v3325_v3  ;;  %v3332_v60 = vmin.f32 %v3330_v54, %v3331_v26  ;;  %v3405_v45 = vrot.slane %v3305_v51, 4  ;;  %v4196_v28 = vld [vmem:[%s6562_s1 + $0x6] ss:$8 sm:$0xf] }
 0x4bd   : > { %v3411_v49 = vrot.slane %v3306_v15, 4  ;;  %v3338_v52 = vmin.f32 %v3336_v31, %v3337_v12  ;;  %v3385_v56 = vrot.slane %v3384_v1, 1  ;;  %v3391_v14 = vrot.slane %v3390_v58, 1 }
 0x4be   : > { %v3397_v50 = vrot.slane %v3396_v2, 1  ;;  %v3344_v6 = vmin.f32 %v3342_v8, %v3343_v27  ;;  %v3350_v43 = vmin.f32 %v3348_v13, %v3349_v61  ;;  %v3356_v22 = vmin.f32 %v3354_v42, %v3355_v32 }
 0x4bf   : > { %v3403_v23 = vrot.slane %v3402_v53, 1  ;;  %v3362_v34 = vmin.f32 %v3360_v59, %v3361_v46  ;;  %v3368_v9 = vmin.f32 %v3366_v37, %v3367_v40  ;;  %v3374_v35 = vmin.f32 %v3372_v10, %v3373_v7  ;;  %v4197_v40 = vld [vmem:[%s6562_s1 + $0x6] ss:$8 sm:$0xf0] }
 0x4c0   : > { %v3380_v19 = vmin.f32 %v3378_v11, %v3379_v47  ;;  %v3406_v16 = vmin.f32 %v3305_v51, %v3405_v45  ;;  %v3412_v44 = vmin.f32 %v3306_v15, %v3411_v49  ;;  %v3417_v18 = vrot.slane %v3307_v48, 4 }
 0x4c1   : > { %v3423_v54 = vrot.slane %v3308_v0, 4  ;;  %v3386_v3 = vmin.f32 %v3384_v1, %v3385_v56  ;;  %v3392_v63 = vmin.f32 %v3390_v58, %v3391_v14  ;;  %v3398_v20 = vmin.f32 %v3396_v2, %v3397_v50 }
 0x4c2   : > { %v3429_v31 = vmax.f32 %v6355_v38, 0.0  ;;  %v3404_v5 = vmin.f32 %v3402_v53, %v3403_v23  ;;  %v3430_v26 = vmax.f32 %v6357_v21, 0.0  ;;  %v3431_v8 = vmax.f32 %v3326_v39, 0.0 }
 0x4c3   : > { %v3432_v55 = vmax.f32 %v3332_v60, 0.0  ;;  %v3433_v13 = vmax.f32 %v3338_v52, 0.0  ;;  %v3434_v41 = vmax.f32 %v3344_v6, 0.0  ;;  %v3435_v4 = vmax.f32 %v3350_v43, 0.0 }
 0x4c4   : > { %v3436_v24 = vmax.f32 %v3356_v22, 0.0  ;;  %v3407_v42 = vrot.slane %v3406_v16, 2  ;;  %v3418_v59 = vmin.f32 %v3307_v48, %v3417_v18  ;;  %v3424_v37 = vmin.f32 %v3308_v0, %v3423_v54 }
 0x4c5   : > { %v3437_v30 = vmax.f32 %v3362_v34, 0.0  ;;  %v3438_v10 = vmax.f32 %v3368_v9, 0.0  ;;  %v3439_v11 = vmax.f32 %v3374_v35, 0.0  ;;  %v3440_v25 = vmax.f32 %v3380_v19, 0.0 }
 0x4c6   : > { %v3441_v57 = vmax.f32 %v3386_v3, 0.0  ;;  %v3442_v12 = vmax.f32 %v3392_v63, 0.0  ;;  %v3443_v27 = vmax.f32 %v3398_v20, 0.0  ;;  %v3444_v38 = vmax.f32 %v3404_v5, 0.0 }
 0x4c7   : > { %v3482_v33 = vcombine.low %v3429_v31, %v3430_v26  ;;  %v3483_v51 = vcombine.low %v3431_v8, %v3432_v55  ;;  %v3484_v21 = vcombine.low %v3433_v13, %v3434_v41  ;;  %v3485_v15 = vcombine.low %v3435_v4, %v3436_v24  ;;  %v4198_v3 = vld [vmem:[%s6562_s1 + $0x46] ss:$8 sm:$0xf] }
 0x4c8   : > { %v6362_v61 = vshrl.u32 %v3489_v36, 7  ;;  %v3413_v1 = vrot.slane %v3412_v44, 2  ;;  %v3419_v62 = vrot.slane %v3418_v59, 2  ;;  %v3408_v32 = vmin.f32 %v3406_v16, %v3407_v42  ;;  %v4199_v5 = vld [vmem:[%s6562_s1 + $0x46] ss:$8 sm:$0xf0] }
 0x4c9   : > { %v3425_v46 = vrot.slane %v3424_v37, 2  ;;  %v3531_v7 = vcombine.low %v3437_v30, %v3438_v10  ;;  %v3532_v36 = vcombine.low %v3439_v11, %v3440_v25  ;;  %v3533_v47 = vcombine.low %v3441_v57, %v3442_v12 }
 0x4ca   : > { %v6373_v58 = vsub.s32 %v3488_v29, %v6362_v61  ;;  %v3534_v2 = vcombine.low %v3443_v27, %v3444_v38  ;;  %v3414_v49 = vmin.f32 %v3412_v44, %v3413_v1  ;;  %v3420_v48 = vmin.f32 %v3418_v59, %v3419_v62 }
 0x4cb   : > { %v3452_v0 = vor.u32 %v4197_v40, %v4196_v28  ;;  %v3426_v52 = vmin.f32 %v3424_v37, %v3425_v46  ;;  %v3409_v43 = vrot.slane %v3408_v32, 1  ;;  %v6390_v16 = vsub.s32 0, %v6362_v61 }
 0x4cc   : > { %v3492_v53 = vrot.slane %v3482_v33, %v6373_v58  ;;  %v3499_v39 = vrot.slane %v3483_v51, %v6373_v58  ;;  %v3506_v60 = vrot.slane %v3484_v21, %v6373_v58  ;;  %v3513_v45 = vrot.slane %v3485_v15, %v6373_v58 }
 0x4cd   : > { %v3541_v29 = vrot.slane %v3531_v7, %v6373_v58  ;;  %v3548_v14 = vrot.slane %v3532_v36, %v6373_v58  ;;  %v3555_v50 = vrot.slane %v3533_v47, %v6373_v58  ;;  %v3562_v6 = vrot.slane %v3534_v2, %v6373_v58 }
 0x4ce   : > { %v3514_v56 = vcombine.low %v3492_v53, %v3499_v39  ;;  %v3515_v17 = vcombine.low %v3506_v60, %v3513_v45  ;;  %v3415_v34 = vrot.slane %v3414_v49, 1  ;;  %v3421_v9 = vrot.slane %v3420_v48, 1 }
 0x4cf   : > { %vm6385_vm14 = vcmp.gt.f32.partialorder %v3452_v0, 0.5  ;;  %v6393_v44 = vsub.s32 1, %v6362_v61  ;;  %v6396_v18 = vsub.s32 2, %v6362_v61  ;;  %v3427_v54 = vrot.slane %v3426_v52, 1 }
 0x4d0   : > { %v3522_v22 = vrot.slane %v3514_v56, %v6373_v58  ;;  %v3529_v23 = vrot.slane %v3515_v17, %v6373_v58  ;;  %v3563_v63 = vcombine.low %v3541_v29, %v3548_v14  ;;  %v3564_v20 = vcombine.low %v3555_v50, %v3562_v6 }
 0x4d1   : > { %v3410_v31 = vmin.f32 %v3408_v32, %v3409_v43  ;;  %v6407_v8 = vsub.s32 3, %v6362_v61  ;;  %v3416_v55 = vmin.f32 %v3414_v49, %v3415_v34  ;;  %v3422_v13 = vmin.f32 %v3420_v48, %v3421_v9 }
 0x4d2   : > { %v3530_v19 = vcombine.low %v3522_v22, %v3529_v23  ;;  %v6413_v42 = vsub.s32 4, %v6362_v61  ;;  %v3428_v59 = vmin.f32 %v3426_v52, %v3427_v54  ;;  %v3456_v37 = vor.u32 %v4199_v5, %v4198_v3 }
 0x4d3   : > { %v3571_v30 = vrot.slane %v3563_v63, %v6373_v58  ;;  %v3578_v10 = vrot.slane %v3564_v20, %v6373_v58  ;;  %v3445_v11 = vmax.f32 %v3410_v31, 0.0  ;;  %v6419_v57 = vsub.s32 5, %v6362_v61 }
 0x4d4   : > { %v3607_v26 = vsel %vm6385_vm14, %v3530_v19, 0.0  ;;  %v3446_v12 = vmax.f32 %v3416_v55, 0.0  ;;  %v3447_v27 = vmax.f32 %v3422_v13, 0.0  ;;  %v6422_v38 = vsub.s32 6, %v6362_v61 }
 0x4d5   : > { %v3616_v41 = vrot.slane %v3607_v26, %v6390_v16  ;;  %v3620_v4 = vrot.slane %v3607_v26, %v6393_v44  ;;  %v3624_v24 = vrot.slane %v3607_v26, %v6396_v18  ;;  %v3628_v25 = vrot.slane %v3607_v26, %v6407_v8 }
 0x4d6   : > { %v3632_v33 = vrot.slane %v3607_v26, %v6413_v42  ;;  %v3448_v1 = vmax.f32 %v3428_v59, 0.0  ;;  %vm6428_vm0 = vcmp.gt.f32.partialorder %v3456_v37, 0.5  ;;  %v3579_v28 = vcombine.low %v3571_v30, %v3578_v10 }
 0x4d7   : > { %v3714_v51 = vsel %vm3713_vm15, %v3616_v41, 0.0  ;;  %v3715_v21 = vsel %vm3713_vm15, %v3620_v4, 0.0  ;;  %v3717_v15 = vsel %vm3713_vm15, %v3624_v24, 0.0  ;;  %v3636_v46 = vrot.slane %v3607_v26, %v6419_v57  ;;  %v4200_v24 = vld [vmem:[%s6562_s1 + $0x86] ss:$8 sm:$0xf] }
 0x4d8   : > { %v3716_v32 = vadd.f32 %v3715_v21, %v3714_v51  ;;  %v6434_v40 = vsub.s32 7, %v6362_v61  ;;  %v3719_v7 = vsel %vm3713_vm15, %v3628_v25, 0.0  ;;  %v4420_v36 = vmov 0.0  }
 0x4d9   : > { %v4201_v47 = vsel %vm6385_vm14, 1.0, %v4420_v36  ;;  %v3580_v53 = vcombine.low %v3445_v11, %v3446_v12  ;;  %v3640_v39 = vrot.slane %v3607_v26, %v6422_v38  ;;  %v3721_v60 = vsel %vm3713_vm15, %v3632_v33, 0.0 }
 0x4da   : > { %v3718_v2 = vadd.f32 %v3717_v15, %v3716_v32  ;;  %v3581_v45 = vcombine.low %v3447_v27, %v3448_v1  ;;  %v6444_v49 = vsel %vm6428_vm0, %v3579_v28, 0.0  ;;  %v3774_v48 = vrot.slane %v4201_v47, %v6390_v16 }
 0x4db   : > { %v3644_v0 = vrot.slane %v3607_v26, %v6434_v40  ;;  %v3723_v52 = vsel %vm3713_vm15, %v3636_v46, 0.0  ;;  %v3778_v56 = vrot.slane %v4201_v47, %v6393_v44  ;;  %v3782_v17 = vrot.slane %v4201_v47, %v6396_v18 }
 0x4dc   : > { %v3720_v61 = vadd.f32 %v3719_v7, %v3718_v2  ;;  %v3588_v14 = vrot.slane %v3580_v53, %v6373_v58  ;;  %v3648_v50 = vrot.slane %v6444_v49, %v6390_v16  ;;  %v3725_v6 = vsel %vm3713_vm15, %v3640_v39, 0.0 }
 0x4dd   : > { %v3786_v43 = vrot.slane %v4201_v47, %v6407_v8  ;;  %v3595_v22 = vrot.slane %v3581_v45, %v6373_v58  ;;  %v3652_v23 = vrot.slane %v6444_v49, %v6393_v44  ;;  %v3790_v9 = vrot.slane %v4201_v47, %v6413_v42 }
 0x4de   : > { %v3722_v29 = vadd.f32 %v3721_v60, %v3720_v61  ;;  %v3727_v35 = vsel %vm3713_vm15, %v3644_v0, 0.0  ;;  %v3871_v19 = vsel %vm3713_vm15, %v3774_v48, 0.0  ;;  %v3872_v54 = vsel %vm3713_vm15, %v3778_v56, 0.0 }
 0x4df   : > { %v3874_v3 = vsel %vm3713_vm15, %v3782_v17, 0.0  ;;  %v3873_v20 = vadd.f32 %v3872_v54, %v3871_v19  ;;  %v3656_v31 = vrot.slane %v6444_v49, %v6396_v18  ;;  %v3729_v5 = vsel %vm3713_vm15, %v3648_v50, 0.0 }
 0x4e0   : > { %v3724_v34 = vadd.f32 %v3723_v52, %v3722_v29  ;;  %v3794_v26 = vrot.slane %v4201_v47, %v6419_v57  ;;  %v3876_v55 = vsel %vm3713_vm15, %v3786_v43, 0.0  ;;  %v3596_v13 = vcombine.low %v3588_v14, %v3595_v22 }
 0x4e1   : > { %v3875_v4 = vadd.f32 %v3874_v3, %v3873_v20  ;;  %v3660_v59 = vrot.slane %v6444_v49, %v6407_v8  ;;  %v3731_v37 = vsel %vm3713_vm15, %v3652_v23, 0.0  ;;  %v3798_v30 = vrot.slane %v4201_v47, %v6422_v38 }
 0x4e2   : > { %v3726_v63 = vadd.f32 %v3725_v6, %v3724_v34  ;;  %v3878_v10 = vsel %vm3713_vm15, %v3790_v9, 0.0  ;;  %v6480_v25 = vsel %vm6428_vm0, 1.0, %v4420_v36  ;;  %v3664_v27 = vrot.slane %v6444_v49, %v6413_v42 }
 0x4e3   : > { %v3877_v12 = vadd.f32 %v3876_v55, %v3875_v4  ;;  %v3733_v33 = vsel %vm3713_vm15, %v3656_v31, 0.0  ;;  %v3802_v51 = vrot.slane %v4201_v47, %v6434_v40  ;;  %v3880_v21 = vsel %vm3713_vm15, %v3794_v26, 0.0 }
 0x4e4   : > { %v3728_v41 = vadd.f32 %v3727_v35, %v3726_v63  ;;  %vm3461_vm1 = vcmp.gt.f32.partialorder %v4200_v24, 0.5  ;;  %v3603_v15 = vrot.slane %v3596_v13, %v6373_v58  ;;  %v3668_v62 = vrot.slane %v6444_v49, %v6419_v57 }
 0x4e5   : > { %v3879_v28 = vadd.f32 %v3878_v10, %v3877_v12  ;;  %v3735_v32 = vsel %vm3713_vm15, %v3660_v59, 0.0  ;;  %v3806_v46 = vrot.slane %v6480_v25, %v6390_v16  ;;  %v3882_v7 = vsel %vm3713_vm15, %v3798_v30, 0.0 }
 0x4e6   : > { %v3730_v11 = vadd.f32 %v3729_v5, %v3728_v41  ;;  %v3672_v47 = vrot.slane %v6444_v49, %v6422_v38  ;;  %v3737_v39 = vsel %vm3713_vm15, %v3664_v27, 0.0  ;;  %v3810_v58 = vrot.slane %v6480_v25, %v6393_v44 }
 0x4e7   : > { %v3881_v53 = vadd.f32 %v3880_v21, %v3879_v28  ;;  %v3884_v60 = vsel %vm3713_vm15, %v3802_v51, 0.0  ;;  %v3609_v45 = vsel %vm3461_vm1, %v3603_v15, 0.0  ;;  %v3676_v0 = vrot.slane %v6444_v49, %v6434_v40 }
 0x4e8   : > { %v3732_v1 = vadd.f32 %v3731_v37, %v3730_v11  ;;  %v3739_v52 = vsel %vm3713_vm15, %v3668_v62, 0.0  ;;  %v3814_v56 = vrot.slane %v6480_v25, %v6396_v18  ;;  %v3886_v17 = vsel %vm3713_vm15, %v3806_v46, 0.0 }
 0x4e9   : > { %v3883_v48 = vadd.f32 %v3882_v7, %v3881_v53  ;;  %v3680_v50 = vrot.slane %v3609_v45, %v6390_v16  ;;  %v3741_v6 = vsel %vm3713_vm15, %v3672_v47, 0.0  ;;  %v3818_v43 = vrot.slane %v6480_v25, %v6407_v8 }
 0x4ea   : > { %v3734_v2 = vadd.f32 %v3733_v33, %v3732_v1  ;;  %v3888_v22 = vsel %vm3713_vm15, %v3810_v58, 0.0  ;;  %v3684_v34 = vrot.slane %v3609_v45, %v6393_v44  ;;  %v3743_v9 = vsel %vm3713_vm15, %v3676_v0, 0.0 }
 0x4eb   : > { %v3885_v14 = vadd.f32 %v3884_v60, %v3883_v48  ;;  %v3822_v35 = vrot.slane %v6480_v25, %v6413_v42  ;;  %v3890_v19 = vsel %vm3713_vm15, %v3814_v56, 0.0  ;;  %v3688_v63 = vrot.slane %v3609_v45, %v6396_v18 }
 0x4ec   : > { %v3736_v61 = vadd.f32 %v3735_v32, %v3734_v2  ;;  %v3745_v20 = vsel %vm3713_vm15, %v3680_v50, 0.0  ;;  %v3826_v31 = vrot.slane %v6480_v25, %v6419_v57  ;;  %v3892_v5 = vsel %vm3713_vm15, %v3818_v43, 0.0 }
 0x4ed   : > { %v3887_v49 = vadd.f32 %v3886_v17, %v3885_v14  ;;  %v3692_v13 = vrot.slane %v3609_v45, %v6407_v8  ;;  %v3747_v41 = vsel %vm3713_vm15, %v3684_v34, 0.0  ;;  %v3830_v42 = vrot.slane %v6480_v25, %v6422_v38 }
 0x4ee   : > { %v3738_v29 = vadd.f32 %v3737_v39, %v3736_v61  ;;  %v3894_v4 = vsel %vm3713_vm15, %v3822_v35, 0.0  ;;  %v4203_v37 = vsel %vm3461_vm1, 1.0, %v4420_v36  ;;  %v3749_v57 = vsel %vm3713_vm15, %v3688_v63, 0.0 }
 0x4ef   : > { %v3889_v3 = vadd.f32 %v3888_v22, %v3887_v49  ;;  %v3834_v10 = vrot.slane %v6480_v25, %v6434_v40  ;;  %v3896_v11 = vsel %vm3713_vm15, %v3826_v31, 0.0  ;;  %v3751_v33 = vsel %vm3713_vm15, %v3692_v13, 0.0 }
 0x4f0   : > { %v3740_v23 = vadd.f32 %v3739_v52, %v3738_v29  ;;  %v3838_v38 = vrot.slane %v4203_v37, %v6390_v16  ;;  %v3898_v51 = vsel %vm3713_vm15, %v3830_v42, 0.0  ;;  %v3842_v36 = vrot.slane %v4203_v37, %v6393_v44 }
 0x4f1   : > { %v3891_v55 = vadd.f32 %v3890_v19, %v3889_v3  ;;  %v3900_v24 = vsel %vm3713_vm15, %v3834_v10, 0.0  ;;  %v3846_v40 = vrot.slane %v4203_v37, %v6396_v18  ;;  %v3850_v32 = vrot.slane %v4203_v37, %v6407_v8 }
 0x4f2   : > { %v3742_v54 = vadd.f32 %v3741_v6, %v3740_v23  ;;  %v3902_v25 = vsel %vm3713_vm15, %v3838_v38, 0.0  ;;  %v3904_v16 = vsel %vm3713_vm15, %v3842_v36, 0.0 }
 0x4f3   : > { %v3893_v30 = vadd.f32 %v3892_v5, %v3891_v55  ;;  %v3906_v7 = vsel %vm3713_vm15, %v3846_v40, 0.0  ;;  %v3908_v44 = vsel %vm3713_vm15, %v3850_v32, 0.0 }
 0x4f4   : > { %v3744_v26 = vadd.f32 %v3743_v9, %v3742_v54 }
 0x4f5   : > { %v3895_v27 = vadd.f32 %v3894_v4, %v3893_v30 }
 0x4f6   : > { %v3746_v59 = vadd.f32 %v3745_v20, %v3744_v26 }
 0x4f7   : > { %v3897_v15 = vadd.f32 %v3896_v11, %v3895_v27 }
 0x4f8   : > { %v3748_v12 = vadd.f32 %v3747_v41, %v3746_v59 }
 0x4f9   : > { %v3899_v28 = vadd.f32 %v3898_v51, %v3897_v15 }
 0x4fa   : > { %v3750_v21 = vadd.f32 %v3749_v57, %v3748_v12 }
 0x4fb   : > { %v3901_v62 = vadd.f32 %v3900_v24, %v3899_v28 }
 0x4fc   : > { %v3752_v1 = vadd.f32 %v3751_v33, %v3750_v21 }
 0x4fd   : > { %v3903_v46 = vadd.f32 %v3902_v25, %v3901_v62 }
 0x4fe   : > { %3753 = vadd.xlane.f32.xlu1 %v3752_v1 }
 0x4ff   : > { %v3905_v2 = vadd.f32 %v3904_v16, %v3903_v46 }
 0x501   : > { %v3907_v53 = vadd.f32 %v3906_v7, %v3905_v2 }
 0x503   : > { %v3909_v47 = vadd.f32 %v3908_v44, %v3907_v53 }
 0x505   : > { %3910 = vadd.xlane.f32.xlu1 %v3909_v47 }
 0x540   : > { %v3225_v39 = vpop.xlane.xlu0 %3224 }
 0x541   : > { %v3226_v58 = vrot.slane %v3225_v39, 4 }
 0x543   : > { %v3227_v18 = vadd.f32 %v3226_v58, %v3225_v39 }
 0x544   : > { %v3281_v45 = vpop.xlane.xlu0 %3280 }
 0x545   : > { %v3228_v60 = vrot.slane %v3227_v18, 2  ;;  %v3282_v61 = vrot.slane %v3281_v45, 4 }
 0x547   : > { %v3229_v48 = vadd.f32 %v3228_v60, %v3227_v18  ;;  %v3283_v0 = vadd.f32 %v3282_v61, %v3281_v45 }
 0x549   : > { %v3230_v8 = vrot.slane %v3229_v48, 1  ;;  %v3284_v52 = vrot.slane %v3283_v0, 2 }
 0x54b   : > { %v3231_v56 = vadd.f32 %v3230_v8, %v3229_v48  ;;  %v3285_v17 = vadd.f32 %v3284_v52, %v3283_v0 }
 0x54d   : > { %4223 = vpush %v3231_v56  ;;  %v3286_v29 = vrot.slane %v3285_v17, 1 }
 0x54f   : > { %v3287_v14 = vadd.f32 %v3286_v29, %v3285_v17 }
 0x551   : > { %4225 = vpush %v3287_v14 }
 0x57e   : > { %s6544_s20 = spop %4223 }
 0x582   : > { %s6546_s21 = spop %4225 }
 0x583   : > { %s3919_s23 = smax.f32 %s4421_s22, %s6546_s21  ;;  %p3930_p9 = scmp.gt.f32.partialorder %s6546_s21, 0.0 }
 0x584   : > { %v3920_v23 = vstv %s3919_s23 }
 0x585   : > { %4358 = vrcp.f32 %v3920_v23 }
 0x587   : > { %v3754_v50 = vpop.xlane.xlu1 %3753 }
 0x588   : > { %v3755_v6 = vrot.slane %v3754_v50, 4 }
 0x58a   : > { %v3756_v43 = vadd.f32 %v3755_v6, %v3754_v50 }
 0x58c   : > { %v3757_v22 = vrot.slane %v3756_v43, 2 }
 0x58e   : > { %v3758_v49 = vadd.f32 %v3757_v22, %v3756_v43  ;;  %v3911_v9 = vpop.xlane.xlu1 %3910 }
 0x58f   : > { %v3912_v35 = vrot.slane %v3911_v9, 4 }
 0x590   : > { %v3759_v34 = vrot.slane %v3758_v49, 1 }
 0x591   : > { %v3913_v54 = vadd.f32 %v3912_v35, %v3911_v9 }
 0x592   : > { %v3760_v19 = vadd.f32 %v3759_v34, %v3758_v49  ;;  %v4359_v31 = vpop.eup %4358 }
 0x593   : > { %v3914_v3 = vrot.slane %v3913_v54, 2 }
 0x594   : > { %4227 = vpush %v3760_v19 }
 0x595   : > { %v3915_v63 = vadd.f32 %v3914_v3, %v3913_v54 }
 0x597   : > { %v3916_v20 = vrot.slane %v3915_v63, 1 }
 0x599   : > { %v3917_v5 = vadd.f32 %v3916_v20, %v3915_v63 }
 0x59b   : > { %4229 = vpush %v3917_v5 }
 0x59c   : > { %4231 = vpush %v4359_v31 }
 0x5c5   : > { %s4228_s25 = spop %4227 }
 0x5cc   : > { %s4230_s26 = spop %4229 }
 0x5cd   : > { %s3924_s27 = smax.f32 %s4421_s22, %s4230_s26  ;;  %s4232_s28 = spop %4231 }
 0x5ce   : > { %v3925_v26 = vstv %s3924_s27  ;;  %p3931_p8 = scmp.gt.f32.partialorder %s4230_s26, 0.0  ;;  %s3923_s29 = smul.f32 %s4232_s28, %s6544_s20 }
 0x5cf   : > { %4360 = vrcp.f32 %v3925_v26 }
 0x5d0   : > { %p3932_p10 = pnand %p3931_p8, %p3930_p9 }
 0x5dc   : > { %v4361_v55 = vpop.eup %4360 }
 0x5dd   : > { %4233 = vpush %v4361_v55 }
 0x60e   : > { %s4234_s30 = spop %4233 }
 0x60f   : > { %s3928_s6 = smul.f32 %s4234_s30, %s4228_s25 }
 0x611   : > { %s3929_s7 = sadd.f32 %s3928_s6, %s3923_s29 }
 0x613   : > { %s6654_s7 = smov (%p3932_p10, %s3929_s7), 0.0 }
 0x614   : > { %3936 = sst [smem:[#allocation5]] %s6654_s7 }
 0x615 PF: > { %p4243_p11 = scmp.eq.s32.totalorder %s4460_s19, 18  ;;  %s4422_s8 = smov [#allocation5]  }
 0x616   : > { %s4423_s10 = smov [#allocation7]  }
 0x617   : > { %4236 = dma.smem_to_hbm (%p4243_p11), %s4422_s8, 16, %s6565_s4, [#allocation6]  }
 0x618   : > { %4238 = dma.smem_to_hbm (%p4243_p11), %s4423_s10, 16, %s6566_s5, [#allocation8]  }
 0x619   : > { %4403 = dma.done.wait (%p4243_p11), [#allocation6], 16  }
 0x61a   : > { %4405 = vsyncadd (%p4243_p11), [#allocation6], 4294967280 }
 0x61b   : > { %4407 = dma.done.wait (%p4243_p11), [#allocation8], 16  }
 0x61c   : > { %4409 = vsyncadd (%p4243_p11), [#allocation8], 4294967280 }
 0x61d   : > { %3963 = sfence }
 0x61e PF: > { %s18_s18 = sadd.s32 1, %s4412_s18  }
 0x61f   : > { %p15_p12 = scmp.ge.s32.totalorder %s18_s18, 21  }
 0x621   :  { %17 = sbr.rel (!%p15_p12) target bundleno = 2 (0x2), region = 84 }
 0x626   :  { %3969 = vsyncpa [#allocation6], 1 }
 0x627   :  { %3971 = vsyncpa [#allocation6 + $0x1], 1 }
 0x628   :  { %3972 = vsyncpa [#allocation8], 1 }

</bundles_post_ra>
